<compile_context>
chip_gen: v6e
topology: v6e:2x2x1
jax: 0.10.0
libtpu: 0.0.40
codegen_flags: <defaults>
</compile_context>

<pallas_src>
import functools
import math

import jax
import jax.numpy as jnp
from jax.experimental import pallas as pl
from jax.experimental.pallas import tpu as pltpu

_VMEM_LIMIT = 48 * 1024 * 1024


def _compiler_params(n_parallel_axes):
    return pltpu.CompilerParams(
        dimension_semantics=("parallel",) * n_parallel_axes,
        vmem_limit_bytes=_VMEM_LIMIT,
    )


# --------------------------------------------------------------------------------------
# Kernel A / C:  WithBias LayerNorm  +  1x1 conv  +  depthwise 3x3 conv  (fused)
# --------------------------------------------------------------------------------------
def _ln_conv1x1_dw3x3_kernel(x_ref, lnw_ref, lnb_ref, w_ref, wdw_ref, mask_ref, o_ref,
                             *, H, W):
    """x_ref:(1,Cin,HW)  lnw/lnb:(Cin,1)  w_ref:(Cout,Cin)  wdw_ref:(9,Cout,1)
       mask_ref:(9,1,HW)  o_ref:(1,Cout,HW)"""
    HW = H * W
    x = x_ref[0]                                              # (Cin, HW)

    # WithBias LayerNorm over the channel (sublane) axis == torch LN over last dim
    # of the (B, HW, C) layout.  unbiased=False variance, eps=1e-5.
    mu = jnp.mean(x, axis=0, keepdims=True)
    xc = x - mu
    var = jnp.mean(xc * xc, axis=0, keepdims=True)
    xn = xc * jax.lax.rsqrt(var + 1e-5) * lnw_ref[...] + lnb_ref[...]

    # 1x1 conv as a channels-first matmul: (Cout, Cin) @ (Cin, HW) -> lane-dense out.
    y = jnp.dot(w_ref[...], xn, preferred_element_type=jnp.float32)

    # Depthwise 3x3, 'same' zero padding, done on the (Cout, HW) slab: a (dy, dx)
    # spatial shift is a lane roll by dy*W + dx; positions that would have read the
    # zero padding are killed by the precomputed 0/1 border mask.
    acc = y * wdw_ref[4]                                      # center tap (dy=dx=0)
    for dy in (-1, 0, 1):
        for dx in (-1, 0, 1):
            if dy == 0 and dx == 0:
                continue
            tap = (dy + 1) * 3 + (dx + 1)
            shift = (-(dy * W + dx)) % HW
            shifted = pltpu.roll(y, shift=shift, axis=1)      # shifted[:,p] = y[:,p+dy*W+dx]
            acc = acc + shifted * mask_ref[tap] * wdw_ref[tap]

    o_ref[...] = acc[None].astype(o_ref.dtype)


def _dw_border_masks(H, W, dtype):
    """(9, 1, HW) 0/1 masks: tap (dy, dx) is valid at pixel (i, j) iff (i+dy, j+dx)
    lies inside the image (i.e. the tap did not read the zero padding)."""
    ii = jnp.arange(H * W, dtype=jnp.int32) // W
    jj = jnp.arange(H * W, dtype=jnp.int32) % W
    masks = []
    for dy in (-1, 0, 1):
        for dx in (-1, 0, 1):
            m = ((ii + dy >= 0) & (ii + dy < H) & (jj + dx >= 0) & (jj + dx < W))
            masks.append(m)
    return jnp.stack(masks, axis=0).astype(dtype).reshape(9, 1, H * W)


def ln_conv1x1_dw3x3(x, ln_w, ln_b, w, w_dw, masks, H, W):
    """x:(B,Cin,HW), w:(Cout,Cin), w_dw:(Cout,3,3) -> (B,Cout,HW)"""
    B, Cin, HW = x.shape
    Cout = w.shape[0]
    wdw = jnp.transpose(w_dw.reshape(Cout, 9), (1, 0))[:, :, None]   # (9, Cout, 1)
    kernel = functools.partial(_ln_conv1x1_dw3x3_kernel, H=H, W=W)
    return pl.pallas_call(
        kernel,
        out_shape=jax.ShapeDtypeStruct((B, Cout, HW), x.dtype),
        grid=(B,),
        in_specs=[
            pl.BlockSpec((1, Cin, HW), lambda b: (b, 0, 0)),
            pl.BlockSpec((Cin, 1), lambda b: (0, 0)),
            pl.BlockSpec((Cin, 1), lambda b: (0, 0)),
            pl.BlockSpec((Cout, Cin), lambda b: (0, 0)),
            pl.BlockSpec((9, Cout, 1), lambda b: (0, 0, 0)),
            pl.BlockSpec((9, 1, HW), lambda b: (0, 0, 0)),
        ],
        out_specs=pl.BlockSpec((1, Cout, HW), lambda b: (b, 0, 0)),
        compiler_params=_compiler_params(1),
    )(x, ln_w.reshape(Cin, 1), ln_b.reshape(Cin, 1), w, wdw, masks)


# --------------------------------------------------------------------------------------
# Kernel B:  all-heads attention  +  project_out  +  residual  (fused, one step / batch)
# --------------------------------------------------------------------------------------
def _attn_proj_res_kernel(qkv_ref, t_ref, wp_ref, res_ref, o_ref, *, num_heads):
    """qkv_ref:(1,3,NH,d,HW)  t_ref:(NH,) SMEM  wp_ref:(NH,C,d)  res_ref/o_ref:(1,C,HW)"""
    C, HW = o_ref.shape[1], o_ref.shape[2]
    y = jnp.zeros((C, HW), jnp.float32)
    for h in range(num_heads):
        q = qkv_ref[0, 0, h]                                   # (d, HW)
        k = qkv_ref[0, 1, h]
        v = qkv_ref[0, 2, h]
        # F.normalize(dim=-1): x / max(||x||, 1e-12)  ==  x * rsqrt(max(||x||^2, 1e-24))
        qn = q * jax.lax.rsqrt(jnp.maximum(jnp.sum(q * q, axis=-1, keepdims=True), 1e-24))
        kn = k * jax.lax.rsqrt(jnp.maximum(jnp.sum(k * k, axis=-1, keepdims=True), 1e-24))
        # (d, d) = qn @ kn^T without materializing the transpose.
        a = jax.lax.dot_general(qn, kn, (((1,), (1,)), ((), ())),
                                preferred_element_type=jnp.float32)
        a = a * t_ref[h]
        a = a - jnp.max(a, axis=-1, keepdims=True)
        e = jnp.exp(a)
        p = e * pl.reciprocal(jnp.sum(e, axis=-1, keepdims=True), approx=True)
        o_h = jnp.dot(p, v, preferred_element_type=jnp.float32)          # (d, HW)
        # project_out folded in per head: y += W_proj[:, h*d:(h+1)*d] @ o_h
        y = y + jnp.dot(wp_ref[h], o_h, preferred_element_type=jnp.float32)
    o_ref[...] = (res_ref[...] + y[None]).astype(o_ref.dtype)


def attention_proj_residual(qkv, temperature, w_proj, res, num_heads):
    """qkv:(B,3C,HW), w_proj:(C,C), res:(B,C,HW) -> res + proj(attn(qkv))"""
    B, C, HW = res.shape
    d = C // num_heads
    qkv5 = qkv.reshape(B, 3, num_heads, d, HW)                  # metadata-only reshape
    wp = w_proj.reshape(C, num_heads, d).transpose(1, 0, 2)     # (NH, C, d)
    kernel = functools.partial(_attn_proj_res_kernel, num_heads=num_heads)
    return pl.pallas_call(
        kernel,
        out_shape=jax.ShapeDtypeStruct((B, C, HW), res.dtype),
        grid=(B,),
        in_specs=[
            pl.BlockSpec((1, 3, num_heads, d, HW), lambda b: (b, 0, 0, 0, 0)),
            pl.BlockSpec(memory_space=pltpu.MemorySpace.SMEM),  # temperature (NH,)
            pl.BlockSpec((num_heads, C, d), lambda b: (0, 0, 0)),
            pl.BlockSpec((1, C, HW), lambda b: (b, 0, 0)),
        ],
        out_specs=pl.BlockSpec((1, C, HW), lambda b: (b, 0, 0)),
        compiler_params=_compiler_params(1),
    )(qkv5, temperature.reshape(-1), wp, res)


# --------------------------------------------------------------------------------------
# Kernel D:  gated GELU  +  FFN project_out  +  residual  (fused, HW-tiled)
# --------------------------------------------------------------------------------------
def _gelu_proj_res_kernel(h_ref, w_ref, res_ref, o_ref, *, hidden):
    """h_ref:(1,2*hidden,T)  w_ref:(C,hidden)  res_ref/o_ref:(1,C,T)"""
    x1 = h_ref[0, :hidden, :]
    x2 = h_ref[0, hidden:, :]
    g = 0.5 * x1 * (1.0 + jax.lax.erf(x1 * (1.0 / math.sqrt(2.0))))   # exact GELU
    y = jnp.dot(w_ref[...], g * x2, preferred_element_type=jnp.float32)
    o_ref[...] = (res_ref[...] + y[None]).astype(o_ref.dtype)


def gated_gelu_proj_residual(h, w_out, res):
    """h:(B,2*hidden,HW), w_out:(C,hidden), res:(B,C,HW) -> res + w_out @ (gelu(x1)*x2)"""
    B, C2, HW = h.shape
    C, hidden = w_out.shape
    T = HW if HW <= 512 else 512            # lane tile: full HW when small, else 512
    kernel = functools.partial(_gelu_proj_res_kernel, hidden=hidden)
    return pl.pallas_call(
        kernel,
        out_shape=jax.ShapeDtypeStruct((B, C, HW), res.dtype),
        grid=(B, pl.cdiv(HW, T)),
        in_specs=[
            pl.BlockSpec((1, C2, T), lambda b, t: (b, 0, t)),
            pl.BlockSpec((C, hidden), lambda b, t: (0, 0)),
            pl.BlockSpec((1, C, T), lambda b, t: (b, 0, t)),
        ],
        out_specs=pl.BlockSpec((1, C, T), lambda b, t: (b, 0, t)),
        compiler_params=_compiler_params(2),
    )(h, w_out, res)


# --------------------------------------------------------------------------------------
# Full TransformerBlock forward
# --------------------------------------------------------------------------------------
def transformer_block_forward(x_nchw, params):
    B, C, H, W = x_nchw.shape
    HW = H * W
    num_heads = params["temperature"].shape[0]

    x = x_nchw.reshape(B, C, HW)                    # channels-first; HW in lanes (free)
    masks = _dw_border_masks(H, W, x.dtype)         # tiny constant metadata

    # ---- x = x + Attention(LayerNorm1(x)) ----
    qkv = ln_conv1x1_dw3x3(x, params["ln1_w"], params["ln1_b"],
                           params["w_qkv"], params["w_dw_qkv"], masks, H, W)
    x = attention_proj_residual(qkv, params["temperature"], params["w_proj"], x,
                                num_heads)

    # ---- x = x + FeedForward(LayerNorm2(x)) ----
    h2 = ln_conv1x1_dw3x3(x, params["ln2_w"], params["ln2_b"],
                          params["w_in"], params["w_dw_ffn"], masks, H, W)
    x = gated_gelu_proj_residual(h2, params["w_out"], x)

    return x.reshape(B, C, H, W)


# --------------------------------------------------------------------------------------
# Pure-JAX reference (mirrors the PyTorch module) for correctness checking
# --------------------------------------------------------------------------------------
def _reference_forward(x_nchw, params, num_heads):
    B, C, H, W = x_nchw.shape

    def layernorm(x, w, b):
        xt = x.transpose(0, 2, 3, 1).reshape(B, H * W, C)
        mu = xt.mean(-1, keepdims=True)
        var = ((xt - mu) ** 2).mean(-1, keepdims=True)
        y = (xt - mu) / jnp.sqrt(var + 1e-5) * w + b
        return y.reshape(B, H, W, C).transpose(0, 3, 1, 2)

    def conv1x1(x, w):                       # w: (Cout, Cin)
        return jnp.einsum('oi,bihw->bohw', w, x)

    def dwconv3x3(x, w):                     # w: (C, 3, 3)
        return jax.lax.conv_general_dilated(
            x, w[:, None], window_strides=(1, 1), padding=((1, 1), (1, 1)),
            dimension_numbers=('NCHW', 'OIHW', 'NCHW'),
            feature_group_count=x.shape[1])

    # Attention branch
    y = layernorm(x_nchw, params["ln1_w"], params["ln1_b"])
    qkv = dwconv3x3(conv1x1(y, params["w_qkv"]), params["w_dw_qkv"])
    q, k, v = jnp.split(qkv, 3, axis=1)
    heads = lambda t: t.reshape(B, num_heads, C // num_heads, H * W)
    q, k, v = heads(q), heads(k), heads(v)
    qn = q / jnp.maximum(jnp.sqrt(jnp.sum(q * q, -1, keepdims=True)), 1e-12)
    kn = k / jnp.maximum(jnp.sqrt(jnp.sum(k * k, -1, keepdims=True)), 1e-12)
    attn = jnp.einsum('bhcn,bhdn->bhcd', qn, kn) * params["temperature"]
    attn = jax.nn.softmax(attn, axis=-1)
    out = jnp.einsum('bhcd,bhdn->bhcn', attn, v).reshape(B, C, H, W)
    x1 = x_nchw + conv1x1(out, params["w_proj"])

    # FFN branch
    y2 = layernorm(x1, params["ln2_w"], params["ln2_b"])
    h2 = dwconv3x3(conv1x1(y2, params["w_in"]), params["w_dw_ffn"])
    a, g = jnp.split(h2, 2, axis=1)
    gated = jax.nn.gelu(a, approximate=False) * g
    return x1 + conv1x1(gated, params["w_out"])


if __name__ == "__main__":
    # Module config: dim=8, num_heads=2, ffn_expansion_factor=2, bias=False, 'WithBias' LN
    B, C, H, W = 2, 8, 16, 16
    num_heads = 2
    hidden = int(C * 2.0)

    key = jax.random.PRNGKey(0)
    ks = jax.random.split(key, 8)
    params = {
        "ln1_w": jnp.ones((C,), jnp.float32),
        "ln1_b": jnp.zeros((C,), jnp.float32),
        # 1x1 conv weights stored as (Cout, Cin) == PyTorch (Cout, Cin, 1, 1) squeezed
        "w_qkv": 0.1 * jax.random.normal(ks[0], (3 * C, C), jnp.float32),
        # depthwise 3x3 weights stored as (C, 3, 3) == PyTorch (C, 1, 3, 3) squeezed
        "w_dw_qkv": 0.1 * jax.random.normal(ks[1], (3 * C, 3, 3), jnp.float32),
        "temperature": jnp.ones((num_heads, 1, 1), jnp.float32),
        "w_proj": 0.1 * jax.random.normal(ks[2], (C, C), jnp.float32),
        "ln2_w": jnp.ones((C,), jnp.float32),
        "ln2_b": jnp.zeros((C,), jnp.float32),
        "w_in": 0.1 * jax.random.normal(ks[3], (2 * hidden, C), jnp.float32),
        "w_dw_ffn": 0.1 * jax.random.normal(ks[4], (2 * hidden, 3, 3), jnp.float32),
        "w_out": 0.1 * jax.random.normal(ks[5], (C, hidden), jnp.float32),
    }

    x = jax.random.normal(ks[6], (B, C, H, W), jnp.float32)

    out = jax.jit(transformer_block_forward)(x, params)
    jax.block_until_ready(out)
    assert out.shape == (B, C, H, W)
    assert bool(jnp.all(jnp.isfinite(out)))

    # Correctness check against the pure-JAX mirror of the PyTorch module.
    ref = jax.jit(functools.partial(_reference_forward, num_heads=num_heads))(x, params)
    jax.block_until_ready(ref)
    err = float(jnp.max(jnp.abs(out - ref)))
    assert err < 5e-3, f"max abs error vs reference = {err}"

    print("KERNEL_OK")
</pallas_src>

<mosaic_0001>
module attributes {stable_mosaic.version = 11 : i64} {
  func.func @_ln_conv1x1_dw3x3_kernel(%arg0: i32, %arg1: memref<1x8x256xf32, #tpu.memory_space<vmem>>, %arg2: memref<8x1xf32, #tpu.memory_space<vmem>>, %arg3: memref<8x1xf32, #tpu.memory_space<vmem>>, %arg4: memref<24x8xf32, #tpu.memory_space<vmem>>, %arg5: memref<9x24x1xf32, #tpu.memory_space<vmem>>, %arg6: memref<9x1x256xf32, #tpu.memory_space<vmem>>, %arg7: memref<1x24x256xf32, #tpu.memory_space<vmem>>) attributes {dimension_semantics = [#tpu.dimension_semantics<parallel>], iteration_bounds = array<i64: 2>, scalar_prefetch = 0 : i64, scratch_operands = 0 : i64, tpu.core_type = #tpu.core_type<tc>, window_params = [{transform_indices = @transform_0, window_bounds = array<i64: 1, 8, 256>}, {pipeline_mode = #tpu.pipeline_mode<synchronous>, transform_indices = @transform_1, window_bounds = array<i64: 8, 1>}, {pipeline_mode = #tpu.pipeline_mode<synchronous>, transform_indices = @transform_2, window_bounds = array<i64: 8, 1>}, {pipeline_mode = #tpu.pipeline_mode<synchronous>, transform_indices = @transform_3, window_bounds = array<i64: 24, 8>}, {pipeline_mode = #tpu.pipeline_mode<synchronous>, transform_indices = @transform_4, window_bounds = array<i64: 9, 24, 1>}, {pipeline_mode = #tpu.pipeline_mode<synchronous>, transform_indices = @transform_5, window_bounds = array<i64: 9, 1, 256>}, {transform_indices = @transform_6, window_bounds = array<i64: 1, 24, 256>}]} {
    %c0 = arith.constant 0 : index
    %c0_0 = arith.constant 0 : index
    %c0_1 = arith.constant 0 : index
    %0 = vector.load %arg1[%c0, %c0_0, %c0_1] : memref<1x8x256xf32, #tpu.memory_space<vmem>>, vector<1x8x256xf32>
    %1 = vector.shape_cast %0 : vector<1x8x256xf32> to vector<8x256xf32>
    %cst = arith.constant dense<0.000000e+00> : vector<256xf32>
    %2 = vector.multi_reduction <add>, %1, %cst [0] : vector<8x256xf32> to vector<256xf32>
    %3 = vector.shape_cast %2 : vector<256xf32> to vector<1x256xf32>
    %cst_2 = arith.constant 8.000000e+00 : f32
    %4 = vector.broadcast %cst_2 : f32 to vector<1x256xf32>
    %5 = arith.divf %3, %4 : vector<1x256xf32>
    %6 = vector.broadcast %5 : vector<1x256xf32> to vector<8x256xf32>
    %7 = arith.subf %1, %6 : vector<8x256xf32>
    %8 = arith.mulf %7, %7 : vector<8x256xf32>
    %cst_3 = arith.constant dense<0.000000e+00> : vector<256xf32>
    %9 = vector.multi_reduction <add>, %8, %cst_3 [0] : vector<8x256xf32> to vector<256xf32>
    %10 = vector.shape_cast %9 : vector<256xf32> to vector<1x256xf32>
    %cst_4 = arith.constant 8.000000e+00 : f32
    %11 = vector.broadcast %cst_4 : f32 to vector<1x256xf32>
    %12 = arith.divf %10, %11 : vector<1x256xf32>
    %cst_5 = arith.constant 9.99999974E-6 : f32
    %13 = vector.broadcast %cst_5 : f32 to vector<1x256xf32>
    %14 = arith.addf %12, %13 : vector<1x256xf32>
    %15 = math.rsqrt %14 : vector<1x256xf32>
    %16 = vector.broadcast %15 : vector<1x256xf32> to vector<8x256xf32>
    %17 = arith.mulf %7, %16 : vector<8x256xf32>
    %c0_6 = arith.constant 0 : index
    %c0_7 = arith.constant 0 : index
    %18 = vector.load %arg2[%c0_6, %c0_7] : memref<8x1xf32, #tpu.memory_space<vmem>>, vector<8x1xf32>
    %19 = vector.broadcast %18 : vector<8x1xf32> to vector<8x256xf32>
    %20 = arith.mulf %17, %19 : vector<8x256xf32>
    %c0_8 = arith.constant 0 : index
    %c0_9 = arith.constant 0 : index
    %21 = vector.load %arg3[%c0_8, %c0_9] : memref<8x1xf32, #tpu.memory_space<vmem>>, vector<8x1xf32>
    %22 = vector.broadcast %21 : vector<8x1xf32> to vector<8x256xf32>
    %23 = arith.addf %20, %22 : vector<8x256xf32>
    %c0_10 = arith.constant 0 : index
    %c0_11 = arith.constant 0 : index
    %24 = vector.load %arg4[%c0_10, %c0_11] : memref<24x8xf32, #tpu.memory_space<vmem>>, vector<24x8xf32>
    %cst_12 = arith.constant dense<0.000000e+00> : vector<24x256xf32>
    %25 = tpu.matmul %24, %23, %cst_12 {dimension_numbers = #tpu.dot_dimension_numbers<[1], [0], [0], [1], [0, 0, 1, 1], [], []>} : vector<24x8xf32>, vector<8x256xf32>, vector<24x256xf32> -> vector<24x256xf32>
    %c4 = arith.constant 4 : index
    %c0_13 = arith.constant 0 : index
    %c0_14 = arith.constant 0 : index
    %26 = vector.load %arg5[%c4, %c0_13, %c0_14] : memref<9x24x1xf32, #tpu.memory_space<vmem>>, vector<1x24x1xf32>
    %27 = vector.shape_cast %26 : vector<1x24x1xf32> to vector<24x1xf32>
    %28 = vector.broadcast %27 : vector<24x1xf32> to vector<24x256xf32>
    %29 = arith.mulf %25, %28 : vector<24x256xf32>
    %c17_i32 = arith.constant 17 : i32
    %30 = tpu.dynamic_rotate %25 by %c17_i32 dim 1 : vector<24x256xf32>, i32 -> vector<24x256xf32>
    %c0_15 = arith.constant 0 : index
    %c0_16 = arith.constant 0 : index
    %c0_17 = arith.constant 0 : index
    %31 = vector.load %arg6[%c0_15, %c0_16, %c0_17] : memref<9x1x256xf32, #tpu.memory_space<vmem>>, vector<1x1x256xf32>
    %32 = vector.shape_cast %31 : vector<1x1x256xf32> to vector<1x256xf32>
    %33 = vector.broadcast %32 : vector<1x256xf32> to vector<24x256xf32>
    %34 = arith.mulf %30, %33 : vector<24x256xf32>
    %c0_18 = arith.constant 0 : index
    %c0_19 = arith.constant 0 : index
    %c0_20 = arith.constant 0 : index
    %35 = vector.load %arg5[%c0_18, %c0_19, %c0_20] : memref<9x24x1xf32, #tpu.memory_space<vmem>>, vector<1x24x1xf32>
    %36 = vector.shape_cast %35 : vector<1x24x1xf32> to vector<24x1xf32>
    %37 = vector.broadcast %36 : vector<24x1xf32> to vector<24x256xf32>
    %38 = arith.mulf %34, %37 : vector<24x256xf32>
    %39 = arith.addf %29, %38 : vector<24x256xf32>
    %c16_i32 = arith.constant 16 : i32
    %40 = tpu.dynamic_rotate %25 by %c16_i32 dim 1 : vector<24x256xf32>, i32 -> vector<24x256xf32>
    %c1 = arith.constant 1 : index
    %c0_21 = arith.constant 0 : index
    %c0_22 = arith.constant 0 : index
    %41 = vector.load %arg6[%c1, %c0_21, %c0_22] : memref<9x1x256xf32, #tpu.memory_space<vmem>>, vector<1x1x256xf32>
    %42 = vector.shape_cast %41 : vector<1x1x256xf32> to vector<1x256xf32>
    %43 = vector.broadcast %42 : vector<1x256xf32> to vector<24x256xf32>
    %44 = arith.mulf %40, %43 : vector<24x256xf32>
    %c1_23 = arith.constant 1 : index
    %c0_24 = arith.constant 0 : index
    %c0_25 = arith.constant 0 : index
    %45 = vector.load %arg5[%c1_23, %c0_24, %c0_25] : memref<9x24x1xf32, #tpu.memory_space<vmem>>, vector<1x24x1xf32>
    %46 = vector.shape_cast %45 : vector<1x24x1xf32> to vector<24x1xf32>
    %47 = vector.broadcast %46 : vector<24x1xf32> to vector<24x256xf32>
    %48 = arith.mulf %44, %47 : vector<24x256xf32>
    %49 = arith.addf %39, %48 : vector<24x256xf32>
    %c15_i32 = arith.constant 15 : i32
    %50 = tpu.dynamic_rotate %25 by %c15_i32 dim 1 : vector<24x256xf32>, i32 -> vector<24x256xf32>
    %c2 = arith.constant 2 : index
    %c0_26 = arith.constant 0 : index
    %c0_27 = arith.constant 0 : index
    %51 = vector.load %arg6[%c2, %c0_26, %c0_27] : memref<9x1x256xf32, #tpu.memory_space<vmem>>, vector<1x1x256xf32>
    %52 = vector.shape_cast %51 : vector<1x1x256xf32> to vector<1x256xf32>
    %53 = vector.broadcast %52 : vector<1x256xf32> to vector<24x256xf32>
    %54 = arith.mulf %50, %53 : vector<24x256xf32>
    %c2_28 = arith.constant 2 : index
    %c0_29 = arith.constant 0 : index
    %c0_30 = arith.constant 0 : index
    %55 = vector.load %arg5[%c2_28, %c0_29, %c0_30] : memref<9x24x1xf32, #tpu.memory_space<vmem>>, vector<1x24x1xf32>
    %56 = vector.shape_cast %55 : vector<1x24x1xf32> to vector<24x1xf32>
    %57 = vector.broadcast %56 : vector<24x1xf32> to vector<24x256xf32>
    %58 = arith.mulf %54, %57 : vector<24x256xf32>
    %59 = arith.addf %49, %58 : vector<24x256xf32>
    %c1_i32 = arith.constant 1 : i32
    %60 = tpu.dynamic_rotate %25 by %c1_i32 dim 1 : vector<24x256xf32>, i32 -> vector<24x256xf32>
    %c3 = arith.constant 3 : index
    %c0_31 = arith.constant 0 : index
    %c0_32 = arith.constant 0 : index
    %61 = vector.load %arg6[%c3, %c0_31, %c0_32] : memref<9x1x256xf32, #tpu.memory_space<vmem>>, vector<1x1x256xf32>
    %62 = vector.shape_cast %61 : vector<1x1x256xf32> to vector<1x256xf32>
    %63 = vector.broadcast %62 : vector<1x256xf32> to vector<24x256xf32>
    %64 = arith.mulf %60, %63 : vector<24x256xf32>
    %c3_33 = arith.constant 3 : index
    %c0_34 = arith.constant 0 : index
    %c0_35 = arith.constant 0 : index
    %65 = vector.load %arg5[%c3_33, %c0_34, %c0_35] : memref<9x24x1xf32, #tpu.memory_space<vmem>>, vector<1x24x1xf32>
    %66 = vector.shape_cast %65 : vector<1x24x1xf32> to vector<24x1xf32>
    %67 = vector.broadcast %66 : vector<24x1xf32> to vector<24x256xf32>
    %68 = arith.mulf %64, %67 : vector<24x256xf32>
    %69 = arith.addf %59, %68 : vector<24x256xf32>
    %c255_i32 = arith.constant 255 : i32
    %70 = tpu.dynamic_rotate %25 by %c255_i32 dim 1 : vector<24x256xf32>, i32 -> vector<24x256xf32>
    %c5 = arith.constant 5 : index
    %c0_36 = arith.constant 0 : index
    %c0_37 = arith.constant 0 : index
    %71 = vector.load %arg6[%c5, %c0_36, %c0_37] : memref<9x1x256xf32, #tpu.memory_space<vmem>>, vector<1x1x256xf32>
    %72 = vector.shape_cast %71 : vector<1x1x256xf32> to vector<1x256xf32>
    %73 = vector.broadcast %72 : vector<1x256xf32> to vector<24x256xf32>
    %74 = arith.mulf %70, %73 : vector<24x256xf32>
    %c5_38 = arith.constant 5 : index
    %c0_39 = arith.constant 0 : index
    %c0_40 = arith.constant 0 : index
    %75 = vector.load %arg5[%c5_38, %c0_39, %c0_40] : memref<9x24x1xf32, #tpu.memory_space<vmem>>, vector<1x24x1xf32>
    %76 = vector.shape_cast %75 : vector<1x24x1xf32> to vector<24x1xf32>
    %77 = vector.broadcast %76 : vector<24x1xf32> to vector<24x256xf32>
    %78 = arith.mulf %74, %77 : vector<24x256xf32>
    %79 = arith.addf %69, %78 : vector<24x256xf32>
    %c241_i32 = arith.constant 241 : i32
    %80 = tpu.dynamic_rotate %25 by %c241_i32 dim 1 : vector<24x256xf32>, i32 -> vector<24x256xf32>
    %c6 = arith.constant 6 : index
    %c0_41 = arith.constant 0 : index
    %c0_42 = arith.constant 0 : index
    %81 = vector.load %arg6[%c6, %c0_41, %c0_42] : memref<9x1x256xf32, #tpu.memory_space<vmem>>, vector<1x1x256xf32>
    %82 = vector.shape_cast %81 : vector<1x1x256xf32> to vector<1x256xf32>
    %83 = vector.broadcast %82 : vector<1x256xf32> to vector<24x256xf32>
    %84 = arith.mulf %80, %83 : vector<24x256xf32>
    %c6_43 = arith.constant 6 : index
    %c0_44 = arith.constant 0 : index
    %c0_45 = arith.constant 0 : index
    %85 = vector.load %arg5[%c6_43, %c0_44, %c0_45] : memref<9x24x1xf32, #tpu.memory_space<vmem>>, vector<1x24x1xf32>
    %86 = vector.shape_cast %85 : vector<1x24x1xf32> to vector<24x1xf32>
    %87 = vector.broadcast %86 : vector<24x1xf32> to vector<24x256xf32>
    %88 = arith.mulf %84, %87 : vector<24x256xf32>
    %89 = arith.addf %79, %88 : vector<24x256xf32>
    %c240_i32 = arith.constant 240 : i32
    %90 = tpu.dynamic_rotate %25 by %c240_i32 dim 1 : vector<24x256xf32>, i32 -> vector<24x256xf32>
    %c7 = arith.constant 7 : index
    %c0_46 = arith.constant 0 : index
    %c0_47 = arith.constant 0 : index
    %91 = vector.load %arg6[%c7, %c0_46, %c0_47] : memref<9x1x256xf32, #tpu.memory_space<vmem>>, vector<1x1x256xf32>
    %92 = vector.shape_cast %91 : vector<1x1x256xf32> to vector<1x256xf32>
    %93 = vector.broadcast %92 : vector<1x256xf32> to vector<24x256xf32>
    %94 = arith.mulf %90, %93 : vector<24x256xf32>
    %c7_48 = arith.constant 7 : index
    %c0_49 = arith.constant 0 : index
    %c0_50 = arith.constant 0 : index
    %95 = vector.load %arg5[%c7_48, %c0_49, %c0_50] : memref<9x24x1xf32, #tpu.memory_space<vmem>>, vector<1x24x1xf32>
    %96 = vector.shape_cast %95 : vector<1x24x1xf32> to vector<24x1xf32>
    %97 = vector.broadcast %96 : vector<24x1xf32> to vector<24x256xf32>
    %98 = arith.mulf %94, %97 : vector<24x256xf32>
    %99 = arith.addf %89, %98 : vector<24x256xf32>
    %c239_i32 = arith.constant 239 : i32
    %100 = tpu.dynamic_rotate %25 by %c239_i32 dim 1 : vector<24x256xf32>, i32 -> vector<24x256xf32>
    %c8 = arith.constant 8 : index
    %c0_51 = arith.constant 0 : index
    %c0_52 = arith.constant 0 : index
    %101 = vector.load %arg6[%c8, %c0_51, %c0_52] : memref<9x1x256xf32, #tpu.memory_space<vmem>>, vector<1x1x256xf32>
    %102 = vector.shape_cast %101 : vector<1x1x256xf32> to vector<1x256xf32>
    %103 = vector.broadcast %102 : vector<1x256xf32> to vector<24x256xf32>
    %104 = arith.mulf %100, %103 : vector<24x256xf32>
    %c8_53 = arith.constant 8 : index
    %c0_54 = arith.constant 0 : index
    %c0_55 = arith.constant 0 : index
    %105 = vector.load %arg5[%c8_53, %c0_54, %c0_55] : memref<9x24x1xf32, #tpu.memory_space<vmem>>, vector<1x24x1xf32>
    %106 = vector.shape_cast %105 : vector<1x24x1xf32> to vector<24x1xf32>
    %107 = vector.broadcast %106 : vector<24x1xf32> to vector<24x256xf32>
    %108 = arith.mulf %104, %107 : vector<24x256xf32>
    %109 = arith.addf %99, %108 : vector<24x256xf32>
    %110 = vector.shape_cast %109 : vector<24x256xf32> to vector<1x24x256xf32>
    %c0_56 = arith.constant 0 : index
    %c0_57 = arith.constant 0 : index
    %c0_58 = arith.constant 0 : index
    %111 = vector.load %arg7[%c0_56, %c0_57, %c0_58] : memref<1x24x256xf32, #tpu.memory_space<vmem>>, vector<1x24x256xf32>
    tpu.vector_store %arg7[%c0_56, %c0_57, %c0_58], %110 {strides = array<i32>} : memref<1x24x256xf32, #tpu.memory_space<vmem>>, vector<1x24x256xf32>,
    return
  }
  func.func @transform_0(%arg0: i32) -> (i32, i32, i32) {
    %c0_i32 = arith.constant 0 : i32
    %c0_i32_0 = arith.constant 0 : i32
    %c0_i32_1 = arith.constant 0 : i32
    return %arg0, %c0_i32, %c0_i32_0 : i32, i32, i32
  }
  func.func @transform_1(%arg0: i32) -> (i32, i32) {
    %c0_i32 = arith.constant 0 : i32
    %c0_i32_0 = arith.constant 0 : i32
    %c0_i32_1 = arith.constant 0 : i32
    return %c0_i32, %c0_i32_0 : i32, i32
  }
  func.func @transform_2(%arg0: i32) -> (i32, i32) {
    %c0_i32 = arith.constant 0 : i32
    %c0_i32_0 = arith.constant 0 : i32
    %c0_i32_1 = arith.constant 0 : i32
    return %c0_i32, %c0_i32_0 : i32, i32
  }
  func.func @transform_3(%arg0: i32) -> (i32, i32) {
    %c0_i32 = arith.constant 0 : i32
    %c0_i32_0 = arith.constant 0 : i32
    %c0_i32_1 = arith.constant 0 : i32
    return %c0_i32, %c0_i32_0 : i32, i32
  }
  func.func @transform_4(%arg0: i32) -> (i32, i32, i32) {
    %c0_i32 = arith.constant 0 : i32
    %c0_i32_0 = arith.constant 0 : i32
    %c0_i32_1 = arith.constant 0 : i32
    %c0_i32_2 = arith.constant 0 : i32
    return %c0_i32, %c0_i32_0, %c0_i32_1 : i32, i32, i32
  }
  func.func @transform_5(%arg0: i32) -> (i32, i32, i32) {
    %c0_i32 = arith.constant 0 : i32
    %c0_i32_0 = arith.constant 0 : i32
    %c0_i32_1 = arith.constant 0 : i32
    %c0_i32_2 = arith.constant 0 : i32
    return %c0_i32, %c0_i32_0, %c0_i32_1 : i32, i32, i32
  }
  func.func @transform_6(%arg0: i32) -> (i32, i32, i32) {
    %c0_i32 = arith.constant 0 : i32
    %c0_i32_0 = arith.constant 0 : i32
    %c0_i32_1 = arith.constant 0 : i32
    return %arg0, %c0_i32, %c0_i32_0 : i32, i32, i32
  }
}

module attributes {stable_mosaic.version = 11 : i64} {
  func.func @_attn_proj_res_kernel(%arg0: i32, %arg1: memref<1x3x2x4x256xf32, #tpu.memory_space<vmem>>, %arg2: memref<2xf32, #tpu.memory_space<smem>>, %arg3: memref<2x8x4xf32, #tpu.memory_space<vmem>>, %arg4: memref<1x8x256xf32, #tpu.memory_space<vmem>>, %arg5: memref<1x8x256xf32, #tpu.memory_space<vmem>>) attributes {dimension_semantics = [#tpu.dimension_semantics<parallel>], iteration_bounds = array<i64: 2>, scalar_prefetch = 0 : i64, scratch_operands = 0 : i64, tpu.core_type = #tpu.core_type<tc>, window_params = [{transform_indices = @transform_0, window_bounds = array<i64: 1, 3, 2, 4, 256>}, {transform_indices = @transform_1, window_bounds = array<i64: 2>}, {pipeline_mode = #tpu.pipeline_mode<synchronous>, transform_indices = @transform_2, window_bounds = array<i64: 2, 8, 4>}, {transform_indices = @transform_3, window_bounds = array<i64: 1, 8, 256>}, {transform_indices = @transform_4, window_bounds = array<i64: 1, 8, 256>}]} {
    %cst = arith.constant 0.000000e+00 : f32
    %0 = vector.broadcast %cst : f32 to vector<8x256xf32>
    %c0 = arith.constant 0 : index
    %c0_0 = arith.constant 0 : index
    %c0_1 = arith.constant 0 : index
    %c0_2 = arith.constant 0 : index
    %c0_3 = arith.constant 0 : index
    %1 = vector.load %arg1[%c0, %c0_0, %c0_1, %c0_2, %c0_3] : memref<1x3x2x4x256xf32, #tpu.memory_space<vmem>>, vector<1x1x1x4x256xf32>
    %2 = vector.shape_cast %1 : vector<1x1x1x4x256xf32> to vector<4x256xf32>
    %c0_4 = arith.constant 0 : index
    %c1 = arith.constant 1 : index
    %c0_5 = arith.constant 0 : index
    %c0_6 = arith.constant 0 : index
    %c0_7 = arith.constant 0 : index
    %3 = vector.load %arg1[%c0_4, %c1, %c0_5, %c0_6, %c0_7] : memref<1x3x2x4x256xf32, #tpu.memory_space<vmem>>, vector<1x1x1x4x256xf32>
    %4 = vector.shape_cast %3 : vector<1x1x1x4x256xf32> to vector<4x256xf32>
    %c0_8 = arith.constant 0 : index
    %c2 = arith.constant 2 : index
    %c0_9 = arith.constant 0 : index
    %c0_10 = arith.constant 0 : index
    %c0_11 = arith.constant 0 : index
    %5 = vector.load %arg1[%c0_8, %c2, %c0_9, %c0_10, %c0_11] : memref<1x3x2x4x256xf32, #tpu.memory_space<vmem>>, vector<1x1x1x4x256xf32>
    %6 = vector.shape_cast %5 : vector<1x1x1x4x256xf32> to vector<4x256xf32>
    %7 = arith.mulf %2, %2 : vector<4x256xf32>
    %cst_12 = arith.constant dense<0.000000e+00> : vector<4xf32>
    %8 = vector.multi_reduction <add>, %7, %cst_12 [1] : vector<4x256xf32> to vector<4xf32>
    %9 = vector.shape_cast %8 : vector<4xf32> to vector<4x1xf32>
    %cst_13 = arith.constant 1.000000e-24 : f32
    %10 = vector.broadcast %cst_13 : f32 to vector<4x1xf32>
    %11 = arith.maximumf %9, %10 : vector<4x1xf32>
    %12 = math.rsqrt %11 : vector<4x1xf32>
    %13 = vector.broadcast %12 : vector<4x1xf32> to vector<4x256xf32>
    %14 = arith.mulf %2, %13 : vector<4x256xf32>
    %15 = arith.mulf %4, %4 : vector<4x256xf32>
    %cst_14 = arith.constant dense<0.000000e+00> : vector<4xf32>
    %16 = vector.multi_reduction <add>, %15, %cst_14 [1] : vector<4x256xf32> to vector<4xf32>
    %17 = vector.shape_cast %16 : vector<4xf32> to vector<4x1xf32>
    %cst_15 = arith.constant 1.000000e-24 : f32
    %18 = vector.broadcast %cst_15 : f32 to vector<4x1xf32>
    %19 = arith.maximumf %17, %18 : vector<4x1xf32>
    %20 = math.rsqrt %19 : vector<4x1xf32>
    %21 = vector.broadcast %20 : vector<4x1xf32> to vector<4x256xf32>
    %22 = arith.mulf %4, %21 : vector<4x256xf32>
    %cst_16 = arith.constant dense<0.000000e+00> : vector<4x4xf32>
    %23 = tpu.matmul %14, %22, %cst_16 {dimension_numbers = #tpu.dot_dimension_numbers<[1], [1], [0], [0], [0, 0, 1, 0], [], []>} : vector<4x256xf32>, vector<4x256xf32>, vector<4x4xf32> -> vector<4x4xf32>
    %c0_17 = arith.constant 0 : index
    %24 = memref.load %arg2[%c0_17] : memref<2xf32, #tpu.memory_space<smem>>
    %25 = vector.broadcast %24 : f32 to vector<4x4xf32>
    %26 = arith.mulf %23, %25 : vector<4x4xf32>
    %cst_18 = arith.constant dense<0xFF800000> : vector<4xf32>
    %27 = vector.multi_reduction <maximumf>, %26, %cst_18 [1] : vector<4x4xf32> to vector<4xf32>
    %28 = vector.shape_cast %27 : vector<4xf32> to vector<4x1xf32>
    %29 = vector.broadcast %28 : vector<4x1xf32> to vector<4x4xf32>
    %30 = arith.subf %26, %29 : vector<4x4xf32>
    %31 = math.exp %30 : vector<4x4xf32>
    %cst_19 = arith.constant dense<0.000000e+00> : vector<4xf32>
    %32 = vector.multi_reduction <add>, %31, %cst_19 [1] : vector<4x4xf32> to vector<4xf32>
    %33 = vector.shape_cast %32 : vector<4xf32> to vector<4x1xf32>
    %34 = tpu.reciprocal %33 {approx = true} : vector<4x1xf32> -> vector<4x1xf32>
    %35 = vector.broadcast %34 : vector<4x1xf32> to vector<4x4xf32>
    %36 = arith.mulf %31, %35 : vector<4x4xf32>
    %cst_20 = arith.constant dense<0.000000e+00> : vector<4x256xf32>
    %37 = tpu.matmul %36, %6, %cst_20 {dimension_numbers = #tpu.dot_dimension_numbers<[1], [0], [0], [1], [0, 0, 1, 1], [], []>} : vector<4x4xf32>, vector<4x256xf32>, vector<4x256xf32> -> vector<4x256xf32>
    %c0_21 = arith.constant 0 : index
    %c0_22 = arith.constant 0 : index
    %c0_23 = arith.constant 0 : index
    %38 = vector.load %arg3[%c0_21, %c0_22, %c0_23] : memref<2x8x4xf32, #tpu.memory_space<vmem>>, vector<1x8x4xf32>
    %39 = vector.shape_cast %38 : vector<1x8x4xf32> to vector<8x4xf32>
    %cst_24 = arith.constant dense<0.000000e+00> : vector<8x256xf32>
    %40 = tpu.matmul %39, %37, %cst_24 {dimension_numbers = #tpu.dot_dimension_numbers<[1], [0], [0], [1], [0, 0, 1, 1], [], []>} : vector<8x4xf32>, vector<4x256xf32>, vector<8x256xf32> -> vector<8x256xf32>
    %41 = arith.addf %0, %40 : vector<8x256xf32>
    %c0_25 = arith.constant 0 : index
    %c0_26 = arith.constant 0 : index
    %c1_27 = arith.constant 1 : index
    %c0_28 = arith.constant 0 : index
    %c0_29 = arith.constant 0 : index
    %42 = vector.load %arg1[%c0_25, %c0_26, %c1_27, %c0_28, %c0_29] : memref<1x3x2x4x256xf32, #tpu.memory_space<vmem>>, vector<1x1x1x4x256xf32>
    %43 = vector.shape_cast %42 : vector<1x1x1x4x256xf32> to vector<4x256xf32>
    %c0_30 = arith.constant 0 : index
    %c1_31 = arith.constant 1 : index
    %c1_32 = arith.constant 1 : index
    %c0_33 = arith.constant 0 : index
    %c0_34 = arith.constant 0 : index
    %44 = vector.load %arg1[%c0_30, %c1_31, %c1_32, %c0_33, %c0_34] : memref<1x3x2x4x256xf32, #tpu.memory_space<vmem>>, vector<1x1x1x4x256xf32>
    %45 = vector.shape_cast %44 : vector<1x1x1x4x256xf32> to vector<4x256xf32>
    %c0_35 = arith.constant 0 : index
    %c2_36 = arith.constant 2 : index
    %c1_37 = arith.constant 1 : index
    %c0_38 = arith.constant 0 : index
    %c0_39 = arith.constant 0 : index
    %46 = vector.load %arg1[%c0_35, %c2_36, %c1_37, %c0_38, %c0_39] : memref<1x3x2x4x256xf32, #tpu.memory_space<vmem>>, vector<1x1x1x4x256xf32>
    %47 = vector.shape_cast %46 : vector<1x1x1x4x256xf32> to vector<4x256xf32>
    %48 = arith.mulf %43, %43 : vector<4x256xf32>
    %cst_40 = arith.constant dense<0.000000e+00> : vector<4xf32>
    %49 = vector.multi_reduction <add>, %48, %cst_40 [1] : vector<4x256xf32> to vector<4xf32>
    %50 = vector.shape_cast %49 : vector<4xf32> to vector<4x1xf32>
    %cst_41 = arith.constant 1.000000e-24 : f32
    %51 = vector.broadcast %cst_41 : f32 to vector<4x1xf32>
    %52 = arith.maximumf %50, %51 : vector<4x1xf32>
    %53 = math.rsqrt %52 : vector<4x1xf32>
    %54 = vector.broadcast %53 : vector<4x1xf32> to vector<4x256xf32>
    %55 = arith.mulf %43, %54 : vector<4x256xf32>
    %56 = arith.mulf %45, %45 : vector<4x256xf32>
    %cst_42 = arith.constant dense<0.000000e+00> : vector<4xf32>
    %57 = vector.multi_reduction <add>, %56, %cst_42 [1] : vector<4x256xf32> to vector<4xf32>
    %58 = vector.shape_cast %57 : vector<4xf32> to vector<4x1xf32>
    %cst_43 = arith.constant 1.000000e-24 : f32
    %59 = vector.broadcast %cst_43 : f32 to vector<4x1xf32>
    %60 = arith.maximumf %58, %59 : vector<4x1xf32>
    %61 = math.rsqrt %60 : vector<4x1xf32>
    %62 = vector.broadcast %61 : vector<4x1xf32> to vector<4x256xf32>
    %63 = arith.mulf %45, %62 : vector<4x256xf32>
    %cst_44 = arith.constant dense<0.000000e+00> : vector<4x4xf32>
    %64 = tpu.matmul %55, %63, %cst_44 {dimension_numbers = #tpu.dot_dimension_numbers<[1], [1], [0], [0], [0, 0, 1, 0], [], []>} : vector<4x256xf32>, vector<4x256xf32>, vector<4x4xf32> -> vector<4x4xf32>
    %c1_45 = arith.constant 1 : index
    %65 = memref.load %arg2[%c1_45] : memref<2xf32, #tpu.memory_space<smem>>
    %66 = vector.broadcast %65 : f32 to vector<4x4xf32>
    %67 = arith.mulf %64, %66 : vector<4x4xf32>
    %cst_46 = arith.constant dense<0xFF800000> : vector<4xf32>
    %68 = vector.multi_reduction <maximumf>, %67, %cst_46 [1] : vector<4x4xf32> to vector<4xf32>
    %69 = vector.shape_cast %68 : vector<4xf32> to vector<4x1xf32>
    %70 = vector.broadcast %69 : vector<4x1xf32> to vector<4x4xf32>
    %71 = arith.subf %67, %70 : vector<4x4xf32>
    %72 = math.exp %71 : vector<4x4xf32>
    %cst_47 = arith.constant dense<0.000000e+00> : vector<4xf32>
    %73 = vector.multi_reduction <add>, %72, %cst_47 [1] : vector<4x4xf32> to vector<4xf32>
    %74 = vector.shape_cast %73 : vector<4xf32> to vector<4x1xf32>
    %75 = tpu.reciprocal %74 {approx = true} : vector<4x1xf32> -> vector<4x1xf32>
    %76 = vector.broadcast %75 : vector<4x1xf32> to vector<4x4xf32>
    %77 = arith.mulf %72, %76 : vector<4x4xf32>
    %cst_48 = arith.constant dense<0.000000e+00> : vector<4x256xf32>
    %78 = tpu.matmul %77, %47, %cst_48 {dimension_numbers = #tpu.dot_dimension_numbers<[1], [0], [0], [1], [0, 0, 1, 1], [], []>} : vector<4x4xf32>, vector<4x256xf32>, vector<4x256xf32> -> vector<4x256xf32>
    %c1_49 = arith.constant 1 : index
    %c0_50 = arith.constant 0 : index
    %c0_51 = arith.constant 0 : index
    %79 = vector.load %arg3[%c1_49, %c0_50, %c0_51] : memref<2x8x4xf32, #tpu.memory_space<vmem>>, vector<1x8x4xf32>
    %80 = vector.shape_cast %79 : vector<1x8x4xf32> to vector<8x4xf32>
    %cst_52 = arith.constant dense<0.000000e+00> : vector<8x256xf32>
    %81 = tpu.matmul %80, %78, %cst_52 {dimension_numbers = #tpu.dot_dimension_numbers<[1], [0], [0], [1], [0, 0, 1, 1], [], []>} : vector<8x4xf32>, vector<4x256xf32>, vector<8x256xf32> -> vector<8x256xf32>
    %82 = arith.addf %41, %81 : vector<8x256xf32>
    %c0_53 = arith.constant 0 : index
    %c0_54 = arith.constant 0 : index
    %c0_55 = arith.constant 0 : index
    %83 = vector.load %arg4[%c0_53, %c0_54, %c0_55] : memref<1x8x256xf32, #tpu.memory_space<vmem>>, vector<1x8x256xf32>
    %84 = vector.shape_cast %82 : vector<8x256xf32> to vector<1x8x256xf32>
    %85 = arith.addf %83, %84 : vector<1x8x256xf32>
    %c0_56 = arith.constant 0 : index
    %c0_57 = arith.constant 0 : index
    %c0_58 = arith.constant 0 : index
    %86 = vector.load %arg5[%c0_56, %c0_57, %c0_58] : memref<1x8x256xf32, #tpu.memory_space<vmem>>, vector<1x8x256xf32>
    tpu.vector_store %arg5[%c0_56, %c0_57, %c0_58], %85 {strides = array<i32>} : memref<1x8x256xf32, #tpu.memory_space<vmem>>, vector<1x8x256xf32>,
    return
  }
  func.func @transform_0(%arg0: i32) -> (i32, i32, i32, i32, i32) {
    %c0_i32 = arith.constant 0 : i32
    %c0_i32_0 = arith.constant 0 : i32
    %c0_i32_1 = arith.constant 0 : i32
    %c0_i32_2 = arith.constant 0 : i32
    %c0_i32_3 = arith.constant 0 : i32
    return %arg0, %c0_i32, %c0_i32_0, %c0_i32_1, %c0_i32_2 : i32, i32, i32, i32, i32
  }
  func.func @transform_1(%arg0: i32) -> i32 {
    %c0_i32 = arith.constant 0 : i32
    %c0_i32_0 = arith.constant 0 : i32
    return %c0_i32 : i32
  }
  func.func @transform_2(%arg0: i32) -> (i32, i32, i32) {
    %c0_i32 = arith.constant 0 : i32
    %c0_i32_0 = arith.constant 0 : i32
    %c0_i32_1 = arith.constant 0 : i32
    %c0_i32_2 = arith.constant 0 : i32
    return %c0_i32, %c0_i32_0, %c0_i32_1 : i32, i32, i32
  }
  func.func @transform_3(%arg0: i32) -> (i32, i32, i32) {
    %c0_i32 = arith.constant 0 : i32
    %c0_i32_0 = arith.constant 0 : i32
    %c0_i32_1 = arith.constant 0 : i32
    return %arg0, %c0_i32, %c0_i32_0 : i32, i32, i32
  }
  func.func @transform_4(%arg0: i32) -> (i32, i32, i32) {
    %c0_i32 = arith.constant 0 : i32
    %c0_i32_0 = arith.constant 0 : i32
    %c0_i32_1 = arith.constant 0 : i32
    return %arg0, %c0_i32, %c0_i32_0 : i32, i32, i32
  }
}

module attributes {stable_mosaic.version = 11 : i64} {
  func.func @_gelu_proj_res_kernel(%arg0: i32, %arg1: i32, %arg2: memref<1x32x256xf32, #tpu.memory_space<vmem>>, %arg3: memref<8x16xf32, #tpu.memory_space<vmem>>, %arg4: memref<1x8x256xf32, #tpu.memory_space<vmem>>, %arg5: memref<1x8x256xf32, #tpu.memory_space<vmem>>) attributes {dimension_semantics = [#tpu.dimension_semantics<parallel>, #tpu.dimension_semantics<parallel>], iteration_bounds = array<i64: 2, 1>, scalar_prefetch = 0 : i64, scratch_operands = 0 : i64, tpu.core_type = #tpu.core_type<tc>, window_params = [{transform_indices = @transform_0, window_bounds = array<i64: 1, 32, 256>}, {pipeline_mode = #tpu.pipeline_mode<synchronous>, transform_indices = @transform_1, window_bounds = array<i64: 8, 16>}, {transform_indices = @transform_2, window_bounds = array<i64: 1, 8, 256>}, {transform_indices = @transform_3, window_bounds = array<i64: 1, 8, 256>}]} {
    %c0 = arith.constant 0 : index
    %c0_0 = arith.constant 0 : index
    %c0_1 = arith.constant 0 : index
    %0 = vector.load %arg2[%c0, %c0_0, %c0_1] : memref<1x32x256xf32, #tpu.memory_space<vmem>>, vector<1x16x256xf32>
    %1 = vector.shape_cast %0 : vector<1x16x256xf32> to vector<16x256xf32>
    %c0_2 = arith.constant 0 : index
    %c16 = arith.constant 16 : index
    %c0_3 = arith.constant 0 : index
    %2 = vector.load %arg2[%c0_2, %c16, %c0_3] : memref<1x32x256xf32, #tpu.memory_space<vmem>>, vector<1x16x256xf32>
    %3 = vector.shape_cast %2 : vector<1x16x256xf32> to vector<16x256xf32>
    %cst = arith.constant 5.000000e-01 : f32
    %4 = vector.broadcast %cst : f32 to vector<16x256xf32>
    %5 = arith.mulf %4, %1 : vector<16x256xf32>
    %cst_4 = arith.constant 0.707106769 : f32
    %6 = vector.broadcast %cst_4 : f32 to vector<16x256xf32>
    %7 = arith.mulf %1, %6 : vector<16x256xf32>
    %8 = math.erf %7 : vector<16x256xf32>
    %cst_5 = arith.constant 1.000000e+00 : f32
    %9 = vector.broadcast %cst_5 : f32 to vector<16x256xf32>
    %10 = arith.addf %9, %8 : vector<16x256xf32>
    %11 = arith.mulf %5, %10 : vector<16x256xf32>
    %c0_6 = arith.constant 0 : index
    %c0_7 = arith.constant 0 : index
    %12 = vector.load %arg3[%c0_6, %c0_7] : memref<8x16xf32, #tpu.memory_space<vmem>>, vector<8x16xf32>
    %13 = arith.mulf %11, %3 : vector<16x256xf32>
    %cst_8 = arith.constant dense<0.000000e+00> : vector<8x256xf32>
    %14 = tpu.matmul %12, %13, %cst_8 {dimension_numbers = #tpu.dot_dimension_numbers<[1], [0], [0], [1], [0, 0, 1, 1], [], []>} : vector<8x16xf32>, vector<16x256xf32>, vector<8x256xf32> -> vector<8x256xf32>
    %c0_9 = arith.constant 0 : index
    %c0_10 = arith.constant 0 : index
    %c0_11 = arith.constant 0 : index
    %15 = vector.load %arg4[%c0_9, %c0_10, %c0_11] : memref<1x8x256xf32, #tpu.memory_space<vmem>>, vector<1x8x256xf32>
    %16 = vector.shape_cast %14 : vector<8x256xf32> to vector<1x8x256xf32>
    %17 = arith.addf %15, %16 : vector<1x8x256xf32>
    %c0_12 = arith.constant 0 : index
    %c0_13 = arith.constant 0 : index
    %c0_14 = arith.constant 0 : index
    %18 = vector.load %arg5[%c0_12, %c0_13, %c0_14] : memref<1x8x256xf32, #tpu.memory_space<vmem>>, vector<1x8x256xf32>
    tpu.vector_store %arg5[%c0_12, %c0_13, %c0_14], %17 {strides = array<i32>} : memref<1x8x256xf32, #tpu.memory_space<vmem>>, vector<1x8x256xf32>,
    return
  }
  func.func @transform_0(%arg0: i32, %arg1: i32) -> (i32, i32, i32) {
    %c0_i32 = arith.constant 0 : i32
    %c0_i32_0 = arith.constant 0 : i32
    return %arg0, %c0_i32, %arg1 : i32, i32, i32
  }
  func.func @transform_1(%arg0: i32, %arg1: i32) -> (i32, i32) {
    %c0_i32 = arith.constant 0 : i32
    %c0_i32_0 = arith.constant 0 : i32
    %c0_i32_1 = arith.constant 0 : i32
    return %c0_i32, %c0_i32_0 : i32, i32
  }
  func.func @transform_2(%arg0: i32, %arg1: i32) -> (i32, i32, i32) {
    %c0_i32 = arith.constant 0 : i32
    %c0_i32_0 = arith.constant 0 : i32
    return %arg0, %c0_i32, %arg1 : i32, i32, i32
  }
  func.func @transform_3(%arg0: i32, %arg1: i32) -> (i32, i32, i32) {
    %c0_i32 = arith.constant 0 : i32
    %c0_i32_0 = arith.constant 0 : i32
    return %arg0, %c0_i32, %arg1 : i32, i32, i32
  }
}

module attributes {stable_mosaic.version = 11 : i64} {
  func.func @_ln_conv1x1_dw3x3_kernel(%arg0: i32, %arg1: memref<1x8x256xf32, #tpu.memory_space<vmem>>, %arg2: memref<8x1xf32, #tpu.memory_space<vmem>>, %arg3: memref<8x1xf32, #tpu.memory_space<vmem>>, %arg4: memref<32x8xf32, #tpu.memory_space<vmem>>, %arg5: memref<9x32x1xf32, #tpu.memory_space<vmem>>, %arg6: memref<9x1x256xf32, #tpu.memory_space<vmem>>, %arg7: memref<1x32x256xf32, #tpu.memory_space<vmem>>) attributes {dimension_semantics = [#tpu.dimension_semantics<parallel>], iteration_bounds = array<i64: 2>, scalar_prefetch = 0 : i64, scratch_operands = 0 : i64, tpu.core_type = #tpu.core_type<tc>, window_params = [{transform_indices = @transform_0, window_bounds = array<i64: 1, 8, 256>}, {pipeline_mode = #tpu.pipeline_mode<synchronous>, transform_indices = @transform_1, window_bounds = array<i64: 8, 1>}, {pipeline_mode = #tpu.pipeline_mode<synchronous>, transform_indices = @transform_2, window_bounds = array<i64: 8, 1>}, {pipeline_mode = #tpu.pipeline_mode<synchronous>, transform_indices = @transform_3, window_bounds = array<i64: 32, 8>}, {pipeline_mode = #tpu.pipeline_mode<synchronous>, transform_indices = @transform_4, window_bounds = array<i64: 9, 32, 1>}, {pipeline_mode = #tpu.pipeline_mode<synchronous>, transform_indices = @transform_5, window_bounds = array<i64: 9, 1, 256>}, {transform_indices = @transform_6, window_bounds = array<i64: 1, 32, 256>}]} {
    %c0 = arith.constant 0 : index
    %c0_0 = arith.constant 0 : index
    %c0_1 = arith.constant 0 : index
    %0 = vector.load %arg1[%c0, %c0_0, %c0_1] : memref<1x8x256xf32, #tpu.memory_space<vmem>>, vector<1x8x256xf32>
    %1 = vector.shape_cast %0 : vector<1x8x256xf32> to vector<8x256xf32>
    %cst = arith.constant dense<0.000000e+00> : vector<256xf32>
    %2 = vector.multi_reduction <add>, %1, %cst [0] : vector<8x256xf32> to vector<256xf32>
    %3 = vector.shape_cast %2 : vector<256xf32> to vector<1x256xf32>
    %cst_2 = arith.constant 8.000000e+00 : f32
    %4 = vector.broadcast %cst_2 : f32 to vector<1x256xf32>
    %5 = arith.divf %3, %4 : vector<1x256xf32>
    %6 = vector.broadcast %5 : vector<1x256xf32> to vector<8x256xf32>
    %7 = arith.subf %1, %6 : vector<8x256xf32>
    %8 = arith.mulf %7, %7 : vector<8x256xf32>
    %cst_3 = arith.constant dense<0.000000e+00> : vector<256xf32>
    %9 = vector.multi_reduction <add>, %8, %cst_3 [0] : vector<8x256xf32> to vector<256xf32>
    %10 = vector.shape_cast %9 : vector<256xf32> to vector<1x256xf32>
    %cst_4 = arith.constant 8.000000e+00 : f32
    %11 = vector.broadcast %cst_4 : f32 to vector<1x256xf32>
    %12 = arith.divf %10, %11 : vector<1x256xf32>
    %cst_5 = arith.constant 9.99999974E-6 : f32
    %13 = vector.broadcast %cst_5 : f32 to vector<1x256xf32>
    %14 = arith.addf %12, %13 : vector<1x256xf32>
    %15 = math.rsqrt %14 : vector<1x256xf32>
    %16 = vector.broadcast %15 : vector<1x256xf32> to vector<8x256xf32>
    %17 = arith.mulf %7, %16 : vector<8x256xf32>
    %c0_6 = arith.constant 0 : index
    %c0_7 = arith.constant 0 : index
    %18 = vector.load %arg2[%c0_6, %c0_7] : memref<8x1xf32, #tpu.memory_space<vmem>>, vector<8x1xf32>
    %19 = vector.broadcast %18 : vector<8x1xf32> to vector<8x256xf32>
    %20 = arith.mulf %17, %19 : vector<8x256xf32>
    %c0_8 = arith.constant 0 : index
    %c0_9 = arith.constant 0 : index
    %21 = vector.load %arg3[%c0_8, %c0_9] : memref<8x1xf32, #tpu.memory_space<vmem>>, vector<8x1xf32>
    %22 = vector.broadcast %21 : vector<8x1xf32> to vector<8x256xf32>
    %23 = arith.addf %20, %22 : vector<8x256xf32>
    %c0_10 = arith.constant 0 : index
    %c0_11 = arith.constant 0 : index
    %24 = vector.load %arg4[%c0_10, %c0_11] : memref<32x8xf32, #tpu.memory_space<vmem>>, vector<32x8xf32>
    %cst_12 = arith.constant dense<0.000000e+00> : vector<32x256xf32>
    %25 = tpu.matmul %24, %23, %cst_12 {dimension_numbers = #tpu.dot_dimension_numbers<[1], [0], [0], [1], [0, 0, 1, 1], [], []>} : vector<32x8xf32>, vector<8x256xf32>, vector<32x256xf32> -> vector<32x256xf32>
    %c4 = arith.constant 4 : index
    %c0_13 = arith.constant 0 : index
    %c0_14 = arith.constant 0 : index
    %26 = vector.load %arg5[%c4, %c0_13, %c0_14] : memref<9x32x1xf32, #tpu.memory_space<vmem>>, vector<1x32x1xf32>
    %27 = vector.shape_cast %26 : vector<1x32x1xf32> to vector<32x1xf32>
    %28 = vector.broadcast %27 : vector<32x1xf32> to vector<32x256xf32>
    %29 = arith.mulf %25, %28 : vector<32x256xf32>
    %c17_i32 = arith.constant 17 : i32
    %30 = tpu.dynamic_rotate %25 by %c17_i32 dim 1 : vector<32x256xf32>, i32 -> vector<32x256xf32>
    %c0_15 = arith.constant 0 : index
    %c0_16 = arith.constant 0 : index
    %c0_17 = arith.constant 0 : index
    %31 = vector.load %arg6[%c0_15, %c0_16, %c0_17] : memref<9x1x256xf32, #tpu.memory_space<vmem>>, vector<1x1x256xf32>
    %32 = vector.shape_cast %31 : vector<1x1x256xf32> to vector<1x256xf32>
    %33 = vector.broadcast %32 : vector<1x256xf32> to vector<32x256xf32>
    %34 = arith.mulf %30, %33 : vector<32x256xf32>
    %c0_18 = arith.constant 0 : index
    %c0_19 = arith.constant 0 : index
    %c0_20 = arith.constant 0 : index
    %35 = vector.load %arg5[%c0_18, %c0_19, %c0_20] : memref<9x32x1xf32, #tpu.memory_space<vmem>>, vector<1x32x1xf32>
    %36 = vector.shape_cast %35 : vector<1x32x1xf32> to vector<32x1xf32>
    %37 = vector.broadcast %36 : vector<32x1xf32> to vector<32x256xf32>
    %38 = arith.mulf %34, %37 : vector<32x256xf32>
    %39 = arith.addf %29, %38 : vector<32x256xf32>
    %c16_i32 = arith.constant 16 : i32
    %40 = tpu.dynamic_rotate %25 by %c16_i32 dim 1 : vector<32x256xf32>, i32 -> vector<32x256xf32>
    %c1 = arith.constant 1 : index
    %c0_21 = arith.constant 0 : index
    %c0_22 = arith.constant 0 : index
    %41 = vector.load %arg6[%c1, %c0_21, %c0_22] : memref<9x1x256xf32, #tpu.memory_space<vmem>>, vector<1x1x256xf32>
    %42 = vector.shape_cast %41 : vector<1x1x256xf32> to vector<1x256xf32>
    %43 = vector.broadcast %42 : vector<1x256xf32> to vector<32x256xf32>
    %44 = arith.mulf %40, %43 : vector<32x256xf32>
    %c1_23 = arith.constant 1 : index
    %c0_24 = arith.constant 0 : index
    %c0_25 = arith.constant 0 : index
    %45 = vector.load %arg5[%c1_23, %c0_24, %c0_25] : memref<9x32x1xf32, #tpu.memory_space<vmem>>, vector<1x32x1xf32>
    %46 = vector.shape_cast %45 : vector<1x32x1xf32> to vector<32x1xf32>
    %47 = vector.broadcast %46 : vector<32x1xf32> to vector<32x256xf32>
    %48 = arith.mulf %44, %47 : vector<32x256xf32>
    %49 = arith.addf %39, %48 : vector<32x256xf32>
    %c15_i32 = arith.constant 15 : i32
    %50 = tpu.dynamic_rotate %25 by %c15_i32 dim 1 : vector<32x256xf32>, i32 -> vector<32x256xf32>
    %c2 = arith.constant 2 : index
    %c0_26 = arith.constant 0 : index
    %c0_27 = arith.constant 0 : index
    %51 = vector.load %arg6[%c2, %c0_26, %c0_27] : memref<9x1x256xf32, #tpu.memory_space<vmem>>, vector<1x1x256xf32>
    %52 = vector.shape_cast %51 : vector<1x1x256xf32> to vector<1x256xf32>
    %53 = vector.broadcast %52 : vector<1x256xf32> to vector<32x256xf32>
    %54 = arith.mulf %50, %53 : vector<32x256xf32>
    %c2_28 = arith.constant 2 : index
    %c0_29 = arith.constant 0 : index
    %c0_30 = arith.constant 0 : index
    %55 = vector.load %arg5[%c2_28, %c0_29, %c0_30] : memref<9x32x1xf32, #tpu.memory_space<vmem>>, vector<1x32x1xf32>
    %56 = vector.shape_cast %55 : vector<1x32x1xf32> to vector<32x1xf32>
    %57 = vector.broadcast %56 : vector<32x1xf32> to vector<32x256xf32>
    %58 = arith.mulf %54, %57 : vector<32x256xf32>
    %59 = arith.addf %49, %58 : vector<32x256xf32>
    %c1_i32 = arith.constant 1 : i32
    %60 = tpu.dynamic_rotate %25 by %c1_i32 dim 1 : vector<32x256xf32>, i32 -> vector<32x256xf32>
    %c3 = arith.constant 3 : index
    %c0_31 = arith.constant 0 : index
    %c0_32 = arith.constant 0 : index
    %61 = vector.load %arg6[%c3, %c0_31, %c0_32] : memref<9x1x256xf32, #tpu.memory_space<vmem>>, vector<1x1x256xf32>
    %62 = vector.shape_cast %61 : vector<1x1x256xf32> to vector<1x256xf32>
    %63 = vector.broadcast %62 : vector<1x256xf32> to vector<32x256xf32>
    %64 = arith.mulf %60, %63 : vector<32x256xf32>
    %c3_33 = arith.constant 3 : index
    %c0_34 = arith.constant 0 : index
    %c0_35 = arith.constant 0 : index
    %65 = vector.load %arg5[%c3_33, %c0_34, %c0_35] : memref<9x32x1xf32, #tpu.memory_space<vmem>>, vector<1x32x1xf32>
    %66 = vector.shape_cast %65 : vector<1x32x1xf32> to vector<32x1xf32>
    %67 = vector.broadcast %66 : vector<32x1xf32> to vector<32x256xf32>
    %68 = arith.mulf %64, %67 : vector<32x256xf32>
    %69 = arith.addf %59, %68 : vector<32x256xf32>
    %c255_i32 = arith.constant 255 : i32
    %70 = tpu.dynamic_rotate %25 by %c255_i32 dim 1 : vector<32x256xf32>, i32 -> vector<32x256xf32>
    %c5 = arith.constant 5 : index
    %c0_36 = arith.constant 0 : index
    %c0_37 = arith.constant 0 : index
    %71 = vector.load %arg6[%c5, %c0_36, %c0_37] : memref<9x1x256xf32, #tpu.memory_space<vmem>>, vector<1x1x256xf32>
    %72 = vector.shape_cast %71 : vector<1x1x256xf32> to vector<1x256xf32>
    %73 = vector.broadcast %72 : vector<1x256xf32> to vector<32x256xf32>
    %74 = arith.mulf %70, %73 : vector<32x256xf32>
    %c5_38 = arith.constant 5 : index
    %c0_39 = arith.constant 0 : index
    %c0_40 = arith.constant 0 : index
    %75 = vector.load %arg5[%c5_38, %c0_39, %c0_40] : memref<9x32x1xf32, #tpu.memory_space<vmem>>, vector<1x32x1xf32>
    %76 = vector.shape_cast %75 : vector<1x32x1xf32> to vector<32x1xf32>
    %77 = vector.broadcast %76 : vector<32x1xf32> to vector<32x256xf32>
    %78 = arith.mulf %74, %77 : vector<32x256xf32>
    %79 = arith.addf %69, %78 : vector<32x256xf32>
    %c241_i32 = arith.constant 241 : i32
    %80 = tpu.dynamic_rotate %25 by %c241_i32 dim 1 : vector<32x256xf32>, i32 -> vector<32x256xf32>
    %c6 = arith.constant 6 : index
    %c0_41 = arith.constant 0 : index
    %c0_42 = arith.constant 0 : index
    %81 = vector.load %arg6[%c6, %c0_41, %c0_42] : memref<9x1x256xf32, #tpu.memory_space<vmem>>, vector<1x1x256xf32>
    %82 = vector.shape_cast %81 : vector<1x1x256xf32> to vector<1x256xf32>
    %83 = vector.broadcast %82 : vector<1x256xf32> to vector<32x256xf32>
    %84 = arith.mulf %80, %83 : vector<32x256xf32>
    %c6_43 = arith.constant 6 : index
    %c0_44 = arith.constant 0 : index
    %c0_45 = arith.constant 0 : index
    %85 = vector.load %arg5[%c6_43, %c0_44, %c0_45] : memref<9x32x1xf32, #tpu.memory_space<vmem>>, vector<1x32x1xf32>
    %86 = vector.shape_cast %85 : vector<1x32x1xf32> to vector<32x1xf32>
    %87 = vector.broadcast %86 : vector<32x1xf32> to vector<32x256xf32>
    %88 = arith.mulf %84, %87 : vector<32x256xf32>
    %89 = arith.addf %79, %88 : vector<32x256xf32>
    %c240_i32 = arith.constant 240 : i32
    %90 = tpu.dynamic_rotate %25 by %c240_i32 dim 1 : vector<32x256xf32>, i32 -> vector<32x256xf32>
    %c7 = arith.constant 7 : index
    %c0_46 = arith.constant 0 : index
    %c0_47 = arith.constant 0 : index
    %91 = vector.load %arg6[%c7, %c0_46, %c0_47] : memref<9x1x256xf32, #tpu.memory_space<vmem>>, vector<1x1x256xf32>
    %92 = vector.shape_cast %91 : vector<1x1x256xf32> to vector<1x256xf32>
    %93 = vector.broadcast %92 : vector<1x256xf32> to vector<32x256xf32>
    %94 = arith.mulf %90, %93 : vector<32x256xf32>
    %c7_48 = arith.constant 7 : index
    %c0_49 = arith.constant 0 : index
    %c0_50 = arith.constant 0 : index
    %95 = vector.load %arg5[%c7_48, %c0_49, %c0_50] : memref<9x32x1xf32, #tpu.memory_space<vmem>>, vector<1x32x1xf32>
    %96 = vector.shape_cast %95 : vector<1x32x1xf32> to vector<32x1xf32>
    %97 = vector.broadcast %96 : vector<32x1xf32> to vector<32x256xf32>
    %98 = arith.mulf %94, %97 : vector<32x256xf32>
    %99 = arith.addf %89, %98 : vector<32x256xf32>
    %c239_i32 = arith.constant 239 : i32
    %100 = tpu.dynamic_rotate %25 by %c239_i32 dim 1 : vector<32x256xf32>, i32 -> vector<32x256xf32>
    %c8 = arith.constant 8 : index
    %c0_51 = arith.constant 0 : index
    %c0_52 = arith.constant 0 : index
    %101 = vector.load %arg6[%c8, %c0_51, %c0_52] : memref<9x1x256xf32, #tpu.memory_space<vmem>>, vector<1x1x256xf32>
    %102 = vector.shape_cast %101 : vector<1x1x256xf32> to vector<1x256xf32>
    %103 = vector.broadcast %102 : vector<1x256xf32> to vector<32x256xf32>
    %104 = arith.mulf %100, %103 : vector<32x256xf32>
    %c8_53 = arith.constant 8 : index
    %c0_54 = arith.constant 0 : index
    %c0_55 = arith.constant 0 : index
    %105 = vector.load %arg5[%c8_53, %c0_54, %c0_55] : memref<9x32x1xf32, #tpu.memory_space<vmem>>, vector<1x32x1xf32>
    %106 = vector.shape_cast %105 : vector<1x32x1xf32> to vector<32x1xf32>
    %107 = vector.broadcast %106 : vector<32x1xf32> to vector<32x256xf32>
    %108 = arith.mulf %104, %107 : vector<32x256xf32>
    %109 = arith.addf %99, %108 : vector<32x256xf32>
    %110 = vector.shape_cast %109 : vector<32x256xf32> to vector<1x32x256xf32>
    %c0_56 = arith.constant 0 : index
    %c0_57 = arith.constant 0 : index
    %c0_58 = arith.constant 0 : index
    %111 = vector.load %arg7[%c0_56, %c0_57, %c0_58] : memref<1x32x256xf32, #tpu.memory_space<vmem>>, vector<1x32x256xf32>
    tpu.vector_store %arg7[%c0_56, %c0_57, %c0_58], %110 {strides = array<i32>} : memref<1x32x256xf32, #tpu.memory_space<vmem>>, vector<1x32x256xf32>,
    return
  }
  func.func @transform_0(%arg0: i32) -> (i32, i32, i32) {
    %c0_i32 = arith.constant 0 : i32
    %c0_i32_0 = arith.constant 0 : i32
    %c0_i32_1 = arith.constant 0 : i32
    return %arg0, %c0_i32, %c0_i32_0 : i32, i32, i32
  }
  func.func @transform_1(%arg0: i32) -> (i32, i32) {
    %c0_i32 = arith.constant 0 : i32
    %c0_i32_0 = arith.constant 0 : i32
    %c0_i32_1 = arith.constant 0 : i32
    return %c0_i32, %c0_i32_0 : i32, i32
  }
  func.func @transform_2(%arg0: i32) -> (i32, i32) {
    %c0_i32 = arith.constant 0 : i32
    %c0_i32_0 = arith.constant 0 : i32
    %c0_i32_1 = arith.constant 0 : i32
    return %c0_i32, %c0_i32_0 : i32, i32
  }
  func.func @transform_3(%arg0: i32) -> (i32, i32) {
    %c0_i32 = arith.constant 0 : i32
    %c0_i32_0 = arith.constant 0 : i32
    %c0_i32_1 = arith.constant 0 : i32
    return %c0_i32, %c0_i32_0 : i32, i32
  }
  func.func @transform_4(%arg0: i32) -> (i32, i32, i32) {
    %c0_i32 = arith.constant 0 : i32
    %c0_i32_0 = arith.constant 0 : i32
    %c0_i32_1 = arith.constant 0 : i32
    %c0_i32_2 = arith.constant 0 : i32
    return %c0_i32, %c0_i32_0, %c0_i32_1 : i32, i32, i32
  }
  func.func @transform_5(%arg0: i32) -> (i32, i32, i32) {
    %c0_i32 = arith.constant 0 : i32
    %c0_i32_0 = arith.constant 0 : i32
    %c0_i32_1 = arith.constant 0 : i32
    %c0_i32_2 = arith.constant 0 : i32
    return %c0_i32, %c0_i32_0, %c0_i32_1 : i32, i32, i32
  }
  func.func @transform_6(%arg0: i32) -> (i32, i32, i32) {
    %c0_i32 = arith.constant 0 : i32
    %c0_i32_0 = arith.constant 0 : i32
    %c0_i32_1 = arith.constant 0 : i32
    return %arg0, %c0_i32, %c0_i32_0 : i32, i32, i32
  }
}

</mosaic_0001>

<bundles_post_ra>
// kernel: transformer_block_forward.7
= control target key start
LH: loop header
LB: loop body
LE: loop exit
PB: predicated region body
PF: predicated region fallthrough
CT: control target
= control target key end

     0   :  { %s560_s12 = smov 0   ;;  %s562_s13 = smov 0   ;;  %s613_s0 = inlined_call_operand.vmem [shape: f32[2,32,256], index: 0, kind: input, shape index: {}]   ;;  %s614_s1 = inlined_call_operand.vmem [shape: f32[8,16], index: 1, kind: input, shape index: {}]   ;;  %s615_s2 = inlined_call_operand.vmem [shape: f32[2,8,256], index: 2, kind: input, shape index: {}]   ;;  %s616_s3 = inlined_call_operand.vmem [shape: f32[2,8,256], index: 3, kind: output, shape index: {}]  }
   0x1   :  { %s564_s14 = smov 0  }
   0x2 LB: > { %s25_s15 = sadd.s32 1, %s533_s13  ;;  %p469_p0 = scmp.ge.s32.totalorder %s537_s14, 1  ;;  %s537_s14 = sphi %s564_s14, %s13_s14   ;;  %s533_s13 = sphi %s562_s13, %s618_s13   ;;  %s529_s12 = sphi %s560_s12, %s617_s12  }
   0x3   : > { %p27_p1 = scmp.ge.s32.totalorder %s25_s15, 2  ;;  %p175_p2 = scmp.lt.s32.totalorder %s537_s14, 3 }
   0x5   : > { %s620_s15 = smov (%p27_p1, %s25_s15), 0  ;;  %p176_p3 = pnand %p469_p0, %p175_p2 }
   0x6   : > { %p217_p4 = scmp.lt.s32.totalorder (!%p176_p3), %s529_s12, 1 }
   0x7   : > { %179 = sbr.rel (%p176_p3) target bundleno = 240 (0xf0), region = 32 }
   0xc   : > { %v539_v0 = vmov 0.0   ;;  %s622_s12 = smov (!%p217_p4, %s529_s12), 1  ;;  %v274_v33 = vld [vmem:[%s614_s1] sm:$0xff]  ;;  %vm279_vm0 = vcmask 130048  }
   0xd   : > { %347 = vmatprep.mubr.f32.mxu0 %v539_v0  ;;  %s479_s16 = sshll.u32 %s622_s12, 6  ;;  %s480_s22 = sshll.u32 %s622_s12, 4 }
   0xe   : > { %s584_s19 = scalar_lea.vmem %s613_s0, %s479_s16  ;;  %s234_s25 = scalar_lea.vmem %s615_s2, %s480_s22 }
   0xf   : > { %v249_v1 = vld [vmem:[%s584_s19 + $0x18] sm:$0xff]  ;;  %v248_v2 = vld [vmem:[%s584_s19 + $0x10] sm:$0xff]  ;;  %v247_v4 = vld [vmem:[%s584_s19 + $0x8] sm:$0xff]  ;;  %s244_s28 = scalar_lea.vmem %s616_s3, %s480_s22 }
  0x10   : > { %v261_v3 = vmul.f32 0.70710677, %v249_v1  ;;  %v260_v5 = vmul.f32 0.70710677, %v248_v2  ;;  %v259_v6 = vmul.f32 0.70710677, %v247_v4 }
  0x11   : > { %v246_v7 = vld [vmem:[%s584_s19] sm:$0xff]  ;;  %v257_v9 = vmul.f32 0.5, %v249_v1  ;;  %v256_v11 = vmul.f32 0.5, %v248_v2  ;;  %v255_v14 = vmul.f32 0.5, %v247_v4  ;;  %v253_v16 = vld [vmem:[%s584_s19 + $0x38] sm:$0xff]  ;;  %v252_v21 = vld [vmem:[%s584_s19 + $0x30] sm:$0xff] }
  0x12   : > { %507 = verf.f32 %v261_v3  ;;  %v258_v8 = vmul.f32 0.70710677, %v246_v7  ;;  %v254_v18 = vmul.f32 0.5, %v246_v7  ;;  %v251_v24 = vld [vmem:[%s584_s19 + $0x28] sm:$0xff]  ;;  %v250_v28 = vld [vmem:[%s584_s19 + $0x20] sm:$0xff] }
  0x13   : > { %509 = verf.f32 %v260_v5  ;;  %v354_v34 = vld [vmem:[%s234_s25] sm:$0xff]  ;;  %v355_v36 = vld [vmem:[%s234_s25 + $0x8] sm:$0xff] }
  0x14   : > { %511 = verf.f32 %v259_v6 }
  0x15   : > { %513 = verf.f32 %v258_v8 }
  0x1f   : > { %v508_v10 = vpop.eup %507 }
  0x20   : > { %v510_v12 = vpop.eup %509  ;;  %v269_v13 = vadd.f32 1.0, %v508_v10 }
  0x21   : > { %v512_v15 = vpop.eup %511  ;;  %v268_v17 = vadd.f32 1.0, %v510_v12 }
  0x22   : > { %v514_v19 = vpop.eup %513  ;;  %v273_v20 = vmul.f32 %v269_v13, %v257_v9  ;;  %v267_v22 = vadd.f32 1.0, %v512_v15 }
  0x23   : > { %v272_v23 = vmul.f32 %v268_v17, %v256_v11  ;;  %v266_v25 = vadd.f32 1.0, %v514_v19 }
  0x24   : > { %v278_v26 = vmul.f32 %v273_v20, %v253_v16  ;;  %v271_v27 = vmul.f32 %v267_v22, %v255_v14 }
  0x25   : > { %v277_v29 = vmul.f32 %v272_v23, %v252_v21  ;;  %v270_v30 = vmul.f32 %v266_v25, %v254_v18 }
  0x26   : > { %311 = vmatprep.subr.mxu0 %v278_v26  ;;  %v276_v31 = vmul.f32 %v271_v27, %v251_v24 }
  0x27   : > { %312 = vmatpush1.msra.mxu0 %v277_v29  ;;  %v275_v32 = vmul.f32 %v270_v30, %v250_v28 }
  0x28   : > { %313 = vmatprep.subr.mxu0 %v276_v31 }
  0x29   : > { %314 = vmatpush1.msra.mxu0 %v275_v32 }
  0x2a   : > { %476 = vmatmul.mubr.msk.f32.vlgmr.msra.gmra.mxu0 %vm279_vm0, %v274_v33 }
  0xea   : > { %v349_v35 = vpop.f32.mrf.mxu0 }
  0xeb   : > { %v356_v37 = vadd.f32 %v354_v34, %v349_v35 }
  0xec   : > { %v351_v38 = vpop.f32.mrf.mxu0 }
  0xed   : > { %358 = vst [vmem:[%s244_s28] sm:$0xff] %v356_v37  ;;  %v357_v39 = vadd.f32 %v355_v36, %v351_v38 }
  0xef   : > { %359 = vst [vmem:[%s244_s28 + $0x8] sm:$0xff] %v357_v39 }
  0xf0 PF: > { %s13_s14 = sadd.s32 1, %s537_s14   ;;  %s617_s12 = smov %s533_s13 }
  0xf1   : > { %p10_p5 = scmp.ge.s32.totalorder %s13_s14, 4   ;;  %s618_s13 = smov %s620_s15 }
  0xf3   :  { %12 = sbr.rel (!%p10_p5) target bundleno = 2 (0x2), region = 65 }

// kernel: transformer_block_forward.5
= control target key start
LH: loop header
LB: loop body
LE: loop exit
PB: predicated region body
PF: predicated region fallthrough
CT: control target
= control target key end

     0   :  { %9 = vsyncpa [#allocation3], 0  ;;  %s1048_s15 = smov 0   ;;  %s1130_s0 = inlined_call_operand.vmem [shape: f32[2,3,2,4,256], index: 0, kind: input, shape index: {}]   ;;  %s1131_s1 = inlined_call_operand.vmem [shape: f32[2], index: 1, kind: input, shape index: {}]   ;;  %s1132_s2 = inlined_call_operand.vmem [shape: f32[2,8,4], index: 2, kind: input, shape index: {}]   ;;  %s1133_s3 = inlined_call_operand.vmem [shape: f32[2,8,256], index: 3, kind: input, shape index: {}]   ;;  %s1134_s4 = inlined_call_operand.vmem [shape: f32[2,8,256], index: 4, kind: output, shape index: {}]  }
   0x1 LB: > { %s918_s16 = sadd.s32 4294967295, %s1018_s15   ;;  %p920_p0 = scmp.ge.s32.totalorder %s1018_s15, 1  ;;  %s1018_s15 = sphi %s1048_s15, %s15_s15  }
   0x2   : > { %p140_p1 = scmp.lt.s32.totalorder %s1018_s15, 3  ;;  %s153_s19 = sshll.u32 %s1131_s1, 4  ;;  %s154_s19 = int_to_ptr.vmem [resolvable:$true] %s153_s19 }
   0x3   : > { %p962_p3 = scmp.eq.s32.totalorder %s918_s16, 0  ;;  %s993_s21 = scalar_lea.vmem %s154_s19, 16 }
   0x4   : > { %p1059_p2 = pnand %p920_p0, %p140_p1  ;;  %p994_p6 = scmp.ne.s32.totalorder %s154_s19, %s993_s21 }
   0x5   : > { %p1001_p10 = scmp.lt.s32.totalorder %s154_s19, %s154_s19  ;;  %p1002_p11 = scmp.lt.s32.totalorder %s993_s21, %s993_s21 }
   0x6   : > { %p958_p4 = pneg %p1059_p2 }
   0x7   : > { %p1003_p12 = por %p1002_p11, %p1001_p10 }
   0x8   : > { %p959_p5 = pnand %p962_p3, %p958_p4 }
   0xa   : > { %p995_p7 = pneg %p959_p5 }
   0xc   : > { %p996_p8 = pnand %p995_p7, %p994_p6 }
   0xe   : > { %p997_p9 = pneg %p996_p8 }
  0x10   : > { %p1004_p13 = pnand %p1003_p12, %p997_p9 }
  0x12   : > { %1007 = shalt.err (!%p1004_p13)
}
  0x13   : > { %s1020_s22 = smov [#allocation2]   ;;  %185 = sbr.rel (%p1059_p2) target bundleno = 1621 (0x655), region = 36 }
  0x14   : > { %961 = dma.vmem_to_smem (!%p959_p5), %s154_s19, 16, %s1020_s22, [#allocation3]  }
  0x18   : > { %1013 = dma.done.wait (%p962_p3), [#allocation3], 16  }
  0x19   : > { %1015 = vsyncadd (%p962_p3), [#allocation3], 4294967280 }
  0x1a   : > { %191 = sfence }
  0x1b   : > { %p217_p0 = scmp.lt.s32.totalorder %s918_s16, 1  ;;  %vm241_vm0 = vcmask 1043456   ;;  %v1021_v16 = vmov 839922192   ;;  %v253_v18 = vlaneseq  ;;  %s356_s27 = sld [smem:[#allocation2]]  ;;  %vm359_vm1 = vcmask 27648  }
  0x1c   : > { %v251_v17 = vunpack.c.l.s4 %v1021_v16  ;;  %v1022_v56 = vmov 0.0   ;;  %vm373_vm2 = vcmask 31744   ;;  %s938_s28 = sld [smem:[#allocation2 + $0x1]] }
  0x1d   : > { %s1137_s16 = smov (!%p217_p0, %s918_s16), 1  ;;  %v254_v20 = vshrl.u32 %v253_v18, 7  ;;  %445 = vmatprep.mubr.f32.mxu1 %v1022_v56 }
  0x1e   : > { %s953_s23 = smul.u32 48, %s1137_s16  ;;  %v252_v19 = vunpack.c.0.s8 %v251_v17  ;;  %s951_s7 = sshll.u32 %s1137_s16, 4 }
  0x1f   : > { %s226_s10 = scalar_lea.vmem %s1133_s3, %s951_s7  ;;  %s231_s13 = scalar_lea.vmem %s1134_s4, %s951_s7 }
  0x20   : > { %s1076_s26 = scalar_lea.vmem %s1130_s0, %s953_s23  ;;  %v1084_v21 = vsub.s32 %v252_v19, %v254_v20 }
  0x21   : > { %v930_v0 = vld [vmem:[%s1076_s26 + $0x10] sm:$0xff]  ;;  %v232_v1 = vld [vmem:[%s1076_s26] sm:$0xff]  ;;  %v357_v30 = vstv %s356_s27  ;;  %v936_v35 = vld [vmem:[%s1076_s26 + $0x18] sm:$0xff] }
  0x22   : > { %v259_v2 = vmul.f32 %v930_v0, %v930_v0  ;;  %v237_v3 = vmul.f32 %v232_v1, %v232_v1  ;;  %v935_v36 = vld [vmem:[%s1076_s26 + $0x8] sm:$0xff]  ;;  %v480_v37 = vmul.f32 %v936_v35, %v936_v35  ;;  %v931_v54 = vld [vmem:[%s1076_s26 + $0x20] sm:$0xff] }
  0x23   : > { %v459_v38 = vmul.f32 %v935_v36, %v935_v36  ;;  %v372_v55 = vcombine.high %v931_v54, %v931_v54 }
  0x24   : > { %v261_v4 = vcombine.high %v259_v2, %v259_v2  ;;  %v263_v5 = vsel %vm241_vm0, %v259_v2, 0.0  ;;  %v239_v6 = vcombine.high %v237_v3, %v237_v3  ;;  %v242_v8 = vsel %vm241_vm0, %v237_v3, 0.0 }
  0x25   : > { %v482_v39 = vcombine.high %v480_v37, %v480_v37  ;;  %v484_v40 = vsel %vm241_vm0, %v480_v37, 0.0  ;;  %v461_v41 = vcombine.high %v459_v38, %v459_v38  ;;  %v463_v42 = vsel %vm241_vm0, %v459_v38, 0.0  ;;  %932 = vmatprep.subr.msk.mxu1 %vm241_vm0, %v372_v55 }
  0x26   : > { %v264_v7 = vsel %vm241_vm0, %v261_v4, 0.0  ;;  %v243_v9 = vsel %vm241_vm0, %v239_v6, 0.0  ;;  %933 = vmatpush1.msk.msra.mxu1 %vm241_vm0, %v931_v54  ;;  %v937_v6 = vld [vmem:[%s1076_s26 + $0x28] sm:$0xff] }
  0x27   : > { %v265_v10 = vadd.f32 %v264_v7, %v263_v5  ;;  %v244_v11 = vadd.f32 %v243_v9, %v242_v8  ;;  %v485_v43 = vsel %vm241_vm0, %v482_v39, 0.0  ;;  %v464_v44 = vsel %vm241_vm0, %v461_v41, 0.0 }
  0x28   : > { %v486_v45 = vadd.f32 %v485_v43, %v484_v40  ;;  %v465_v46 = vadd.f32 %v464_v44, %v463_v42  ;;  %v592_v7 = vcombine.high %v937_v6, %v937_v6 }
  0x29   : > { %266 = vadd.xlane.f32.xlu0 %v265_v10  ;;  %v578_v10 = vstv %s938_s28 }
  0x2d   : > { %245 = vadd.xlane.f32.xlu0 %v244_v11 }
  0x31   : > { %466 = vadd.xlane.f32.xlu0 %v465_v46 }
  0xb2   : > { %v267_v12 = vpop.xlane.xlu0 %266 }
  0xb3   : > { %v268_v13 = vmax.f32 %v267_v12, 1e-24 }
  0xb5   : > { %977 = vrsqrt.f32 %v268_v13 }
  0xb6   : > { %v246_v14 = vpop.xlane.xlu0 %245 }
  0xb7   : > { %v247_v15 = vmax.f32 %v246_v14, 1e-24 }
  0xb9   : > { %979 = vrsqrt.f32 %v247_v15 }
  0xba   : > { %v467_v61 = vpop.xlane.xlu0 %466 }
  0xbb   : > { %v468_v62 = vmax.f32 %v467_v61, 1e-24 }
  0xc2   : > { %v978_v22 = vpop.eup %977 }
  0xc3   : > { %v277_v23 = vrot.slane %v978_v22, %v1084_v21 }
  0xc5   : > { %v279_v24 = vmul.f32 %v930_v0, %v277_v23  ;;  %v452_v23 = vld [vmem:[%s1132_s2] sm:$0xff] }
  0xc6   : > { %v980_v25 = vpop.eup %979 }
  0xc7   : > { %v284_v26 = vcombine.high %v279_v24, %v279_v24  ;;  %v256_v27 = vrot.slane %v980_v25, %v1084_v21 }
  0xc9   : > { %316 = vmatprep.subr.mxu0 %v284_v26  ;;  %v258_v28 = vmul.f32 %v256_v27, %v232_v1  ;;  %v942_v26 = vld [vmem:[%s1132_s2 + $0x8] sm:$0xff] }
  0xca   : > { %317 = vmatpush1.xpose.msra.mxu0 %v279_v24 }
  0xcb   : > { %v281_v29 = vcombine.high %v258_v28, %v258_v28  ;;  %939 = vmatprep.subr.msk.mxu0 %vm241_vm0, %v592_v7 }
  0xcd   : > { %350 = vmatprep.mubr.f32.mxu0 %v281_v29  ;;  %v833_v29 = vld [vmem:[%s226_s10] sm:$0xff] }
  0xce   : > { %351 = vmatmul.mubr.f32.vlgmr.msra.gmra.mxu0 %v258_v28 }
  0xcf   : > { %664 = vmatprep.mubr.f32.mxu0 %v1022_v56  ;;  %940 = vmatpush1.msk.msra.mxu0 %vm241_vm0, %v937_v6 }
 0x18e   : > { %v352_v31 = vpop.f32.mrf.mxu0 }
 0x18f   : > { %v358_v32 = vmul.f32 %v357_v30, %v352_v31 }
 0x190   : > { %v354_v33 = vpop.f32.mrf.mxu0 }
 0x191   : > { %v360_v34 = vsel %vm359_vm1, %v358_v32, -inf  ;;  %v834_v33 = vld [vmem:[%s226_s10 + $0x8] sm:$0xff] }
 0x192   : > { %361 = vmax.xlane.f32.xlu1 %v360_v34 }
 0x196   : > { %487 = vadd.xlane.f32.xlu1 %v486_v45 }
 0x21b   : > { %v362_v47 = vpop.xlane.xlu1 %361 }
 0x21c   : > { %v363_v48 = vsub.f32 %v358_v32, %v362_v47 }
 0x21e   : > { %v364_v49 = vmul.f32 1.442695, %v363_v48 }
 0x21f   : > { %v488_v52 = vpop.xlane.xlu1 %487 }
 0x220   : > { %981 = vpow2.f32 %v364_v49  ;;  %v489_v53 = vmax.f32 %v488_v52, 1e-24 }
 0x222   : > { %983 = vrsqrt.f32 %v489_v53 }
 0x223   : > { %985 = vrsqrt.f32 %v468_v62 }
 0x22d   : > { %v982_v50 = vpop.eup %981 }
 0x22e   : > { %v366_v51 = vsel %vm359_vm1, %v982_v50, 0.0 }
 0x22f   : > { %367 = vadd.xlane.f32.xlu1 %v366_v51  ;;  %v984_v57 = vpop.eup %983 }
 0x230   : > { %v498_v58 = vrot.slane %v984_v57, %v1084_v21  ;;  %v986_v0 = vpop.eup %985 }
 0x231   : > { %v477_v1 = vrot.slane %v986_v0, %v1084_v21 }
 0x232   : > { %v500_v59 = vmul.f32 %v936_v35, %v498_v58 }
 0x233   : > { %v479_v2 = vmul.f32 %v935_v36, %v477_v1 }
 0x234   : > { %v505_v60 = vcombine.high %v500_v59, %v500_v59 }
 0x235   : > { %v502_v4 = vcombine.high %v479_v2, %v479_v2 }
 0x236   : > { %537 = vmatprep.subr.mxu1 %v505_v60 }
 0x2b8   : > { %v368_v63 = vpop.xlane.xlu1 %367 }
 0x2b9   : > { %987 = vrcp.f32 %v368_v63 }
 0x2c6   : > { %v988_v3 = vpop.eup %987 }
 0x2c7   : > { %v370_v5 = vmul.f32 %v988_v3, %v982_v50 }
 0x2c9   : > { %934 = vmatmul.mubr.msk.f32.vlgmr.msra.gmra.mxu1 %vm373_vm2, %v370_v5 }
 0x2ca   : > { %538 = vmatpush1.xpose.msra.mxu1 %v500_v59  ;;  %571 = vmatprep.mubr.f32.mxu1 %v502_v4 }
 0x2cd   : > { %572 = vmatmul.mubr.f32.vlgmr.msra.gmra.mxu1 %v479_v2 }
 0x2ce   : > { %746 = vmatprep.mubr.f32.mxu1 %v1022_v56 }
 0x389   : > { %v447_v8 = vpop.f32.mrf.mxu1 }
 0x38b   : > { %v449_v9 = vpop.f32.mrf.mxu1 }
 0x38c   : > { %946 = vmatprep.subr.msk.mxu0 %vm241_vm0, %v449_v9 }
 0x38d   : > { %v573_v11 = vpop.f32.mrf.mxu1 }
 0x38e   : > { %v579_v12 = vmul.f32 %v578_v10, %v573_v11 }
 0x38f   : > { %v575_v13 = vpop.f32.mrf.mxu1 }
 0x390   : > { %v580_v14 = vsel %vm359_vm1, %v579_v12, -inf }
 0x391   : > { %581 = vmax.xlane.f32.xlu0 %v580_v14 }
 0x41a   : > { %v582_v15 = vpop.xlane.xlu0 %581 }
 0x41b   : > { %v583_v16 = vsub.f32 %v579_v12, %v582_v15 }
 0x41d   : > { %v584_v17 = vmul.f32 1.442695, %v583_v16 }
 0x41f   : > { %989 = vpow2.f32 %v584_v17 }
 0x42c   : > { %v990_v18 = vpop.eup %989 }
 0x42d   : > { %v586_v19 = vsel %vm359_vm1, %v990_v18, 0.0 }
 0x42e   : > { %587 = vadd.xlane.f32.xlu1 %v586_v19 }
 0x4b7   : > { %v588_v20 = vpop.xlane.xlu1 %587 }
 0x4b8   : > { %991 = vrcp.f32 %v588_v20 }
 0x4c5   : > { %v992_v21 = vpop.eup %991 }
 0x4c6   : > { %v590_v22 = vmul.f32 %v992_v21, %v990_v18 }
 0x4c8   : > { %941 = vmatmul.mubr.msk.f32.vlgmr.msra.gmra.mxu0 %vm373_vm2, %v590_v22 }
 0x4c9   : > { %947 = vmatpush1.msk.msra.mxu0 %vm241_vm0, %v447_v8  ;;  %826 = vmatprep.mubr.f32.mxu0 %v1022_v56 }
 0x4cc   : > { %948 = vmatmul.mubr.msk.f32.vlgmr.msra.gmra.mxu0 %vm373_vm2, %v452_v23 }
 0x588   : > { %v666_v24 = vpop.f32.mrf.mxu0 }
 0x58a   : > { %v668_v25 = vpop.f32.mrf.mxu0 }
 0x58b   : > { %943 = vmatprep.subr.msk.mxu1 %vm241_vm0, %v668_v25 }
 0x58c   : > { %944 = vmatpush1.msk.msra.mxu1 %vm241_vm0, %v666_v24  ;;  %v828_v27 = vpop.f32.mrf.mxu0 }
 0x58d   : > { %945 = vmatmul.mubr.msk.f32.vlgmr.msra.gmra.mxu1 %vm373_vm2, %v942_v26 }
 0x58e   : > { %v830_v32 = vpop.f32.mrf.mxu0 }
 0x64d   : > { %v748_v28 = vpop.f32.mrf.mxu1 }
 0x64e   : > { %v829_v30 = vadd.f32 %v828_v27, %v748_v28 }
 0x64f   : > { %v750_v31 = vpop.f32.mrf.mxu1 }
 0x650   : > { %v835_v34 = vadd.f32 %v833_v29, %v829_v30  ;;  %v831_v35 = vadd.f32 %v830_v32, %v750_v31 }
 0x652   : > { %837 = vst [vmem:[%s231_s13] sm:$0xff] %v835_v34  ;;  %v836_v36 = vadd.f32 %v834_v33, %v831_v35 }
 0x654   : > { %838 = vst [vmem:[%s231_s13 + $0x8] sm:$0xff] %v836_v36 }
 0x655 PF: > { %s15_s15 = sadd.s32 1, %s1018_s15  }
 0x656   : > { %p12_p1 = scmp.ge.s32.totalorder %s15_s15, 4  }
 0x658   :  { %14 = sbr.rel (!%p12_p1) target bundleno = 1 (0x1), region = 80 }
 0x65d   :  { %860 = vsyncpa [#allocation3], 1 }
 0x65e   :  { %862 = vsyncpa [#allocation3 + $0x1], 1 }

// kernel: transformer_block_forward.4
= control target key start
LH: loop header
LB: loop body
LE: loop exit
PB: predicated region body
PF: predicated region fallthrough
CT: control target
= control target key end

     0   :  { %s1168_s21 = smov 0   ;;  %s1825_s0 = inlined_call_operand.vmem [shape: f32[2,8,256], index: 0, kind: input, shape index: {}]   ;;  %s1826_s1 = inlined_call_operand.vmem [shape: f32[8,1], index: 1, kind: input, shape index: {}]   ;;  %s1827_s2 = inlined_call_operand.vmem [shape: f32[8,1], index: 2, kind: input, shape index: {}]   ;;  %s1828_s3 = inlined_call_operand.vmem [shape: f32[24,8], index: 3, kind: input, shape index: {}]   ;;  %s1829_s4 = inlined_call_operand.vmem [shape: f32[9,24,1], index: 4, kind: input, shape index: {}]   ;;  %s1830_s5 = inlined_call_operand.vmem [shape: f32[9,1,256], index: 5, kind: input, shape index: {}]   ;;  %s1831_s6 = inlined_call_operand.vmem [shape: f32[2,24,256], index: 6, kind: output, shape index: {}]  }
   0x1 LB: > { %s1043_s22 = sadd.s32 4294967295, %s1121_s21   ;;  %p1047_p0 = scmp.ge.s32.totalorder %s1121_s21, 1  ;;  %s1121_s21 = sphi %s1168_s21, %s16_s21  }
   0x2   : > { %p212_p1 = scmp.lt.s32.totalorder %s1121_s21, 3 }
   0x4   : > { %p213_p2 = pnand %p1047_p0, %p212_p1 }
   0x6   : > { %216 = sbr.rel (%p213_p2) target bundleno = 557 (0x22d), region = 44 }
   0xb   : > { %v293_v0 = vld [vmem:[%s1826_s1] sm:$0xff]  ;;  %v1123_v1 = vmov 0   ;;  %v1124_v3 = vmov 0.0   ;;  %v1056_v4 = vld [vmem:[%s1829_s4 + $0x70] sm:$0xff]  ;;  %v470_v5 = vld [vmem:[%s1829_s4 + $0x8] sm:$0xff]  ;;  %p242_p3 = scmp.lt.s32.totalorder %s1043_s22, 1 }
   0xc   : > { %1109 = vset.pattern.permute.xlu0 %v1123_v1  ;;  %1110 = vset.pattern.permute.xlu1 %v1123_v1  ;;  %v301_v2 = vld [vmem:[%s1827_s2] sm:$0xff]  ;;  %v1058_v6 = vld [vmem:[%s1829_s4 + $0x18] sm:$0xff]  ;;  %v1060_v7 = vld [vmem:[%s1829_s4 + $0x28] sm:$0xff]  ;;  %vm312_vm0 = vcmask 64512   ;;  %s1125_s25 = smov 17   ;;  %s1126_s26 = smov 16  }
   0xd   : > { %296 = vperm.xlu0 %1109, %v293_v0   ;;  %386 = vmatprep.mubr.f32.mxu0 %v1124_v3  ;;  %v1063_v8 = vld [vmem:[%s1829_s4 + $0x38] sm:$0xff]  ;;  %s1881_s22 = smov (!%p242_p3, %s1043_s22), 1  ;;  %v1066_v9 = vld [vmem:[%s1829_s4 + $0x48] sm:$0xff]  ;;  %v1071_v11 = vld [vmem:[%s1829_s4 + $0x80] sm:$0xff]  ;;  %s1127_s27 = smov 15  }
   0xe   : > { %392 = vmatprep.mubr.f32.mxu1 %v1124_v3  ;;  %s1087_s15 = sshll.u32 %s1881_s22, 4  ;;  %v1068_v10 = vld [vmem:[%s1829_s4 + $0x58] sm:$0xff]  ;;  %v1079_v17 = vld [vmem:[%s1829_s4 + $0xb0] sm:$0xff]  ;;  %v1082_v20 = vld [vmem:[%s1829_s4 + $0xc0] sm:$0xff]  ;;  %s1128_s28 = smov 1  }
   0xf   : > { %s246_s20 = scalar_lea.vmem %s1825_s0, %s1087_s15  ;;  %v1075_v14 = vld [vmem:[%s1829_s4 + $0x98] sm:$0xff]  ;;  %v1054_v23 = vld [vmem:[%s1829_s4 + $0x60] sm:$0xff]  ;;  %v1084_v24 = vld [vmem:[%s1829_s4 + $0xd0] sm:$0xff]  ;;  %s1129_s29 = smov 127  }
  0x10   : > { %v252_v12 = vld [vmem:[%s246_s20] sm:$0xff]  ;;  %v253_v13 = vld [vmem:[%s246_s20 + $0x8] sm:$0xff]  ;;  %411 = vperm.xlu1 %1110, %v1054_v23   ;;  %v471_v32 = vld [vmem:[%s1829_s4 + $0x10] sm:$0xff]  ;;  %s1130_s30 = smov 113   ;;  %s1131_s7 = smov 112  }
  0x11   : > { %304 = vperm.xlu0 %1109, %v301_v2   ;;  %v254_v15 = vrot.slane %v252_v12, 4  ;;  %v260_v16 = vrot.slane %v253_v13, 4  ;;  %v1055_v26 = vld [vmem:[%s1829_s4 + $0x68] sm:$0xff]  ;;  %v469_v29 = vld [vmem:[%s1829_s4] sm:$0xff]  ;;  %v1062_v38 = vld [vmem:[%s1829_s4 + $0x30] sm:$0xff]  ;;  %s1132_s8 = smov 111  }
  0x12   : > { %v1059_v35 = vld [vmem:[%s1829_s4 + $0x20] sm:$0xff]  ;;  %v1067_v44 = vld [vmem:[%s1829_s4 + $0x50] sm:$0xff]  ;;  %v1070_v47 = vld [vmem:[%s1829_s4 + $0x78] sm:$0xff] }
  0x13   : > { %v255_v18 = vadd.f32 %v254_v15, %v252_v12  ;;  %v261_v19 = vadd.f32 %v260_v16, %v253_v13  ;;  %v1064_v41 = vld [vmem:[%s1829_s4 + $0x40] sm:$0xff]  ;;  %v1072_v50 = vld [vmem:[%s1829_s4 + $0x88] sm:$0xff]  ;;  %v1074_v53 = vld [vmem:[%s1829_s4 + $0x90] sm:$0xff] }
  0x14   : > { %416 = vperm.xlu1 %1110, %v1055_v26   ;;  %v1076_v56 = vld [vmem:[%s1829_s4 + $0xa0] sm:$0xff]  ;;  %v1078_v59 = vld [vmem:[%s1829_s4 + $0xa8] sm:$0xff]  ;;  %v1080_v62 = vld [vmem:[%s1829_s4 + $0xb8] sm:$0xff] }
  0x15   : > { %421 = vperm.xlu0 %1109, %v1056_v4   ;;  %v256_v21 = vrot.slane %v255_v18, 2  ;;  %v262_v22 = vrot.slane %v261_v19, 2  ;;  %v1083_v1 = vld [vmem:[%s1829_s4 + $0xc8] sm:$0xff]  ;;  %v311_v16 = vld [vmem:[%s1828_s3 + $0x10] sm:$0xff] }
  0x16   : > { %v310_v15 = vld [vmem:[%s1828_s3 + $0x8] sm:$0xff] }
  0x17   : > { %v257_v25 = vadd.f32 %v256_v21, %v255_v18  ;;  %v263_v27 = vadd.f32 %v262_v22, %v261_v19 }
  0x18   : > { %474 = vperm.xlu1 %1110, %v469_v29  }
  0x19   : > { %479 = vperm.xlu0 %1109, %v470_v5   ;;  %v258_v28 = vrot.slane %v257_v25, 1  ;;  %v264_v30 = vrot.slane %v263_v27, 1 }
  0x1b   : > { %v259_v31 = vadd.f32 %v258_v28, %v257_v25  ;;  %v265_v33 = vadd.f32 %v264_v30, %v263_v27 }
  0x1c   : > { %484 = vperm.xlu1 %1110, %v471_v32  }
  0x1d   : > { %543 = vperm.xlu0 %1109, %v1058_v6   ;;  %v267_v34 = vmul.f32 0.125, %v259_v31  ;;  %v268_v36 = vmul.f32 0.125, %v265_v33 }
  0x1f   : > { %v269_v37 = vsub.f32 %v252_v12, %v267_v34  ;;  %v270_v39 = vsub.f32 %v253_v13, %v268_v36 }
  0x20   : > { %548 = vperm.xlu1 %1110, %v1059_v35  }
  0x21   : > { %553 = vperm.xlu0 %1109, %v1060_v7   ;;  %v271_v40 = vmul.f32 %v269_v37, %v269_v37  ;;  %v272_v42 = vmul.f32 %v270_v39, %v270_v39 }
  0x23   : > { %v273_v43 = vrot.slane %v271_v40, 4  ;;  %v279_v45 = vrot.slane %v272_v42, 4 }
  0x24   : > { %612 = vperm.xlu1 %1110, %v1062_v38  }
  0x25   : > { %617 = vperm.xlu0 %1109, %v1063_v8   ;;  %v274_v46 = vadd.f32 %v273_v43, %v271_v40  ;;  %v280_v48 = vadd.f32 %v279_v45, %v272_v42 }
  0x27   : > { %v275_v49 = vrot.slane %v274_v46, 2  ;;  %v281_v51 = vrot.slane %v280_v48, 2 }
  0x28   : > { %622 = vperm.xlu1 %1110, %v1064_v41  }
  0x29   : > { %681 = vperm.xlu0 %1109, %v1066_v9   ;;  %v276_v52 = vadd.f32 %v275_v49, %v274_v46  ;;  %v282_v54 = vadd.f32 %v281_v51, %v280_v48 }
  0x2b   : > { %v277_v55 = vrot.slane %v276_v52, 1  ;;  %v283_v57 = vrot.slane %v282_v54, 1 }
  0x2c   : > { %686 = vperm.xlu1 %1110, %v1067_v44  }
  0x2d   : > { %691 = vperm.xlu0 %1109, %v1068_v10   ;;  %v278_v58 = vadd.f32 %v277_v55, %v276_v52  ;;  %v284_v60 = vadd.f32 %v283_v57, %v282_v54  ;;  %v442_v57 = vlaneseq }
  0x2f   : > { %v285_v61 = vmul.f32 0.125, %v278_v58  ;;  %v286_v63 = vmul.f32 0.125, %v284_v60  ;;  %v454_v60 = vshrl.u32 %v442_v57, 7 }
  0x30   : > { %750 = vperm.xlu1 %1110, %v1070_v47  }
  0x31   : > { %755 = vperm.xlu0 %1109, %v1071_v11   ;;  %v287_v0 = vadd.f32 1e-05, %v285_v61  ;;  %v288_v2 = vadd.f32 1e-05, %v286_v63  ;;  %v1461_v63 = vand.u32 127, %v442_v57 }
  0x33   : > { %1111 = vrsqrt.f32 %v287_v0  ;;  %v1463_v0 = vsub.s32 0, %v454_v60  ;;  %vm444_vm1 = vcmp.lt.s32.totalorder %v1461_v63, 17  ;;  %vm511_vm2 = vcmp.lt.s32.totalorder %v1461_v63, 16 }
  0x34   : > { %760 = vperm.xlu1 %1110, %v1072_v50   ;;  %1113 = vrsqrt.f32 %v288_v2  ;;  %vm580_vm3 = vcmp.lt.s32.totalorder %v1461_v63, 15  ;;  %vm649_vm4 = vcmp.lt.s32.totalorder %v1461_v63, 1  ;;  %vm718_vm5 = vcmp.lt.s32.totalorder %v1461_v63, 127 }
  0x35   : > { %824 = vperm.xlu0 %1109, %v1075_v14   ;;  %v309_v14 = vld [vmem:[%s1828_s3] sm:$0xff]  ;;  %vm787_vm6 = vcmp.lt.s32.totalorder %v1461_v63, 113  ;;  %vm856_vm7 = vcmp.lt.s32.totalorder %v1461_v63, 112  ;;  %vm925_vm8 = vcmp.lt.s32.totalorder %v1461_v63, 111 }
  0x38   : > { %819 = vperm.xlu1 %1110, %v1074_v53  }
  0x39   : > { %893 = vperm.xlu0 %1109, %v1079_v17  }
  0x3c   : > { %829 = vperm.xlu1 %1110, %v1076_v56  }
  0x3d   : > { %957 = vperm.xlu0 %1109, %v1082_v20  }
  0x40   : > { %888 = vperm.xlu1 %1110, %v1078_v59   ;;  %v1112_v4 = vpop.eup %1111 }
  0x41   : > { %967 = vperm.xlu0 %1109, %v1084_v24   ;;  %v1114_v5 = vpop.eup %1113  ;;  %v291_v6 = vmul.f32 %v1112_v4, %v269_v37 }
  0x42   : > { %v292_v7 = vmul.f32 %v1114_v5, %v270_v39 }
  0x44   : > { %898 = vperm.xlu1 %1110, %v1080_v62  }
  0x48   : > { %962 = vperm.xlu1 %1110, %v1083_v1   ;;  %v451_v1 = vld [vmem:[%s1830_s5] sm:$0x3] }
  0x49   : > { %v1474_v5 = vrot.slane %v451_v1, %v1463_v0 }
  0x4b   : > { %1861 = vst [vmem:[#allocation15_spill] sm:$0xff] %v1474_v5 }
  0x88   : > { %v297_v8 = vpop.permute.xlu0 %296 }
  0x89   : > { %v299_v9 = vmul.f32 %v297_v8, %v291_v6  ;;  %v300_v10 = vmul.f32 %v297_v8, %v292_v7  ;;  %v459_v6 = vsub.s32 1, %v454_v60  ;;  %v1061_v60 = vld [vmem:[%s1830_s5 + $0x4] sm:$0x3] }
  0x8b   : > { %v1315_v19 = vpop.permute.xlu1 %411 }
  0x8c   : > { %v305_v11 = vpop.permute.xlu0 %304 }
  0x8d   : > { %v308_v12 = vadd.f32 %v305_v11, %v300_v10  ;;  %v307_v13 = vadd.f32 %v305_v11, %v299_v9  ;;  %v1480_v10 = vrot.slane %v451_v1, %v459_v6 }
  0x8f   : > { %352 = vmatprep.subr.mxu0 %v308_v12  ;;  %1088 = vmatprep.subr.mxu1 %v308_v12  ;;  %v1327_v21 = vpop.permute.xlu1 %416  ;;  %1862 = vst [vmem:[#allocation16_spill] sm:$0xff] %v1480_v10 }
  0x90   : > { %353 = vmatpush1.msra.mxu0 %v307_v13  ;;  %1089 = vmatpush1.msra.mxu1 %v307_v13  ;;  %v1339_v23 = vpop.permute.xlu0 %421 }
  0x91   : > { %1051 = vmatmul.mubr.msk.f32.vlgmr.msra.gmra.mxu0 %vm312_vm0, %v309_v14  ;;  %1052 = vmatmul.mubr.msk.f32.vlgmr.msra.gmra.mxu1 %vm312_vm0, %v310_v15  ;;  %1848 = vst [vmem:[#allocation2_spill] sm:$0xff] %v1339_v23 }
  0x92   : > { %398 = vmatprep.mubr.f32.mxu1 %v1124_v3 }
  0x93   : > { %v1333_v22 = vpop.permute.xlu1 %474 }
  0x94   : > { %v1351_v25 = vpop.permute.xlu0 %479 }
  0x95   : > { %1053 = vmatmul.mubr.msk.f32.gmra.mxu1 %vm312_vm0, %v311_v16  ;;  %v1057_v16 = vld [vmem:[%s1830_s5 + $0x2] sm:$0x3] }
  0x97   : > { %v1341_v24 = vpop.permute.xlu1 %484 }
  0x98   : > { %1849 = vst [vmem:[#allocation3_spill] sm:$0xff] %v1341_v24  ;;  %v1361_v28 = vpop.permute.xlu0 %543 }
  0x9b   : > { %v1353_v26 = vpop.permute.xlu1 %548 }
  0x9c   : > { %v1373_v30 = vpop.permute.xlu0 %553 }
  0x9d   : > { %1851 = vst [vmem:[#allocation5_spill] sm:$0xff] %v1373_v30 }
  0x9f   : > { %v1363_v29 = vpop.permute.xlu1 %612 }
  0xa0   : > { %v1381_v32 = vpop.permute.xlu0 %617 }
  0xa3   : > { %v1375_v31 = vpop.permute.xlu1 %622 }
  0xa4   : > { %1852 = vst [vmem:[#allocation6_spill] sm:$0xff] %v1375_v31  ;;  %v1393_v34 = vpop.permute.xlu0 %681 }
  0xa7   : > { %v1383_v33 = vpop.permute.xlu1 %686 }
  0xa8   : > { %v1403_v37 = vpop.permute.xlu0 %691 }
  0xa9   : > { %1854 = vst [vmem:[#allocation8_spill] sm:$0xff] %v1403_v37 }
  0xab   : > { %v1395_v35 = vpop.permute.xlu1 %750 }
  0xac   : > { %v1415_v39 = vpop.permute.xlu0 %755 }
  0xaf   : > { %v1405_v38 = vpop.permute.xlu1 %760 }
  0xb0   : > { %1855 = vst [vmem:[#allocation9_spill] sm:$0xff] %v1405_v38  ;;  %v1423_v41 = vpop.permute.xlu0 %824 }
  0xb3   : > { %v1417_v40 = vpop.permute.xlu1 %819 }
  0xb4   : > { %v1431_v43 = vpop.permute.xlu0 %893 }
  0xb7   : > { %v1425_v42 = vpop.permute.xlu1 %829 }
  0xb8   : > { %1856 = vst [vmem:[#allocation10_spill] sm:$0xff] %v1425_v42  ;;  %v1435_v45 = vpop.permute.xlu0 %957 }
  0xb9   : > { %1857 = vst [vmem:[#allocation11_spill] sm:$0xff] %v1435_v45 }
  0xbb   : > { %v1433_v44 = vpop.permute.xlu1 %888 }
  0xbc   : > { %v1439_v47 = vpop.permute.xlu0 %967 }
  0xbd   : > { %1859 = vst [vmem:[#allocation13_spill] sm:$0xff] %v1439_v47  ;;  %v1512_v47 = vrot.slane %v1057_v16, %v459_v6 }
  0xbf   : > { %v1437_v46 = vpop.permute.xlu1 %898 }
  0xc0   : > { %1858 = vst [vmem:[#allocation12_spill] sm:$0xff] %v1437_v46 }
  0xc3   : > { %v1441_v48 = vpop.permute.xlu1 %962 }
  0xc4   : > { %1860 = vst [vmem:[#allocation14_spill] sm:$0xff] %v1441_v48 }
 0x151   : > { %v1281_v17 = vpop.f32.mrf.mxu0  ;;  %v1283_v18 = vpop.f32.mrf.mxu1 }
 0x152   : > { %432 = vrot.lane.b32.xlu0 %v1283_v18, %s1125_s25  ;;  %430 = vrot.lane.b32.xlu1 %v1281_v17, %s1125_s25  ;;  %v426_v13 = vmul.f32 %v1327_v21, %v1283_v18 }
 0x153   : > { %v1313_v3 = vpop.f32.mrf.mxu1  ;;  %v1321_v20 = vpop.f32.mrf.mxu0 }
 0x155   : > { %v1359_v27 = vpop.f32.mrf.mxu1 }
 0x156   : > { %499 = vrot.lane.b32.xlu0 %v1281_v17, %s1126_s26  ;;  %501 = vrot.lane.b32.xlu1 %v1283_v18, %s1126_s26  ;;  %1850 = vst [vmem:[#allocation4_spill] sm:$0xff] %v1359_v27 }
 0x157   : > { %v1397_v36 = vpop.f32.mrf.mxu1 }
 0x158   : > { %1853 = vst [vmem:[#allocation7_spill] sm:$0xff] %v1397_v36 }
 0x15a   : > { %570 = vrot.lane.b32.xlu0 %v1283_v18, %s1127_s27  ;;  %568 = vrot.lane.b32.xlu1 %v1281_v17, %s1127_s27 }
 0x15e   : > { %637 = vrot.lane.b32.xlu0 %v1281_v17, %s1128_s28  ;;  %639 = vrot.lane.b32.xlu1 %v1283_v18, %s1128_s28 }
 0x162   : > { %708 = vrot.lane.b32.xlu0 %v1283_v18, %s1129_s29  ;;  %706 = vrot.lane.b32.xlu1 %v1281_v17, %s1129_s29 }
 0x166   : > { %775 = vrot.lane.b32.xlu0 %v1281_v17, %s1130_s30  ;;  %846 = vrot.lane.b32.xlu1 %v1283_v18, %s1131_s7 }
 0x16a   : > { %777 = vrot.lane.b32.xlu0 %v1283_v18, %s1130_s30  ;;  %913 = vrot.lane.b32.xlu1 %v1281_v17, %s1132_s8 }
 0x16e   : > { %844 = vrot.lane.b32.xlu0 %v1281_v17, %s1131_s7  ;;  %438 = vrot.lane.b32.xlu1 %v1313_v3, %s1125_s25 }
 0x172   : > { %915 = vrot.lane.b32.xlu0 %v1283_v18, %s1132_s8  ;;  %505 = vrot.lane.b32.xlu1 %v1321_v20, %s1126_s26 }
 0x176   : > { %576 = vrot.lane.b32.xlu1 %v1313_v3, %s1127_s27  ;;  %436 = vrot.lane.b32.xlu0 %v1321_v20, %s1125_s25 }
 0x17a   : > { %643 = vrot.lane.b32.xlu1 %v1321_v20, %s1128_s28  ;;  %507 = vrot.lane.b32.xlu0 %v1313_v3, %s1126_s26 }
 0x17e   : > { %714 = vrot.lane.b32.xlu1 %v1313_v3, %s1129_s29  ;;  %574 = vrot.lane.b32.xlu0 %v1321_v20, %s1127_s27 }
 0x182   : > { %783 = vrot.lane.b32.xlu1 %v1313_v3, %s1130_s30  ;;  %645 = vrot.lane.b32.xlu0 %v1313_v3, %s1128_s28 }
 0x186   : > { %850 = vrot.lane.b32.xlu1 %v1321_v20, %s1131_s7  ;;  %712 = vrot.lane.b32.xlu0 %v1321_v20, %s1129_s29 }
 0x18a   : > { %434 = vrot.lane.b32.xlu1 %v1359_v27, %s1125_s25  ;;  %781 = vrot.lane.b32.xlu0 %v1321_v20, %s1130_s30 }
 0x18e   : > { %572 = vrot.lane.b32.xlu1 %v1359_v27, %s1127_s27  ;;  %852 = vrot.lane.b32.xlu0 %v1313_v3, %s1131_s7 }
 0x192   : > { %710 = vrot.lane.b32.xlu1 %v1359_v27, %s1129_s29  ;;  %919 = vrot.lane.b32.xlu0 %v1321_v20, %s1132_s8 }
 0x196   : > { %779 = vrot.lane.b32.xlu1 %v1359_v27, %s1130_s30  ;;  %503 = vrot.lane.b32.xlu0 %v1359_v27, %s1126_s26 }
 0x19a   : > { %917 = vrot.lane.b32.xlu1 %v1359_v27, %s1132_s8  ;;  %641 = vrot.lane.b32.xlu0 %v1359_v27, %s1128_s28 }
 0x19e   : > { %509 = vrot.lane.b32.xlu1 %v1397_v36, %s1126_s26  ;;  %848 = vrot.lane.b32.xlu0 %v1359_v27, %s1131_s7 }
 0x1a2   : > { %647 = vrot.lane.b32.xlu1 %v1397_v36, %s1128_s28  ;;  %440 = vrot.lane.b32.xlu0 %v1397_v36, %s1125_s25 }
 0x1a6   : > { %854 = vrot.lane.b32.xlu1 %v1397_v36, %s1131_s7  ;;  %578 = vrot.lane.b32.xlu0 %v1397_v36, %s1127_s27  ;;  %s1090_s27 = smul.u32 48, %s1881_s22 }
 0x1aa   : > { %921 = vrot.lane.b32.xlu1 %v1313_v3, %s1132_s8  ;;  %716 = vrot.lane.b32.xlu0 %v1397_v36, %s1129_s29  ;;  %s1722_s29 = scalar_lea.vmem %s1831_s6, %s1090_s27 }
 0x1ae   : > { %785 = vrot.lane.b32.xlu0 %v1397_v36, %s1130_s30 }
 0x1b2   : > { %923 = vrot.lane.b32.xlu0 %v1397_v36, %s1132_s8 }
 0x1c4   : > { %v433_v49 = vpop.permute.xlu0 %432  ;;  %v431_v50 = vpop.permute.xlu1 %430 }
 0x1c8   : > { %v500_v51 = vpop.permute.xlu0 %499  ;;  %v1443_v52 = vpop.permute.xlu1 %501 }
 0x1cc   : > { %v1445_v53 = vpop.permute.xlu0 %570  ;;  %v1447_v54 = vpop.permute.xlu1 %568 }
 0x1d0   : > { %v1449_v55 = vpop.permute.xlu0 %637  ;;  %v1451_v56 = vpop.permute.xlu1 %639 }
 0x1d4   : > { %v1453_v58 = vpop.permute.xlu0 %708  ;;  %v1455_v59 = vpop.permute.xlu1 %706 }
 0x1d8   : > { %v1457_v61 = vpop.permute.xlu0 %775  ;;  %v1459_v62 = vpop.permute.xlu1 %846 }
 0x1dc   : > { %v1468_v2 = vpop.permute.xlu0 %777  ;;  %v1470_v4 = vpop.permute.xlu1 %913 }
 0x1e0   : > { %v1476_v7 = vpop.permute.xlu0 %844  ;;  %v439_v8 = vpop.permute.xlu1 %438 }
 0x1e1   : > { %v449_v9 = vsel %vm444_vm1, %v439_v8, %v433_v49  ;;  %v446_v12 = vsel %vm444_vm1, %v433_v49, %v439_v8  ;;  %v427_v49 = vmul.f32 %v1327_v21, %v1313_v3  ;;  %v1504_v8 = vmul.f32 %v1315_v19, %v1281_v17  ;;  %v1069_v17 = vld [vmem:[%s1830_s5 + $0xa] sm:$0x3] }
 0x1e2   : > { %v465_v11 = vmul.f32 %v1474_v5, %v449_v9  ;;  %v466_v18 = vmul.f32 %v1480_v10, %v446_v12  ;;  %v1065_v9 = vld [vmem:[%s1830_s5 + $0x6] sm:$0x3]  ;;  %v1517_v3 = vmul.f32 %v1315_v19, %v1321_v20  ;;  %v1073_v19 = vld [vmem:[%s1830_s5 + $0xc] sm:$0x3]  ;;  %v1550_v48 = vrot.slane %v1069_v17, %v1463_v0 }
 0x1e3   : > { %v1546_v38 = vrot.slane %v1065_v9, %v459_v6  ;;  %v1557_v31 = vrot.slane %v1073_v19, %v1463_v0 }
 0x1e4   : > { %v489_v14 = vmul.f32 %v1351_v25, %v465_v11  ;;  %v1488_v15 = vpop.permute.xlu0 %915  ;;  %v506_v57 = vpop.permute.xlu1 %505  ;;  %v1510_v11 = vrot.slane %v1057_v16, %v1463_v0 }
 0x1e5   : > { %1863 = vst [vmem:[#allocation17_spill] sm:$0xff] %v1488_v15  ;;  %v512_v21 = vsel %vm511_vm2, %v500_v51, %v506_v57  ;;  %v515_v12 = vsel %vm511_vm2, %v506_v57, %v500_v51  ;;  %v1540_v51 = vrot.slane %v1065_v9, %v1463_v0  ;;  %v1077_v57 = vld [vmem:[%s1830_s5 + $0xe] sm:$0x3]  ;;  %v1554_v15 = vrot.slane %v1069_v17, %v459_v6 }
 0x1e6   : > { %v1500_v1 = vadd.f32 %v489_v14, %v426_v13  ;;  %v1527_v13 = vrot.slane %v1061_v60, %v1463_v0  ;;  %v1529_v14 = vrot.slane %v1061_v60, %v459_v6  ;;  %v490_v60 = vmul.f32 %v1351_v25, %v466_v18  ;;  %v1081_v25 = vld [vmem:[%s1830_s5 + $0x10] sm:$0x3] }
 0x1e7   : > { %v1568_v17 = vrot.slane %v1077_v57, %v1463_v0  ;;  %v1582_v36 = vrot.slane %v1077_v57, %v459_v6  ;;  %v1585_v23 = vrot.slane %v1081_v25, %v1463_v0  ;;  %v1587_v27 = vrot.slane %v1081_v25, %v459_v6 }
 0x1e8   : > { %v577_v16 = vpop.permute.xlu1 %576  ;;  %v437_v46 = vpop.permute.xlu0 %436 }
 0x1e9   : > { %v445_v20 = vsel %vm444_vm1, %v431_v50, %v437_v46  ;;  %v448_v42 = vsel %vm444_vm1, %v437_v46, %v431_v50  ;;  %v531_v46 = vmul.f32 %v1510_v11, %v515_v12  ;;  %v532_v50 = vmul.f32 %v1512_v47, %v512_v21 }
 0x1ea   : > { %v463_v18 = vmul.f32 %v1474_v5, %v448_v42  ;;  %v464_v9 = vmul.f32 %v1480_v10, %v445_v20  ;;  %v1565_v12 = vrot.slane %v1073_v19, %v459_v6  ;;  %v582_v21 = vsel %vm580_vm3, %v1445_v53, %v577_v16 }
 0x1eb   : > { %v585_v24 = vsel %vm580_vm3, %v577_v16, %v1445_v53  ;;  %v496_v20 = vadd.f32 %v490_v60, %v427_v49  ;;  %v556_v10 = vmul.f32 %v1361_v28, %v531_v46  ;;  %v557_v53 = vmul.f32 %v1361_v28, %v532_v50 }
 0x1ec   : > { %v644_v37 = vpop.permute.xlu1 %643  ;;  %v508_v30 = vpop.permute.xlu0 %507  ;;  %v602_v45 = vmul.f32 %v1527_v13, %v585_v24  ;;  %v488_v49 = vmul.f32 %v1333_v22, %v464_v9 }
 0x1ed   : > { %v513_v42 = vsel %vm511_vm2, %v1443_v52, %v508_v30  ;;  %v516_v19 = vsel %vm511_vm2, %v508_v30, %v1443_v52  ;;  %v603_v30 = vmul.f32 %v1529_v14, %v582_v21  ;;  %v487_v52 = vmul.f32 %v1333_v22, %v463_v18 }
 0x1ee   : > { %v533_v16 = vmul.f32 %v1510_v11, %v516_v19  ;;  %v534_v5 = vmul.f32 %v1512_v47, %v513_v42  ;;  %v650_v6 = vsel %vm649_vm4, %v1449_v55, %v644_v37  ;;  %v653_v28 = vsel %vm649_vm4, %v644_v37, %v1449_v55 }
 0x1ef   : > { %v627_v18 = vmul.f32 %v1381_v32, %v602_v45  ;;  %v628_v9 = vmul.f32 %v1381_v32, %v603_v30  ;;  %v670_v21 = vmul.f32 %v1546_v38, %v650_v6 }
 0x1f0   : > { %v715_v0 = vpop.permute.xlu1 %714  ;;  %v575_v57 = vpop.permute.xlu0 %574  ;;  %v558_v60 = vmul.f32 %v1353_v26, %v533_v16  ;;  %v559_v24 = vmul.f32 %v1353_v26, %v534_v5  ;;  %v493_v16 = vadd.f32 %v487_v52, %v1504_v8 }
 0x1f1   : > { %v720_v22 = vsel %vm718_vm5, %v1453_v58, %v715_v0  ;;  %v723_v46 = vsel %vm718_vm5, %v715_v0, %v1453_v58  ;;  %v581_v50 = vsel %vm580_vm3, %v1447_v54, %v575_v57  ;;  %v584_v37 = vsel %vm580_vm3, %v575_v57, %v1447_v54 }
 0x1f2   : > { %v564_v26 = vadd.f32 %v558_v60, %v1500_v1  ;;  %v565_v55 = vadd.f32 %v559_v24, %v496_v20  ;;  %v600_v5 = vmul.f32 %v1527_v13, %v584_v37  ;;  %v601_v25 = vmul.f32 %v1529_v14, %v581_v50 }
 0x1f3   : > { %v669_v58 = vmul.f32 %v1540_v51, %v653_v28  ;;  %v494_v54 = vadd.f32 %v488_v49, %v1517_v3  ;;  %v740_v1 = vmul.f32 %v1550_v48, %v720_v22  ;;  %v741_v20 = vmul.f32 %v1554_v15, %v723_v46 }
 0x1f4   : > { %v784_v42 = vpop.permute.xlu1 %783  ;;  %v646_v19 = vpop.permute.xlu0 %645  ;;  %v625_v0 = vmul.f32 %v1363_v29, %v600_v5  ;;  %v626_v45 = vmul.f32 %v1363_v29, %v601_v25  ;;  %v633_v57 = vadd.f32 %v627_v18, %v564_v26  ;;  %v634_v32 = vadd.f32 %v628_v9, %v565_v55 }
 0x1f5   : > { %v789_v30 = vsel %vm787_vm6, %v1468_v2, %v784_v42  ;;  %v792_v8 = vsel %vm787_vm6, %v784_v42, %v1468_v2  ;;  %v651_v3 = vsel %vm649_vm4, %v1451_v56, %v646_v19  ;;  %v654_v52 = vsel %vm649_vm4, %v646_v19, %v1451_v56 }
 0x1f6   : > { %v694_v29 = vmul.f32 %v1393_v34, %v669_v58  ;;  %v695_v49 = vmul.f32 %v1393_v34, %v670_v21  ;;  %v671_v6 = vmul.f32 %v1540_v51, %v654_v52  ;;  %v672_v28 = vmul.f32 %v1546_v38, %v651_v3 }
 0x1f7   : > { %v765_v2 = vmul.f32 %v1415_v39, %v740_v1  ;;  %v766_v22 = vmul.f32 %v1415_v39, %v741_v20  ;;  %v562_v46 = vadd.f32 %v556_v10, %v493_v16  ;;  %v563_v50 = vadd.f32 %v557_v53, %v494_v54 }
 0x1f8   : > { %v851_v60 = vpop.permute.xlu1 %850  ;;  %v713_v24 = vpop.permute.xlu0 %712  ;;  %v809_v37 = vmul.f32 %v1557_v31, %v789_v30  ;;  %v810_v56 = vmul.f32 %v1565_v12, %v792_v8  ;;  %v696_v26 = vmul.f32 %v1383_v33, %v671_v6  ;;  %v697_v34 = vmul.f32 %v1383_v33, %v672_v28 }
 0x1f9   : > { %v631_v55 = vadd.f32 %v625_v0, %v562_v46  ;;  %v632_v5 = vadd.f32 %v626_v45, %v563_v50  ;;  %v719_v25 = vsel %vm718_vm5, %v1455_v59, %v713_v24  ;;  %v722_v39 = vsel %vm718_vm5, %v713_v24, %v1455_v59 }
 0x1fa   : > { %v702_v10 = vadd.f32 %v696_v26, %v633_v57  ;;  %v703_v53 = vadd.f32 %v697_v34, %v634_v32  ;;  %v857_v18 = vsel %vm856_vm7, %v1476_v7, %v851_v60  ;;  %v860_v33 = vsel %vm856_vm7, %v851_v60, %v1476_v7 }
 0x1fb   : > { %v738_v21 = vmul.f32 %v1550_v48, %v719_v25  ;;  %v739_v42 = vmul.f32 %v1554_v15, %v722_v39  ;;  %v834_v20 = vmul.f32 %v1423_v41, %v809_v37  ;;  %v835_v0 = vmul.f32 %v1423_v41, %v810_v56 }
 0x1fc   : > { %v1666_v9 = vpop.permute.xlu1 %434  ;;  %v782_v58 = vpop.permute.xlu0 %781  ;;  %v771_v16 = vadd.f32 %v765_v2, %v702_v10  ;;  %v772_v54 = vadd.f32 %v766_v22, %v703_v53  ;;  %v700_v32 = vadd.f32 %v694_v29, %v631_v55  ;;  %v701_v30 = vadd.f32 %v695_v49, %v632_v5 }
 0x1fd   : > { %v788_v59 = vsel %vm787_vm6, %v1457_v61, %v782_v58  ;;  %v791_v19 = vsel %vm787_vm6, %v782_v58, %v1457_v61  ;;  %v763_v45 = vmul.f32 %v1395_v35, %v738_v21  ;;  %v764_v57 = vmul.f32 %v1395_v35, %v739_v42 }
 0x1fe   : > { %v807_v1 = vmul.f32 %v1557_v31, %v788_v59  ;;  %v808_v7 = vmul.f32 %v1565_v12, %v791_v19  ;;  %v876_v6 = vmul.f32 %v1568_v17, %v857_v18  ;;  %v877_v28 = vmul.f32 %v1582_v36, %v860_v33  ;;  %v1864_v33 = vld [vmem:[#allocation11_spill] sm:$0xff] }
 0x1ff   : > { %v769_v29 = vadd.f32 %v763_v45, %v700_v32  ;;  %v770_v49 = vadd.f32 %v764_v57, %v701_v30  ;;  %v840_v24 = vadd.f32 %v834_v20, %v771_v16  ;;  %v841_v2 = vadd.f32 %v835_v0, %v772_v54 }
 0x200   : > { %v832_v8 = vmul.f32 %v1417_v40, %v807_v1  ;;  %v833_v61 = vmul.f32 %v1417_v40, %v808_v7  ;;  %v1684_v3 = vpop.permute.xlu1 %572  ;;  %v853_v52 = vpop.permute.xlu0 %852  ;;  %v902_v34 = vmul.f32 %v1433_v44, %v877_v28 }
 0x201   : > { %v858_v41 = vsel %vm856_vm7, %v1459_v62, %v853_v52  ;;  %v861_v35 = vsel %vm856_vm7, %v853_v52, %v1459_v62  ;;  %v901_v62 = vmul.f32 %v1433_v44, %v876_v6  ;;  %v1865_v6 = vld [vmem:[#allocation15_spill] sm:$0xff] }
 0x202   : > { %v878_v40 = vmul.f32 %v1568_v17, %v858_v41  ;;  %v879_v60 = vmul.f32 %v1582_v36, %v861_v35  ;;  %v838_v22 = vadd.f32 %v832_v8, %v769_v29  ;;  %v839_v46 = vadd.f32 %v833_v61, %v770_v49  ;;  %v1866_v41 = vld [vmem:[#allocation16_spill] sm:$0xff]  ;;  %v1868_v49 = vld [vmem:[#allocation2_spill] sm:$0xff] }
 0x203   : > { %v1867_v29 = vld [vmem:[#allocation4_spill] sm:$0xff] }
 0x204   : > { %v903_v50 = vmul.f32 %v1431_v43, %v878_v40  ;;  %v904_v37 = vmul.f32 %v1431_v43, %v879_v60  ;;  %v1698_v56 = vpop.permute.xlu1 %710  ;;  %v920_v26 = vpop.permute.xlu0 %919  ;;  %v907_v53 = vadd.f32 %v901_v62, %v838_v22  ;;  %v908_v18 = vadd.f32 %v902_v34, %v839_v46  ;;  %v1869_v60 = vld [vmem:[#allocation7_spill] sm:$0xff]  ;;  %v1871_v62 = vld [vmem:[#allocation5_spill] sm:$0xff] }
 0x205   : > { %v926_v55 = vsel %vm925_vm8, %v1470_v4, %v920_v26  ;;  %v929_v5 = vsel %vm925_vm8, %v920_v26, %v1470_v4  ;;  %v428_v40 = vmul.f32 %v1868_v49, %v1867_v29  ;;  %v1870_v46 = vld [vmem:[#allocation3_spill] sm:$0xff]  ;;  %v1876_v29 = vld [vmem:[#allocation9_spill] sm:$0xff] }
 0x206   : > { %v1709_v25 = vadd.f32 %v903_v50, %v840_v24  ;;  %v1711_v39 = vadd.f32 %v904_v37, %v841_v2  ;;  %v945_v43 = vmul.f32 %v1585_v23, %v926_v55  ;;  %v946_v10 = vmul.f32 %v1587_v27, %v929_v5 }
 0x207   : > { %v429_v24 = vmul.f32 %v1868_v49, %v1869_v60 }
 0x208   : > { %v970_v44 = vmul.f32 %v1864_v33, %v945_v43  ;;  %v971_v58 = vmul.f32 %v1864_v33, %v946_v10  ;;  %v1717_v21 = vpop.permute.xlu1 %779  ;;  %v504_v42 = vpop.permute.xlu0 %503  ;;  %v1872_v10 = vld [vmem:[#allocation8_spill] sm:$0xff] }
 0x20a   : > { %v976_v4 = vadd.f32 %v970_v44, %v907_v53  ;;  %v977_v59 = vadd.f32 %v971_v58, %v908_v18 }
 0x20c   : > { %982 = vst [vmem:[%s1722_s29] sm:$0xff] %v976_v4  ;;  %983 = vst [vmem:[%s1722_s29 + $0x8] sm:$0xff] %v977_v59  ;;  %v1726_v19 = vpop.permute.xlu1 %917  ;;  %v642_v16 = vpop.permute.xlu0 %641  ;;  %v1873_v4 = vld [vmem:[#allocation6_spill] sm:$0xff] }
 0x210   : > { %v510_v54 = vpop.permute.xlu1 %509  ;;  %v849_v1 = vpop.permute.xlu0 %848 }
 0x211   : > { %v514_v7 = vsel %vm511_vm2, %v504_v42, %v510_v54  ;;  %v517_v20 = vsel %vm511_vm2, %v510_v54, %v504_v42 }
 0x212   : > { %v535_v61 = vmul.f32 %v1510_v11, %v517_v20  ;;  %v536_v52 = vmul.f32 %v1512_v47, %v514_v7 }
 0x214   : > { %v648_v0 = vpop.permute.xlu1 %647  ;;  %v441_v45 = vpop.permute.xlu0 %440  ;;  %v560_v34 = vmul.f32 %v1871_v62, %v535_v61 }
 0x215   : > { %v652_v57 = vsel %vm649_vm4, %v642_v16, %v648_v0  ;;  %v655_v32 = vsel %vm649_vm4, %v648_v0, %v642_v16  ;;  %v447_v30 = vsel %vm444_vm1, %v1666_v9, %v441_v45  ;;  %v450_v8 = vsel %vm444_vm1, %v441_v45, %v1666_v9  ;;  %v1874_v16 = vld [vmem:[#allocation17_spill] sm:$0xff] }
 0x216   : > { %v467_v28 = vmul.f32 %v1865_v6, %v450_v8  ;;  %v468_v35 = vmul.f32 %v1866_v41, %v447_v30  ;;  %v673_v2 = vmul.f32 %v1540_v51, %v655_v32  ;;  %v674_v22 = vmul.f32 %v1546_v38, %v652_v57 }
 0x217   : > { %v561_v51 = vmul.f32 %v1871_v62, %v536_v52  ;;  %v1875_v52 = vld [vmem:[#allocation14_spill] sm:$0xff] }
 0x218   : > { %v491_v9 = vmul.f32 %v1870_v46, %v467_v28  ;;  %v492_v11 = vmul.f32 %v1870_v46, %v468_v35  ;;  %v855_v50 = vpop.permute.xlu1 %854  ;;  %v579_v47 = vpop.permute.xlu0 %578  ;;  %v698_v53 = vmul.f32 %v1872_v10, %v673_v2  ;;  %v699_v18 = vmul.f32 %v1872_v10, %v674_v22 }
 0x219   : > { %v583_v37 = vsel %vm580_vm3, %v1684_v3, %v579_v47  ;;  %v586_v26 = vsel %vm580_vm3, %v579_v47, %v1684_v3  ;;  %v859_v8 = vsel %vm856_vm7, %v849_v1, %v855_v50  ;;  %v862_v61 = vsel %vm856_vm7, %v855_v50, %v849_v1 }
 0x21a   : > { %v497_v55 = vadd.f32 %v491_v9, %v428_v40  ;;  %v498_v38 = vadd.f32 %v492_v11, %v429_v24  ;;  %v604_v5 = vmul.f32 %v1527_v13, %v586_v26  ;;  %v605_v43 = vmul.f32 %v1529_v14, %v583_v37  ;;  %v1877_v11 = vld [vmem:[#allocation10_spill] sm:$0xff] }
 0x21b   : > { %v880_v24 = vmul.f32 %v1568_v17, %v859_v8  ;;  %v881_v2 = vmul.f32 %v1582_v36, %v862_v61 }
 0x21c   : > { %v566_v33 = vadd.f32 %v560_v34, %v497_v55  ;;  %v567_v44 = vadd.f32 %v561_v51, %v498_v38  ;;  %v922_v58 = vpop.permute.xlu1 %921  ;;  %v717_v42 = vpop.permute.xlu0 %716  ;;  %v629_v3 = vmul.f32 %v1873_v4, %v604_v5  ;;  %v630_v59 = vmul.f32 %v1873_v4, %v605_v43  ;;  %v1879_v51 = vld [vmem:[#allocation13_spill] sm:$0xff] }
 0x21d   : > { %v927_v54 = vsel %vm925_vm8, %v1874_v16, %v922_v58  ;;  %v930_v13 = vsel %vm925_vm8, %v922_v58, %v1874_v16  ;;  %v721_v20 = vsel %vm718_vm5, %v1698_v56, %v717_v42  ;;  %v724_v0 = vsel %vm718_vm5, %v717_v42, %v1698_v56 }
 0x21e   : > { %v947_v14 = vmul.f32 %v1585_v23, %v927_v54  ;;  %v948_v7 = vmul.f32 %v1587_v27, %v930_v13  ;;  %v635_v45 = vadd.f32 %v629_v3, %v566_v33  ;;  %v636_v57 = vadd.f32 %v630_v59, %v567_v44 }
 0x21f   : > { %v742_v32 = vmul.f32 %v1550_v48, %v721_v20  ;;  %v743_v30 = vmul.f32 %v1554_v15, %v724_v0 }
 0x220   : > { %v972_v6 = vmul.f32 %v1875_v52, %v947_v14  ;;  %v973_v28 = vmul.f32 %v1875_v52, %v948_v7  ;;  %v786_v41 = vpop.permute.xlu0 %785  ;;  %v704_v56 = vadd.f32 %v698_v53, %v635_v45  ;;  %v705_v35 = vadd.f32 %v699_v18, %v636_v57 }
 0x221   : > { %v767_v49 = vmul.f32 %v1876_v29, %v742_v32  ;;  %v768_v48 = vmul.f32 %v1876_v29, %v743_v30  ;;  %v790_v1 = vsel %vm787_vm6, %v1717_v21, %v786_v41  ;;  %v793_v60 = vsel %vm787_vm6, %v786_v41, %v1717_v21  ;;  %v1878_v21 = vld [vmem:[#allocation12_spill] sm:$0xff] }
 0x222   : > { %v978_v15 = vadd.f32 %v972_v6, %v1709_v25  ;;  %v979_v40 = vadd.f32 %v973_v28, %v1711_v39  ;;  %v811_v22 = vmul.f32 %v1557_v31, %v790_v1  ;;  %v812_v46 = vmul.f32 %v1565_v12, %v793_v60 }
 0x223   : > { %v773_v25 = vadd.f32 %v767_v49, %v704_v56  ;;  %v774_v39 = vadd.f32 %v768_v48, %v705_v35  ;;  %v905_v37 = vmul.f32 %v1878_v21, %v880_v24  ;;  %v906_v26 = vmul.f32 %v1878_v21, %v881_v2 }
 0x224   : > { %984 = vst [vmem:[%s1722_s29 + $0x10] sm:$0xff] %v978_v15  ;;  %985 = vst [vmem:[%s1722_s29 + $0x18] sm:$0xff] %v979_v40  ;;  %v924_v9 = vpop.permute.xlu0 %923  ;;  %v836_v50 = vmul.f32 %v1877_v11, %v811_v22  ;;  %v837_v47 = vmul.f32 %v1877_v11, %v812_v46 }
 0x225   : > { %v928_v17 = vsel %vm925_vm8, %v1726_v19, %v924_v9  ;;  %v931_v31 = vsel %vm925_vm8, %v924_v9, %v1726_v19 }
 0x226   : > { %v949_v36 = vmul.f32 %v1585_v23, %v928_v17  ;;  %v950_v12 = vmul.f32 %v1587_v27, %v931_v31  ;;  %v842_v62 = vadd.f32 %v836_v50, %v773_v25  ;;  %v843_v34 = vadd.f32 %v837_v47, %v774_v39 }
 0x228   : > { %v974_v55 = vmul.f32 %v1879_v51, %v949_v36  ;;  %v975_v38 = vmul.f32 %v1879_v51, %v950_v12  ;;  %v911_v5 = vadd.f32 %v905_v37, %v842_v62  ;;  %v912_v43 = vadd.f32 %v906_v26, %v843_v34 }
 0x22a   : > { %v980_v10 = vadd.f32 %v974_v55, %v911_v5  ;;  %v981_v53 = vadd.f32 %v975_v38, %v912_v43 }
 0x22c   : > { %986 = vst [vmem:[%s1722_s29 + $0x20] sm:$0xff] %v980_v10  ;;  %987 = vst [vmem:[%s1722_s29 + $0x28] sm:$0xff] %v981_v53 }
 0x22d PF: > { %s16_s21 = sadd.s32 1, %s1121_s21  }
 0x22e   : > { %p13_p4 = scmp.ge.s32.totalorder %s16_s21, 4  }
 0x230   :  { %15 = sbr.rel (!%p13_p4) target bundleno = 1 (0x1), region = 89 }

// kernel: transformer_block_forward.6
= control target key start
LH: loop header
LB: loop body
LE: loop exit
PB: predicated region body
PF: predicated region fallthrough
CT: control target
= control target key end

     0   :  { %s1342_s21 = smov 0   ;;  %s2193_s0 = inlined_call_operand.vmem [shape: f32[2,8,256], index: 0, kind: input, shape index: {}]   ;;  %s2194_s1 = inlined_call_operand.vmem [shape: f32[8,1], index: 1, kind: input, shape index: {}]   ;;  %s2195_s2 = inlined_call_operand.vmem [shape: f32[8,1], index: 2, kind: input, shape index: {}]   ;;  %s2196_s3 = inlined_call_operand.vmem [shape: f32[32,8], index: 3, kind: input, shape index: {}]   ;;  %s2197_s4 = inlined_call_operand.vmem [shape: f32[9,32,1], index: 4, kind: input, shape index: {}]   ;;  %s2198_s5 = inlined_call_operand.vmem [shape: f32[9,1,256], index: 5, kind: input, shape index: {}]   ;;  %s2199_s6 = inlined_call_operand.vmem [shape: f32[2,32,256], index: 6, kind: output, shape index: {}]  }
   0x1 LB: > { %s1207_s22 = sadd.s32 4294967295, %s1295_s21   ;;  %p1211_p0 = scmp.ge.s32.totalorder %s1295_s21, 1  ;;  %s1295_s21 = sphi %s1342_s21, %s16_s21  }
   0x2   : > { %p212_p1 = scmp.lt.s32.totalorder %s1295_s21, 3 }
   0x4   : > { %p213_p2 = pnand %p1211_p0, %p212_p1 }
   0x6   : > { %216 = sbr.rel (%p213_p2) target bundleno = 591 (0x24f), region = 44 }
   0xb   : > { %v293_v0 = vld [vmem:[%s2194_s1] sm:$0xff]  ;;  %v1297_v1 = vmov 0   ;;  %v1298_v3 = vmov 0.0   ;;  %v1222_v4 = vld [vmem:[%s2197_s4 + $0x90] sm:$0xff]  ;;  %p242_p3 = scmp.lt.s32.totalorder %s1207_s22, 1  ;;  %v1221_v24 = vld [vmem:[%s2197_s4 + $0x88] sm:$0xff] }
   0xc   : > { %1283 = vset.pattern.permute.xlu0 %v1297_v1  ;;  %1284 = vset.pattern.permute.xlu1 %v1297_v1  ;;  %v301_v2 = vld [vmem:[%s2195_s2] sm:$0xff]  ;;  %v497_v6 = vld [vmem:[%s2197_s4 + $0x10] sm:$0xff]  ;;  %v1223_v28 = vld [vmem:[%s2197_s4 + $0x98] sm:$0xff]  ;;  %vm313_vm0 = vcmask 64512   ;;  %s1299_s23 = smov 17   ;;  %s1300_s24 = smov 16  }
   0xd   : > { %296 = vperm.xlu0 %1283, %v293_v0   ;;  %390 = vmatprep.mubr.f32.mxu0 %v1298_v3  ;;  %v495_v5 = vld [vmem:[%s2197_s4] sm:$0xff]  ;;  %v1227_v8 = vld [vmem:[%s2197_s4 + $0x30] sm:$0xff]  ;;  %s2315_s22 = smov (!%p242_p3, %s1207_s22), 1  ;;  %v496_v32 = vld [vmem:[%s2197_s4 + $0x8] sm:$0xff]  ;;  %s1301_s25 = smov 15  }
   0xe   : > { %402 = vmatprep.mubr.f32.mxu1 %v1298_v3  ;;  %v1225_v7 = vld [vmem:[%s2197_s4 + $0x20] sm:$0xff]  ;;  %s1261_s15 = sshll.u32 %s2315_s22, 4  ;;  %v1232_v10 = vld [vmem:[%s2197_s4 + $0x50] sm:$0xff]  ;;  %v498_v36 = vld [vmem:[%s2197_s4 + $0x18] sm:$0xff]  ;;  %s1302_s26 = smov 1  }
   0xf   : > { %v1230_v9 = vld [vmem:[%s2197_s4 + $0x40] sm:$0xff]  ;;  %s246_s20 = scalar_lea.vmem %s2193_s0, %s1261_s15  ;;  %v1237_v14 = vld [vmem:[%s2197_s4 + $0x70] sm:$0xff]  ;;  %v1226_v40 = vld [vmem:[%s2197_s4 + $0x28] sm:$0xff]  ;;  %s1303_s27 = smov 127  }
  0x10   : > { %v1235_v11 = vld [vmem:[%s2197_s4 + $0x60] sm:$0xff]  ;;  %v253_v12 = vld [vmem:[%s246_s20 + $0x8] sm:$0xff]  ;;  %v1242_v21 = vld [vmem:[%s2197_s4 + $0xb0] sm:$0xff]  ;;  %s1304_s28 = smov 113   ;;  %s1305_s29 = smov 112  }
  0x11   : > { %304 = vperm.xlu0 %1283, %v301_v2   ;;  %v252_v13 = vld [vmem:[%s246_s20] sm:$0xff]  ;;  %v260_v15 = vrot.slane %v253_v12, 4  ;;  %v1247_v29 = vld [vmem:[%s2197_s4 + $0xd0] sm:$0xff]  ;;  %v1228_v44 = vld [vmem:[%s2197_s4 + $0x38] sm:$0xff]  ;;  %s1306_s30 = smov 111  }
  0x12   : > { %v254_v16 = vrot.slane %v252_v13, 4  ;;  %v1240_v17 = vld [vmem:[%s2197_s4 + $0xa0] sm:$0xff]  ;;  %v1252_v37 = vld [vmem:[%s2197_s4 + $0xf0] sm:$0xff]  ;;  %v1231_v47 = vld [vmem:[%s2197_s4 + $0x48] sm:$0xff] }
  0x13   : > { %v261_v18 = vadd.f32 %v260_v15, %v253_v12  ;;  %v1220_v20 = vld [vmem:[%s2197_s4 + $0x80] sm:$0xff]  ;;  %v1257_v45 = vld [vmem:[%s2197_s4 + $0x110] sm:$0xff]  ;;  %v1233_v50 = vld [vmem:[%s2197_s4 + $0x58] sm:$0xff] }
  0x14   : > { %v255_v19 = vadd.f32 %v254_v16, %v252_v13  ;;  %422 = vperm.xlu1 %1284, %v1220_v20   ;;  %v1245_v25 = vld [vmem:[%s2197_s4 + $0xc0] sm:$0xff]  ;;  %v1236_v53 = vld [vmem:[%s2197_s4 + $0x68] sm:$0xff]  ;;  %v1238_v56 = vld [vmem:[%s2197_s4 + $0x78] sm:$0xff] }
  0x15   : > { %432 = vperm.xlu0 %1283, %v1222_v4   ;;  %v262_v22 = vrot.slane %v261_v18, 2  ;;  %v1250_v33 = vld [vmem:[%s2197_s4 + $0xe0] sm:$0xff]  ;;  %v1241_v59 = vld [vmem:[%s2197_s4 + $0xa8] sm:$0xff]  ;;  %v1243_v62 = vld [vmem:[%s2197_s4 + $0xb8] sm:$0xff] }
  0x16   : > { %v256_v23 = vrot.slane %v255_v19, 2  ;;  %v1255_v41 = vld [vmem:[%s2197_s4 + $0x100] sm:$0xff]  ;;  %v1246_v1 = vld [vmem:[%s2197_s4 + $0xc8] sm:$0xff] }
  0x17   : > { %v263_v26 = vadd.f32 %v262_v22, %v261_v18 }
  0x18   : > { %427 = vperm.xlu1 %1284, %v1221_v24   ;;  %v257_v27 = vadd.f32 %v256_v23, %v255_v19  ;;  %v309_v23 = vld [vmem:[%s2196_s3] sm:$0xff]  ;;  %v311_v24 = vld [vmem:[%s2196_s3 + $0x10] sm:$0xff] }
  0x19   : > { %501 = vperm.xlu0 %1283, %v495_v5   ;;  %v264_v30 = vrot.slane %v263_v26, 1  ;;  %v1248_v5 = vld [vmem:[%s2197_s4 + $0xd8] sm:$0xff] }
  0x1a   : > { %v258_v31 = vrot.slane %v257_v27, 1 }
  0x1b   : > { %v265_v34 = vadd.f32 %v264_v30, %v263_v26  ;;  %v312_v26 = vld [vmem:[%s2196_s3 + $0x18] sm:$0xff] }
  0x1c   : > { %437 = vperm.xlu1 %1284, %v1223_v28   ;;  %v259_v35 = vadd.f32 %v258_v31, %v257_v27 }
  0x1d   : > { %511 = vperm.xlu0 %1283, %v497_v6   ;;  %v268_v38 = vmul.f32 0.125, %v265_v34 }
  0x1e   : > { %v267_v39 = vmul.f32 0.125, %v259_v35 }
  0x1f   : > { %v270_v42 = vsub.f32 %v253_v12, %v268_v38  ;;  %v1258_v12 = vld [vmem:[%s2197_s4 + $0x118] sm:$0xff] }
  0x20   : > { %506 = vperm.xlu1 %1284, %v496_v32   ;;  %v269_v43 = vsub.f32 %v252_v13, %v267_v39 }
  0x21   : > { %588 = vperm.xlu0 %1283, %v1225_v7   ;;  %v272_v46 = vmul.f32 %v270_v42, %v270_v42 }
  0x22   : > { %v271_v48 = vmul.f32 %v269_v43, %v269_v43 }
  0x23   : > { %v279_v49 = vrot.slane %v272_v46, 4 }
  0x24   : > { %516 = vperm.xlu1 %1284, %v498_v36   ;;  %v273_v51 = vrot.slane %v271_v48, 4 }
  0x25   : > { %598 = vperm.xlu0 %1283, %v1227_v8   ;;  %v280_v52 = vadd.f32 %v279_v49, %v272_v46  ;;  %v1251_v8 = vld [vmem:[%s2197_s4 + $0xe8] sm:$0xff] }
  0x26   : > { %v274_v54 = vadd.f32 %v273_v51, %v271_v48 }
  0x27   : > { %v281_v55 = vrot.slane %v280_v52, 2 }
  0x28   : > { %593 = vperm.xlu1 %1284, %v1226_v40   ;;  %v275_v57 = vrot.slane %v274_v54, 2 }
  0x29   : > { %675 = vperm.xlu0 %1283, %v1230_v9   ;;  %v282_v58 = vadd.f32 %v281_v55, %v280_v52 }
  0x2a   : > { %v276_v60 = vadd.f32 %v275_v57, %v274_v54 }
  0x2b   : > { %v283_v61 = vrot.slane %v282_v58, 1 }
  0x2c   : > { %603 = vperm.xlu1 %1284, %v1228_v44   ;;  %v277_v63 = vrot.slane %v276_v60, 1 }
  0x2d   : > { %685 = vperm.xlu0 %1283, %v1232_v10   ;;  %v284_v0 = vadd.f32 %v283_v61, %v282_v58  ;;  %v1253_v10 = vld [vmem:[%s2197_s4 + $0xf8] sm:$0xff] }
  0x2e   : > { %v278_v2 = vadd.f32 %v277_v63, %v276_v60 }
  0x2f   : > { %v286_v4 = vmul.f32 0.125, %v284_v0 }
  0x30   : > { %680 = vperm.xlu1 %1284, %v1231_v47   ;;  %v285_v6 = vmul.f32 0.125, %v278_v2 }
  0x31   : > { %762 = vperm.xlu0 %1283, %v1235_v11   ;;  %v288_v7 = vadd.f32 1e-05, %v286_v4  ;;  %v1256_v11 = vld [vmem:[%s2197_s4 + $0x108] sm:$0xff] }
  0x32   : > { %v287_v9 = vadd.f32 1e-05, %v285_v6 }
  0x33   : > { %1285 = vrsqrt.f32 %v288_v7 }
  0x34   : > { %690 = vperm.xlu1 %1284, %v1233_v50   ;;  %1287 = vrsqrt.f32 %v287_v9 }
  0x35   : > { %772 = vperm.xlu0 %1283, %v1237_v14  }
  0x38   : > { %767 = vperm.xlu1 %1284, %v1236_v53  }
  0x39   : > { %849 = vperm.xlu0 %1283, %v1240_v17  }
  0x3c   : > { %777 = vperm.xlu1 %1284, %v1238_v56  }
  0x3d   : > { %859 = vperm.xlu0 %1283, %v1242_v21  }
  0x40   : > { %854 = vperm.xlu1 %1284, %v1241_v59   ;;  %v1286_v13 = vpop.eup %1285 }
  0x41   : > { %936 = vperm.xlu0 %1283, %v1245_v25   ;;  %v1288_v14 = vpop.eup %1287  ;;  %v292_v15 = vmul.f32 %v1286_v13, %v270_v42  ;;  %v310_v25 = vld [vmem:[%s2196_s3 + $0x8] sm:$0xff] }
  0x42   : > { %v291_v16 = vmul.f32 %v1288_v14, %v269_v43 }
  0x44   : > { %864 = vperm.xlu1 %1284, %v1243_v62  }
  0x45   : > { %946 = vperm.xlu0 %1283, %v1247_v29  }
  0x48   : > { %941 = vperm.xlu1 %1284, %v1246_v1  }
  0x49   : > { %1023 = vperm.xlu0 %1283, %v1250_v33  }
  0x4c   : > { %951 = vperm.xlu1 %1284, %v1248_v5  }
  0x4d   : > { %1033 = vperm.xlu0 %1283, %v1252_v37  }
  0x50   : > { %1028 = vperm.xlu1 %1284, %v1251_v8  }
  0x51   : > { %1110 = vperm.xlu0 %1283, %v1255_v41  }
  0x54   : > { %1038 = vperm.xlu1 %1284, %v1253_v10  }
  0x55   : > { %1120 = vperm.xlu0 %1283, %v1257_v45  }
  0x58   : > { %1115 = vperm.xlu1 %1284, %v1256_v11  }
  0x5c   : > { %1125 = vperm.xlu1 %1284, %v1258_v12  }
  0x88   : > { %v297_v17 = vpop.permute.xlu0 %296 }
  0x89   : > { %v300_v18 = vmul.f32 %v297_v17, %v292_v15  ;;  %v299_v19 = vmul.f32 %v297_v17, %v291_v16 }
  0x8c   : > { %v305_v20 = vpop.permute.xlu0 %304 }
  0x8d   : > { %v308_v21 = vadd.f32 %v305_v20, %v300_v18  ;;  %v307_v22 = vadd.f32 %v305_v20, %v299_v19 }
  0x8f   : > { %356 = vmatprep.subr.mxu0 %v308_v21  ;;  %1263 = vmatprep.subr.mxu1 %v308_v21  ;;  %v1502_v31 = vpop.permute.xlu1 %422 }
  0x90   : > { %357 = vmatpush1.msra.mxu0 %v307_v22  ;;  %1264 = vmatpush1.msra.mxu1 %v307_v22  ;;  %v1516_v34 = vpop.permute.xlu0 %432 }
  0x91   : > { %1216 = vmatmul.mubr.msk.f32.vlgmr.msra.gmra.mxu0 %vm313_vm0, %v309_v23  ;;  %1218 = vmatmul.mubr.msk.f32.vlgmr.msra.gmra.mxu1 %vm313_vm0, %v311_v24 }
  0x92   : > { %396 = vmatprep.mubr.f32.mxu0 %v1298_v3  ;;  %408 = vmatprep.mubr.f32.mxu1 %v1298_v3 }
  0x93   : > { %v1510_v33 = vpop.permute.xlu1 %427 }
  0x94   : > { %v1524_v36 = vpop.permute.xlu0 %501 }
  0x95   : > { %1217 = vmatmul.mubr.msk.f32.gmra.mxu0 %vm313_vm0, %v310_v25  ;;  %1219 = vmatmul.mubr.msk.f32.gmra.mxu1 %vm313_vm0, %v312_v26 }
  0x97   : > { %v1522_v35 = vpop.permute.xlu1 %437 }
  0x98   : > { %v1536_v38 = vpop.permute.xlu0 %511 }
  0x9b   : > { %v1530_v37 = vpop.permute.xlu1 %506 }
  0x9c   : > { %v1544_v40 = vpop.permute.xlu0 %588 }
  0x9f   : > { %v1542_v39 = vpop.permute.xlu1 %516 }
  0xa0   : > { %v1556_v42 = vpop.permute.xlu0 %598 }
  0xa3   : > { %v1550_v41 = vpop.permute.xlu1 %593 }
  0xa4   : > { %v1564_v44 = vpop.permute.xlu0 %675 }
  0xa7   : > { %v1562_v43 = vpop.permute.xlu1 %603 }
  0xa8   : > { %v1576_v46 = vpop.permute.xlu0 %685 }
  0xab   : > { %v1570_v45 = vpop.permute.xlu1 %680 }
  0xac   : > { %v1584_v48 = vpop.permute.xlu0 %762 }
  0xaf   : > { %v1582_v47 = vpop.permute.xlu1 %690 }
  0xb0   : > { %v1596_v50 = vpop.permute.xlu0 %772 }
  0xb3   : > { %v1590_v49 = vpop.permute.xlu1 %767 }
  0xb4   : > { %v1606_v53 = vpop.permute.xlu0 %849 }
  0xb5   : > { %2239 = vst [vmem:[#allocation3_spill] sm:$0xff] %v1606_v53 }
  0xb7   : > { %v1602_v51 = vpop.permute.xlu1 %777 }
  0xb8   : > { %2238 = vst [vmem:[#allocation2_spill] sm:$0xff] %v1602_v51  ;;  %v1620_v56 = vpop.permute.xlu0 %859 }
  0xb9   : > { %2241 = vst [vmem:[#allocation5_spill] sm:$0xff] %v1620_v56 }
  0xbb   : > { %v1614_v55 = vpop.permute.xlu1 %854 }
  0xbc   : > { %2240 = vst [vmem:[#allocation4_spill] sm:$0xff] %v1614_v55  ;;  %v1628_v58 = vpop.permute.xlu0 %936 }
  0xbd   : > { %2243 = vst [vmem:[#allocation7_spill] sm:$0xff] %v1628_v58 }
  0xbf   : > { %v1626_v57 = vpop.permute.xlu1 %864 }
  0xc0   : > { %2242 = vst [vmem:[#allocation6_spill] sm:$0xff] %v1626_v57  ;;  %v1640_v60 = vpop.permute.xlu0 %946 }
  0xc1   : > { %2245 = vst [vmem:[#allocation9_spill] sm:$0xff] %v1640_v60 }
  0xc3   : > { %v1634_v59 = vpop.permute.xlu1 %941 }
  0xc4   : > { %2244 = vst [vmem:[#allocation8_spill] sm:$0xff] %v1634_v59  ;;  %v1648_v62 = vpop.permute.xlu0 %1023 }
  0xc5   : > { %2247 = vst [vmem:[#allocation11_spill] sm:$0xff] %v1648_v62 }
  0xc7   : > { %v1646_v61 = vpop.permute.xlu1 %951 }
  0xc8   : > { %2246 = vst [vmem:[#allocation10_spill] sm:$0xff] %v1646_v61  ;;  %v1660_v0 = vpop.permute.xlu0 %1033 }
  0xc9   : > { %2249 = vst [vmem:[#allocation13_spill] sm:$0xff] %v1660_v0 }
  0xcb   : > { %v1654_v63 = vpop.permute.xlu1 %1028 }
  0xcc   : > { %2248 = vst [vmem:[#allocation12_spill] sm:$0xff] %v1654_v63  ;;  %v1668_v2 = vpop.permute.xlu0 %1110  ;;  %v464_v63 = vlaneseq }
  0xcd   : > { %2251 = vst [vmem:[#allocation15_spill] sm:$0xff] %v1668_v2 }
  0xce   : > { %v478_v62 = vshrl.u32 %v464_v63, 7  ;;  %v1758_v57 = vand.u32 127, %v464_v63 }
  0xcf   : > { %v1666_v1 = vpop.permute.xlu1 %1038 }
  0xd0   : > { %2250 = vst [vmem:[#allocation14_spill] sm:$0xff] %v1666_v1  ;;  %v1680_v5 = vpop.permute.xlu0 %1120  ;;  %v479_v58 = vsub.s32 0, %v478_v62  ;;  %vm466_vm1 = vcmp.lt.s32.totalorder %v1758_v57, 17  ;;  %vm551_vm2 = vcmp.lt.s32.totalorder %v1758_v57, 16  ;;  %vm638_vm3 = vcmp.lt.s32.totalorder %v1758_v57, 15 }
  0xd1   : > { %2253 = vst [vmem:[#allocation17_spill] sm:$0xff] %v1680_v5  ;;  %vm725_vm4 = vcmp.lt.s32.totalorder %v1758_v57, 1  ;;  %vm812_vm5 = vcmp.lt.s32.totalorder %v1758_v57, 127  ;;  %vm899_vm6 = vcmp.lt.s32.totalorder %v1758_v57, 113  ;;  %vm986_vm7 = vcmp.lt.s32.totalorder %v1758_v57, 112 }
  0xd2   : > { %vm1073_vm8 = vcmp.lt.s32.totalorder %v1758_v57, 111 }
  0xd3   : > { %v1674_v4 = vpop.permute.xlu1 %1115 }
  0xd4   : > { %2252 = vst [vmem:[#allocation16_spill] sm:$0xff] %v1674_v4 }
  0xd7   : > { %v1686_v6 = vpop.permute.xlu1 %1125 }
  0xd8   : > { %2254 = vst [vmem:[#allocation18_spill] sm:$0xff] %v1686_v6 }
 0x151   : > { %v1486_v27 = vpop.f32.mrf.mxu0  ;;  %v1490_v28 = vpop.f32.mrf.mxu1 }
 0x152   : > { %448 = vrot.lane.b32.xlu0 %v1486_v27, %s1299_s23  ;;  %v440_v63 = vmul.f32 %v1502_v31, %v1486_v27 }
 0x153   : > { %v1492_v29 = vpop.f32.mrf.mxu0  ;;  %v1500_v3 = vpop.f32.mrf.mxu1 }
 0x155   : > { %v1494_v30 = vpop.f32.mrf.mxu0  ;;  %v1504_v32 = vpop.f32.mrf.mxu1 }
 0x156   : > { %452 = vrot.lane.b32.xlu0 %v1490_v28, %s1299_s23  ;;  %450 = vrot.lane.b32.xlu1 %v1494_v30, %s1299_s23 }
 0x157   : > { %v1604_v52 = vpop.f32.mrf.mxu0  ;;  %v1612_v54 = vpop.f32.mrf.mxu1 }
 0x15a   : > { %535 = vrot.lane.b32.xlu0 %v1486_v27, %s1300_s24  ;;  %454 = vrot.lane.b32.xlu1 %v1504_v32, %s1299_s23 }
 0x15e   : > { %539 = vrot.lane.b32.xlu0 %v1490_v28, %s1300_s24  ;;  %537 = vrot.lane.b32.xlu1 %v1494_v30, %s1300_s24 }
 0x162   : > { %622 = vrot.lane.b32.xlu0 %v1486_v27, %s1301_s25  ;;  %541 = vrot.lane.b32.xlu1 %v1504_v32, %s1300_s24 }
 0x166   : > { %626 = vrot.lane.b32.xlu0 %v1490_v28, %s1301_s25  ;;  %624 = vrot.lane.b32.xlu1 %v1494_v30, %s1301_s25 }
 0x16a   : > { %709 = vrot.lane.b32.xlu0 %v1486_v27, %s1302_s26  ;;  %628 = vrot.lane.b32.xlu1 %v1504_v32, %s1301_s25 }
 0x16e   : > { %713 = vrot.lane.b32.xlu0 %v1490_v28, %s1302_s26  ;;  %711 = vrot.lane.b32.xlu1 %v1494_v30, %s1302_s26 }
 0x172   : > { %796 = vrot.lane.b32.xlu0 %v1486_v27, %s1303_s27  ;;  %715 = vrot.lane.b32.xlu1 %v1504_v32, %s1302_s26 }
 0x176   : > { %800 = vrot.lane.b32.xlu0 %v1490_v28, %s1303_s27  ;;  %798 = vrot.lane.b32.xlu1 %v1494_v30, %s1303_s27 }
 0x17a   : > { %883 = vrot.lane.b32.xlu0 %v1486_v27, %s1304_s28  ;;  %802 = vrot.lane.b32.xlu1 %v1504_v32, %s1303_s27 }
 0x17e   : > { %887 = vrot.lane.b32.xlu0 %v1490_v28, %s1304_s28  ;;  %885 = vrot.lane.b32.xlu1 %v1494_v30, %s1304_s28 }
 0x182   : > { %970 = vrot.lane.b32.xlu0 %v1486_v27, %s1305_s29  ;;  %889 = vrot.lane.b32.xlu1 %v1504_v32, %s1304_s28 }
 0x186   : > { %974 = vrot.lane.b32.xlu0 %v1490_v28, %s1305_s29  ;;  %972 = vrot.lane.b32.xlu1 %v1494_v30, %s1305_s29 }
 0x18a   : > { %1057 = vrot.lane.b32.xlu0 %v1486_v27, %s1306_s30  ;;  %976 = vrot.lane.b32.xlu1 %v1504_v32, %s1305_s29  ;;  %v442_v27 = vmul.f32 %v1510_v33, %v1494_v30 }
 0x18e   : > { %1061 = vrot.lane.b32.xlu0 %v1490_v28, %s1306_s30  ;;  %1059 = vrot.lane.b32.xlu1 %v1494_v30, %s1306_s30 }
 0x192   : > { %456 = vrot.lane.b32.xlu0 %v1492_v29, %s1299_s23  ;;  %1063 = vrot.lane.b32.xlu1 %v1504_v32, %s1306_s30 }
 0x196   : > { %460 = vrot.lane.b32.xlu0 %v1500_v3, %s1299_s23  ;;  %458 = vrot.lane.b32.xlu1 %v1604_v52, %s1299_s23 }
 0x19a   : > { %543 = vrot.lane.b32.xlu0 %v1492_v29, %s1300_s24  ;;  %462 = vrot.lane.b32.xlu1 %v1612_v54, %s1299_s23 }
 0x19e   : > { %547 = vrot.lane.b32.xlu0 %v1500_v3, %s1300_s24  ;;  %545 = vrot.lane.b32.xlu1 %v1604_v52, %s1300_s24 }
 0x1a2   : > { %630 = vrot.lane.b32.xlu0 %v1492_v29, %s1301_s25  ;;  %549 = vrot.lane.b32.xlu1 %v1612_v54, %s1300_s24 }
 0x1a6   : > { %634 = vrot.lane.b32.xlu0 %v1500_v3, %s1301_s25  ;;  %632 = vrot.lane.b32.xlu1 %v1604_v52, %s1301_s25 }
 0x1aa   : > { %717 = vrot.lane.b32.xlu0 %v1492_v29, %s1302_s26  ;;  %636 = vrot.lane.b32.xlu1 %v1612_v54, %s1301_s25  ;;  %s1262_s25 = sshll.u32 %s2315_s22, 6 }
 0x1ae   : > { %721 = vrot.lane.b32.xlu0 %v1500_v3, %s1302_s26  ;;  %719 = vrot.lane.b32.xlu1 %v1604_v52, %s1302_s26 }
 0x1b2   : > { %804 = vrot.lane.b32.xlu0 %v1492_v29, %s1303_s27  ;;  %723 = vrot.lane.b32.xlu1 %v1612_v54, %s1302_s26 }
 0x1b6   : > { %808 = vrot.lane.b32.xlu0 %v1500_v3, %s1303_s27  ;;  %806 = vrot.lane.b32.xlu1 %v1604_v52, %s1303_s27 }
 0x1ba   : > { %891 = vrot.lane.b32.xlu0 %v1492_v29, %s1304_s28  ;;  %810 = vrot.lane.b32.xlu1 %v1612_v54, %s1303_s27  ;;  %s2162_s27 = scalar_lea.vmem %s2199_s6, %s1262_s25 }
 0x1be   : > { %895 = vrot.lane.b32.xlu0 %v1500_v3, %s1304_s28  ;;  %893 = vrot.lane.b32.xlu1 %v1604_v52, %s1304_s28 }
 0x1c2   : > { %978 = vrot.lane.b32.xlu0 %v1492_v29, %s1305_s29  ;;  %897 = vrot.lane.b32.xlu1 %v1612_v54, %s1304_s28 }
 0x1c4   : > { %v449_v7 = vpop.permute.xlu0 %448 }
 0x1c6   : > { %982 = vrot.lane.b32.xlu0 %v1500_v3, %s1305_s29  ;;  %980 = vrot.lane.b32.xlu1 %v1604_v52, %s1305_s29 }
 0x1c8   : > { %v1692_v8 = vpop.permute.xlu0 %452  ;;  %v1694_v9 = vpop.permute.xlu1 %450 }
 0x1ca   : > { %1065 = vrot.lane.b32.xlu0 %v1492_v29, %s1306_s30  ;;  %984 = vrot.lane.b32.xlu1 %v1612_v54, %s1305_s29 }
 0x1cc   : > { %v1700_v10 = vpop.permute.xlu0 %535  ;;  %v1702_v11 = vpop.permute.xlu1 %454 }
 0x1ce   : > { %1069 = vrot.lane.b32.xlu0 %v1500_v3, %s1306_s30  ;;  %1067 = vrot.lane.b32.xlu1 %v1604_v52, %s1306_s30 }
 0x1d0   : > { %v1708_v12 = vpop.permute.xlu0 %539  ;;  %v1710_v13 = vpop.permute.xlu1 %537 }
 0x1d2   : > { %1071 = vrot.lane.b32.xlu1 %v1612_v54, %s1306_s30 }
 0x1d4   : > { %v1714_v14 = vpop.permute.xlu0 %622  ;;  %v1716_v15 = vpop.permute.xlu1 %541 }
 0x1d8   : > { %v1718_v16 = vpop.permute.xlu0 %626  ;;  %v1720_v17 = vpop.permute.xlu1 %624 }
 0x1dc   : > { %v1722_v18 = vpop.permute.xlu0 %709  ;;  %v1724_v19 = vpop.permute.xlu1 %628 }
 0x1e0   : > { %v1726_v20 = vpop.permute.xlu0 %713  ;;  %v1728_v21 = vpop.permute.xlu1 %711 }
 0x1e4   : > { %v1730_v22 = vpop.permute.xlu0 %796  ;;  %v1732_v23 = vpop.permute.xlu1 %715 }
 0x1e5   : > { %2255 = vst [vmem:[#allocation19_spill] sm:$0xff] %v1730_v22  ;;  %2256 = vst [vmem:[#allocation20_spill] sm:$0xff] %v1732_v23 }
 0x1e8   : > { %v1734_v24 = vpop.permute.xlu0 %800  ;;  %v1736_v25 = vpop.permute.xlu1 %798 }
 0x1e9   : > { %2257 = vst [vmem:[#allocation21_spill] sm:$0xff] %v1734_v24  ;;  %2258 = vst [vmem:[#allocation22_spill] sm:$0xff] %v1736_v25 }
 0x1ec   : > { %v1738_v26 = vpop.permute.xlu0 %883  ;;  %v1740_v6 = vpop.permute.xlu1 %802 }
 0x1ed   : > { %2259 = vst [vmem:[#allocation23_spill] sm:$0xff] %v1738_v26  ;;  %2260 = vst [vmem:[#allocation24_spill] sm:$0xff] %v1740_v6 }
 0x1f0   : > { %v1742_v4 = vpop.permute.xlu0 %887  ;;  %v1744_v5 = vpop.permute.xlu1 %885 }
 0x1f1   : > { %2261 = vst [vmem:[#allocation25_spill] sm:$0xff] %v1742_v4  ;;  %2262 = vst [vmem:[#allocation26_spill] sm:$0xff] %v1744_v5  ;;  %v483_v4 = vsub.s32 1, %v478_v62  ;;  %v441_v62 = vmul.f32 %v1502_v31, %v1492_v29  ;;  %v1791_v29 = vmul.f32 %v1510_v33, %v1604_v52  ;;  %v1229_v31 = vld [vmem:[%s2198_s5 + $0x4] sm:$0x3] }
 0x1f2   : > { %v1239_v33 = vld [vmem:[%s2198_s5 + $0xa] sm:$0x3]  ;;  %v1821_v55 = vrot.slane %v1229_v31, %v479_v58 }
 0x1f3   : > { %v1836_v53 = vrot.slane %v1239_v33, %v483_v4 }
 0x1f4   : > { %v1746_v1 = vpop.permute.xlu0 %970  ;;  %v1748_v2 = vpop.permute.xlu1 %889 }
 0x1f5   : > { %2263 = vst [vmem:[#allocation27_spill] sm:$0xff] %v1746_v1  ;;  %2264 = vst [vmem:[#allocation28_spill] sm:$0xff] %v1748_v2  ;;  %v475_v1 = vld [vmem:[%s2198_s5] sm:$0x3] }
 0x1f6   : > { %2273 = vst [vmem:[#allocation37_spill] sm:$0xff] %v1836_v53 }
 0x1f8   : > { %v1750_v0 = vpop.permute.xlu0 %974  ;;  %v1752_v61 = vpop.permute.xlu1 %972 }
 0x1f9   : > { %2265 = vst [vmem:[#allocation29_spill] sm:$0xff] %v1750_v0  ;;  %2266 = vst [vmem:[#allocation30_spill] sm:$0xff] %v1752_v61  ;;  %v1768_v61 = vrot.slane %v475_v1, %v479_v58  ;;  %v1770_v0 = vrot.slane %v475_v1, %v483_v4  ;;  %v1785_v1 = vmul.f32 %v1516_v34, %v1500_v3  ;;  %v1234_v3 = vld [vmem:[%s2198_s5 + $0x6] sm:$0x3] }
 0x1fc   : > { %v1754_v59 = vpop.permute.xlu0 %1057  ;;  %v1756_v60 = vpop.permute.xlu1 %976 }
 0x1fd   : > { %2267 = vst [vmem:[#allocation31_spill] sm:$0xff] %v1754_v59  ;;  %2268 = vst [vmem:[#allocation32_spill] sm:$0xff] %v1756_v60  ;;  %v444_v60 = vmul.f32 %v1516_v34, %v1490_v28  ;;  %v1795_v28 = vmul.f32 %v1522_v35, %v1504_v32  ;;  %v1810_v32 = vmul.f32 %v1522_v35, %v1612_v54  ;;  %v1244_v54 = vld [vmem:[%s2198_s5 + $0xc] sm:$0x3] }
 0x1fe   : > { %v1827_v35 = vrot.slane %v1234_v3, %v483_v4  ;;  %v1863_v23 = vrot.slane %v1244_v54, %v483_v4 }
 0x200   : > { %v1763_v5 = vpop.permute.xlu0 %1061  ;;  %v1765_v2 = vpop.permute.xlu1 %1059 }
 0x201   : > { %2269 = vst [vmem:[#allocation33_spill] sm:$0xff] %v1763_v5  ;;  %2270 = vst [vmem:[#allocation34_spill] sm:$0xff] %v1765_v2  ;;  %v1224_v5 = vld [vmem:[%s2198_s5 + $0x2] sm:$0x3] }
 0x202   : > { %v1817_v6 = vrot.slane %v1224_v5, %v479_v58  ;;  %v1819_v26 = vrot.slane %v1224_v5, %v483_v4  ;;  %v1834_v5 = vrot.slane %v1239_v33, %v479_v58  ;;  %v1254_v33 = vld [vmem:[%s2198_s5 + $0x10] sm:$0x3] }
 0x204   : > { %v457_v2 = vpop.permute.xlu0 %456  ;;  %v1781_v59 = vpop.permute.xlu1 %1063  ;;  %2272 = vst [vmem:[#allocation36_spill] sm:$0xff] %v1834_v5  ;;  %v1858_v5 = vrot.slane %v1244_v54, %v479_v58 }
 0x205   : > { %2271 = vst [vmem:[#allocation35_spill] sm:$0xff] %v1781_v59  ;;  %v467_v34 = vsel %vm466_vm1, %v449_v7, %v457_v2  ;;  %v471_v30 = vsel %vm466_vm1, %v457_v2, %v449_v7  ;;  %v1823_v2 = vrot.slane %v1229_v31, %v483_v4  ;;  %v1825_v7 = vrot.slane %v1234_v3, %v479_v58  ;;  %v1249_v31 = vld [vmem:[%s2198_s5 + $0xe] sm:$0x3] }
 0x206   : > { %v487_v52 = vmul.f32 %v1768_v61, %v471_v30  ;;  %v488_v59 = vmul.f32 %v1770_v0, %v467_v34  ;;  %2274 = vst [vmem:[#allocation38_spill] sm:$0xff] %v1858_v5 }
 0x208   : > { %v519_v30 = vmul.f32 %v1524_v36, %v487_v52  ;;  %v520_v34 = vmul.f32 %v1524_v36, %v488_v59  ;;  %v461_v56 = vpop.permute.xlu0 %460  ;;  %v459_v51 = vpop.permute.xlu1 %458 }
 0x209   : > { %v469_v3 = vsel %vm466_vm1, %v1692_v8, %v461_v56  ;;  %v473_v52 = vsel %vm466_vm1, %v461_v56, %v1692_v8  ;;  %v468_v36 = vsel %vm466_vm1, %v1694_v9, %v459_v51  ;;  %v472_v59 = vsel %vm466_vm1, %v459_v51, %v1694_v9 }
 0x20a   : > { %v527_v25 = vadd.f32 %v519_v30, %v440_v63  ;;  %v491_v24 = vmul.f32 %v1768_v61, %v473_v52  ;;  %v492_v53 = vmul.f32 %v1770_v0, %v469_v3  ;;  %v489_v56 = vmul.f32 %v1768_v61, %v472_v59 }
 0x20b   : > { %v490_v8 = vmul.f32 %v1770_v0, %v468_v36  ;;  %v1865_v51 = vrot.slane %v1249_v31, %v479_v58  ;;  %v1868_v30 = vrot.slane %v1249_v31, %v483_v4  ;;  %v1870_v52 = vrot.slane %v1254_v33, %v479_v58 }
 0x20c   : > { %v523_v9 = vmul.f32 %v1536_v38, %v491_v24  ;;  %v544_v22 = vpop.permute.xlu0 %543  ;;  %v463_v63 = vpop.permute.xlu1 %462  ;;  %v1872_v3 = vrot.slane %v1254_v33, %v483_v4  ;;  %v528_v5 = vadd.f32 %v520_v34, %v441_v62  ;;  %v521_v59 = vmul.f32 %v1530_v37, %v489_v56 }
 0x20d   : > { %2275 = vst [vmem:[#allocation39_spill] sm:$0xff] %v1865_v51  ;;  %v552_v54 = vsel %vm551_vm2, %v1700_v10, %v544_v22  ;;  %v556_v36 = vsel %vm551_vm2, %v544_v22, %v1700_v10  ;;  %v524_v24 = vmul.f32 %v1536_v38, %v492_v53  ;;  %v522_v4 = vmul.f32 %v1530_v37, %v490_v8 }
 0x20e   : > { %v531_v51 = vadd.f32 %v523_v9, %v444_v60  ;;  %v573_v31 = vmul.f32 %v1817_v6, %v556_v36  ;;  %v574_v58 = vmul.f32 %v1819_v26, %v552_v54  ;;  %v529_v62 = vadd.f32 %v521_v59, %v442_v27 }
 0x20f   : > { %v470_v34 = vsel %vm466_vm1, %v1702_v11, %v463_v63  ;;  %v474_v33 = vsel %vm466_vm1, %v463_v63, %v1702_v11  ;;  %v532_v36 = vadd.f32 %v524_v24, %v1785_v1 }
 0x210   : > { %v606_v10 = vmul.f32 %v1544_v40, %v573_v31  ;;  %v607_v38 = vmul.f32 %v1544_v40, %v574_v58  ;;  %v493_v53 = vmul.f32 %v1768_v61, %v474_v33  ;;  %v494_v60 = vmul.f32 %v1770_v0, %v470_v34  ;;  %v548_v22 = vpop.permute.xlu0 %547  ;;  %v546_v56 = vpop.permute.xlu1 %545 }
 0x211   : > { %v554_v37 = vsel %vm551_vm2, %v1708_v12, %v548_v22  ;;  %v558_v27 = vsel %vm551_vm2, %v548_v22, %v1708_v12  ;;  %v553_v11 = vsel %vm551_vm2, %v1710_v13, %v546_v56  ;;  %v557_v40 = vsel %vm551_vm2, %v546_v56, %v1710_v13 }
 0x212   : > { %v614_v61 = vadd.f32 %v606_v10, %v527_v25  ;;  %v615_v0 = vadd.f32 %v607_v38, %v528_v5  ;;  %v525_v8 = vmul.f32 %v1542_v39, %v493_v53  ;;  %v526_v9 = vmul.f32 %v1542_v39, %v494_v60 }
 0x213   : > { %v577_v63 = vmul.f32 %v1817_v6, %v558_v27  ;;  %v578_v59 = vmul.f32 %v1819_v26, %v554_v37  ;;  %v575_v12 = vmul.f32 %v1817_v6, %v557_v40  ;;  %v576_v54 = vmul.f32 %v1819_v26, %v553_v11 }
 0x214   : > { %v530_v13 = vadd.f32 %v522_v4, %v1791_v29  ;;  %v533_v25 = vadd.f32 %v525_v8, %v1795_v28  ;;  %v534_v5 = vadd.f32 %v526_v9, %v1810_v32  ;;  %v631_v31 = vpop.permute.xlu0 %630  ;;  %v550_v39 = vpop.permute.xlu1 %549 }
 0x215   : > { %v610_v58 = vmul.f32 %v1556_v42, %v577_v63  ;;  %v611_v34 = vmul.f32 %v1556_v42, %v578_v59  ;;  %v608_v33 = vmul.f32 %v1550_v41, %v575_v12  ;;  %v609_v10 = vmul.f32 %v1550_v41, %v576_v54 }
 0x216   : > { %v639_v1 = vsel %vm638_vm3, %v1714_v14, %v631_v31  ;;  %v643_v29 = vsel %vm638_vm3, %v631_v31, %v1714_v14  ;;  %v555_v28 = vsel %vm551_vm2, %v1716_v15, %v550_v39  ;;  %v559_v42 = vsel %vm551_vm2, %v550_v39, %v1716_v15 }
 0x217   : > { %v618_v32 = vadd.f32 %v610_v58, %v531_v51  ;;  %v619_v24 = vadd.f32 %v611_v34, %v532_v36  ;;  %v616_v4 = vadd.f32 %v608_v33, %v529_v62  ;;  %v617_v41 = vadd.f32 %v609_v10, %v530_v13 }
 0x218   : > { %v660_v38 = vmul.f32 %v1821_v55, %v643_v29  ;;  %v661_v53 = vmul.f32 %v1823_v2, %v639_v1  ;;  %v579_v60 = vmul.f32 %v1817_v6, %v559_v42  ;;  %v580_v14 = vmul.f32 %v1819_v26, %v555_v28  ;;  %v635_v22 = vpop.permute.xlu0 %634  ;;  %v633_v56 = vpop.permute.xlu1 %632 }
 0x219   : > { %v641_v37 = vsel %vm638_vm3, %v1718_v16, %v635_v22  ;;  %v645_v15 = vsel %vm638_vm3, %v635_v22, %v1718_v16  ;;  %v640_v51 = vsel %vm638_vm3, %v1720_v17, %v633_v56  ;;  %v644_v6 = vsel %vm638_vm3, %v633_v56, %v1720_v17 }
 0x21a   : > { %v693_v26 = vmul.f32 %v1564_v44, %v660_v38  ;;  %v694_v62 = vmul.f32 %v1564_v44, %v661_v53  ;;  %v612_v27 = vmul.f32 %v1562_v43, %v579_v60  ;;  %v613_v11 = vmul.f32 %v1562_v43, %v580_v14 }
 0x21b   : > { %v664_v40 = vmul.f32 %v1821_v55, %v645_v15  ;;  %v665_v16 = vmul.f32 %v1823_v2, %v641_v37  ;;  %v662_v8 = vmul.f32 %v1821_v55, %v644_v6  ;;  %v663_v9 = vmul.f32 %v1823_v2, %v640_v51  ;;  %v2276_v6 = vld [vmem:[#allocation19_spill] sm:$0xff] }
 0x21c   : > { %v701_v63 = vadd.f32 %v693_v26, %v614_v61  ;;  %v702_v17 = vadd.f32 %v694_v62, %v615_v0  ;;  %v620_v59 = vadd.f32 %v612_v27, %v533_v25  ;;  %v621_v12 = vadd.f32 %v613_v11, %v534_v5  ;;  %v718_v54 = vpop.permute.xlu0 %717  ;;  %v637_v44 = vpop.permute.xlu1 %636  ;;  %v2277_v27 = vld [vmem:[#allocation20_spill] sm:$0xff] }
 0x21d   : > { %v697_v36 = vmul.f32 %v1576_v46, %v664_v40  ;;  %v698_v43 = vmul.f32 %v1576_v46, %v665_v16  ;;  %v695_v13 = vmul.f32 %v1570_v45, %v662_v8  ;;  %v696_v31 = vmul.f32 %v1570_v45, %v663_v9  ;;  %v2278_v9 = vld [vmem:[#allocation36_spill] sm:$0xff] }
 0x21e   : > { %v726_v39 = vsel %vm725_vm4, %v1722_v18, %v718_v54  ;;  %v730_v61 = vsel %vm725_vm4, %v718_v54, %v1722_v18  ;;  %v642_v0 = vsel %vm638_vm3, %v1724_v19, %v637_v44  ;;  %v646_v46 = vsel %vm638_vm3, %v637_v44, %v1724_v19 }
 0x21f   : > { %v705_v25 = vadd.f32 %v697_v36, %v618_v32  ;;  %v706_v5 = vadd.f32 %v698_v43, %v619_v24  ;;  %v703_v58 = vadd.f32 %v695_v13, %v616_v4  ;;  %v704_v45 = vadd.f32 %v696_v31, %v617_v41  ;;  %v2280_v43 = vld [vmem:[#allocation21_spill] sm:$0xff] }
 0x220   : > { %v747_v34 = vmul.f32 %v1825_v7, %v730_v61  ;;  %v748_v33 = vmul.f32 %v1827_v35, %v726_v39  ;;  %v666_v10 = vmul.f32 %v1821_v55, %v646_v46  ;;  %v667_v18 = vmul.f32 %v1823_v2, %v642_v0  ;;  %v722_v1 = vpop.permute.xlu0 %721  ;;  %v720_v29 = vpop.permute.xlu1 %719  ;;  %v2281_v39 = vld [vmem:[#allocation22_spill] sm:$0xff]  ;;  %v2282_v0 = vld [vmem:[#allocation3_spill] sm:$0xff] }
 0x221   : > { %v728_v28 = vsel %vm725_vm4, %v1726_v20, %v722_v1  ;;  %v732_v19 = vsel %vm725_vm4, %v722_v1, %v1726_v20  ;;  %v727_v42 = vsel %vm725_vm4, %v1728_v21, %v720_v29  ;;  %v731_v55 = vsel %vm725_vm4, %v720_v29, %v1728_v21 }
 0x222   : > { %v780_v2 = vmul.f32 %v1584_v48, %v747_v34  ;;  %v781_v32 = vmul.f32 %v1584_v48, %v748_v33  ;;  %v699_v24 = vmul.f32 %v1582_v47, %v666_v10  ;;  %v700_v4 = vmul.f32 %v1582_v47, %v667_v18 }
 0x223   : > { %v751_v41 = vmul.f32 %v1825_v7, %v732_v19  ;;  %v752_v20 = vmul.f32 %v1827_v35, %v728_v28  ;;  %v749_v38 = vmul.f32 %v1825_v7, %v731_v55  ;;  %v750_v53 = vmul.f32 %v1827_v35, %v727_v42  ;;  %v2284_v55 = vld [vmem:[#allocation5_spill] sm:$0xff] }
 0x224   : > { %v788_v60 = vadd.f32 %v780_v2, %v701_v63  ;;  %v789_v21 = vadd.f32 %v781_v32, %v702_v17  ;;  %v707_v14 = vadd.f32 %v699_v24, %v620_v59  ;;  %v708_v22 = vadd.f32 %v700_v4, %v621_v12  ;;  %v805_v56 = vpop.permute.xlu0 %804  ;;  %v724_v48 = vpop.permute.xlu1 %723  ;;  %v2279_v17 = vld [vmem:[#allocation37_spill] sm:$0xff]  ;;  %v2285_v24 = vld [vmem:[#allocation4_spill] sm:$0xff] }
 0x225   : > { %v784_v37 = vmul.f32 %v1596_v50, %v751_v41  ;;  %v785_v47 = vmul.f32 %v1596_v50, %v752_v20  ;;  %v782_v15 = vmul.f32 %v1590_v49, %v749_v38  ;;  %v783_v51 = vmul.f32 %v1590_v49, %v750_v53  ;;  %v2286_v20 = vld [vmem:[#allocation23_spill] sm:$0xff] }
 0x226   : > { %v813_v26 = vsel %vm812_vm5, %v2276_v6, %v805_v56  ;;  %v817_v62 = vsel %vm812_vm5, %v805_v56, %v2276_v6  ;;  %v729_v11 = vsel %vm725_vm4, %v2277_v27, %v724_v48  ;;  %v733_v50 = vsel %vm725_vm4, %v724_v48, %v2277_v27 }
 0x227   : > { %v792_v40 = vadd.f32 %v784_v37, %v705_v25  ;;  %v793_v16 = vadd.f32 %v785_v47, %v706_v5  ;;  %v790_v8 = vadd.f32 %v782_v15, %v703_v58  ;;  %v791_v49 = vadd.f32 %v783_v51, %v704_v45  ;;  %v2283_v25 = vld [vmem:[#allocation2_spill] sm:$0xff] }
 0x228   : > { %v834_v63 = vmul.f32 %v2278_v9, %v813_v26  ;;  %v835_v59 = vmul.f32 %v2279_v17, %v817_v62  ;;  %v753_v12 = vmul.f32 %v1825_v7, %v733_v50  ;;  %v754_v54 = vmul.f32 %v1827_v35, %v729_v11  ;;  %v809_v44 = vpop.permute.xlu0 %808  ;;  %v807_v36 = vpop.permute.xlu1 %806  ;;  %v2288_v47 = vld [vmem:[#allocation38_spill] sm:$0xff]  ;;  %v2289_v11 = vld [vmem:[#allocation25_spill] sm:$0xff] }
 0x229   : > { %v815_v13 = vsel %vm812_vm5, %v2280_v43, %v809_v44  ;;  %v819_v31 = vsel %vm812_vm5, %v809_v44, %v2280_v43  ;;  %v814_v61 = vsel %vm812_vm5, %v2281_v39, %v807_v36  ;;  %v818_v7 = vsel %vm812_vm5, %v807_v36, %v2281_v39 }
 0x22a   : > { %v867_v35 = vmul.f32 %v2282_v0, %v834_v63  ;;  %v868_v46 = vmul.f32 %v2282_v0, %v835_v59  ;;  %v786_v5 = vmul.f32 %v2283_v25, %v753_v12  ;;  %v787_v58 = vmul.f32 %v2283_v25, %v754_v54  ;;  %v2292_v59 = vld [vmem:[#allocation6_spill] sm:$0xff] }
 0x22b   : > { %v838_v45 = vmul.f32 %v2278_v9, %v815_v13  ;;  %v839_v34 = vmul.f32 %v2279_v17, %v819_v31  ;;  %v836_v33 = vmul.f32 %v2278_v9, %v814_v61  ;;  %v837_v10 = vmul.f32 %v2279_v17, %v818_v7 }
 0x22c   : > { %v875_v18 = vadd.f32 %v867_v35, %v788_v60  ;;  %v876_v1 = vadd.f32 %v868_v46, %v789_v21  ;;  %v794_v29 = vadd.f32 %v786_v5, %v707_v14  ;;  %v795_v28 = vadd.f32 %v787_v58, %v708_v22  ;;  %v892_v19 = vpop.permute.xlu0 %891  ;;  %v811_v42 = vpop.permute.xlu1 %810  ;;  %v2287_v60 = vld [vmem:[#allocation24_spill] sm:$0xff]  ;;  %v2293_v46 = vld [vmem:[#allocation9_spill] sm:$0xff] }
 0x22d   : > { %v871_v2 = vmul.f32 %v2284_v55, %v838_v45  ;;  %v872_v32 = vmul.f32 %v2284_v55, %v839_v34  ;;  %v869_v4 = vmul.f32 %v2285_v24, %v836_v33  ;;  %v870_v41 = vmul.f32 %v2285_v24, %v837_v10  ;;  %v2294_v58 = vld [vmem:[#allocation8_spill] sm:$0xff]  ;;  %v2295_v33 = vld [vmem:[#allocation27_spill] sm:$0xff] }
 0x22e   : > { %v900_v38 = vsel %vm899_vm6, %v2286_v20, %v892_v19  ;;  %v904_v53 = vsel %vm899_vm6, %v892_v19, %v2286_v20  ;;  %v816_v21 = vsel %vm812_vm5, %v2287_v60, %v811_v42  ;;  %v820_v14 = vsel %vm812_vm5, %v811_v42, %v2287_v60  ;;  %v2298_v60 = vld [vmem:[#allocation29_spill] sm:$0xff] }
 0x22f   : > { %v879_v22 = vadd.f32 %v871_v2, %v792_v40  ;;  %v880_v56 = vadd.f32 %v872_v32, %v793_v16  ;;  %v877_v48 = vadd.f32 %v869_v4, %v790_v8  ;;  %v878_v37 = vadd.f32 %v870_v41, %v791_v49  ;;  %v2290_v16 = vld [vmem:[#allocation26_spill] sm:$0xff]  ;;  %v2297_v32 = vld [vmem:[#allocation39_spill] sm:$0xff] }
 0x230   : > { %v921_v15 = vmul.f32 %v2288_v47, %v900_v38  ;;  %v922_v51 = vmul.f32 %v1863_v23, %v904_v53  ;;  %v840_v6 = vmul.f32 %v2278_v9, %v816_v21  ;;  %v841_v26 = vmul.f32 %v2279_v17, %v820_v14  ;;  %v896_v62 = vpop.permute.xlu0 %895  ;;  %v894_v27 = vpop.permute.xlu1 %893  ;;  %v2291_v9 = vld [vmem:[#allocation7_spill] sm:$0xff] }
 0x231   : > { %v902_v50 = vsel %vm899_vm6, %v2289_v11, %v896_v62  ;;  %v906_v40 = vsel %vm899_vm6, %v896_v62, %v2289_v11  ;;  %v901_v8 = vsel %vm899_vm6, %v2290_v16, %v894_v27  ;;  %v905_v49 = vsel %vm899_vm6, %v894_v27, %v2290_v16 }
 0x232   : > { %v954_v63 = vmul.f32 %v2291_v9, %v921_v15  ;;  %v955_v17 = vmul.f32 %v2291_v9, %v922_v51  ;;  %v873_v12 = vmul.f32 %v2292_v59, %v840_v6  ;;  %v874_v54 = vmul.f32 %v2292_v59, %v841_v26  ;;  %v2301_v15 = vld [vmem:[#allocation10_spill] sm:$0xff] }
 0x233   : > { %v925_v44 = vmul.f32 %v2288_v47, %v902_v50  ;;  %v926_v36 = vmul.f32 %v1863_v23, %v906_v40  ;;  %v923_v43 = vmul.f32 %v2288_v47, %v901_v8  ;;  %v924_v13 = vmul.f32 %v1863_v23, %v905_v49 }
 0x234   : > { %v962_v31 = vadd.f32 %v954_v63, %v875_v18  ;;  %v963_v39 = vadd.f32 %v955_v17, %v876_v1  ;;  %v881_v61 = vadd.f32 %v873_v12, %v794_v29  ;;  %v882_v7 = vadd.f32 %v874_v54, %v795_v28  ;;  %v979_v0 = vpop.permute.xlu0 %978  ;;  %v898_v35 = vpop.permute.xlu1 %897  ;;  %v2296_v1 = vld [vmem:[#allocation28_spill] sm:$0xff]  ;;  %v2302_v63 = vld [vmem:[#allocation13_spill] sm:$0xff] }
 0x235   : > { %v958_v25 = vmul.f32 %v2293_v46, %v925_v44  ;;  %v959_v5 = vmul.f32 %v2293_v46, %v926_v36  ;;  %v956_v45 = vmul.f32 %v2294_v58, %v923_v43  ;;  %v957_v34 = vmul.f32 %v2294_v58, %v924_v13  ;;  %v2303_v12 = vld [vmem:[#allocation12_spill] sm:$0xff]  ;;  %v2304_v36 = vld [vmem:[#allocation31_spill] sm:$0xff] }
 0x236   : > { %v987_v10 = vsel %vm986_vm7, %v2295_v33, %v979_v0  ;;  %v991_v18 = vsel %vm986_vm7, %v979_v0, %v2295_v33  ;;  %v903_v29 = vsel %vm899_vm6, %v2296_v1, %v898_v35  ;;  %v907_v28 = vsel %vm899_vm6, %v898_v35, %v2296_v1 }
 0x237   : > { %v966_v19 = vadd.f32 %v958_v25, %v879_v22  ;;  %v967_v42 = vadd.f32 %v959_v5, %v880_v56  ;;  %v964_v55 = vadd.f32 %v956_v45, %v877_v48  ;;  %v965_v2 = vadd.f32 %v957_v34, %v878_v37  ;;  %v2299_v22 = vld [vmem:[#allocation30_spill] sm:$0xff]  ;;  %v2300_v37 = vld [vmem:[#allocation11_spill] sm:$0xff] }
 0x238   : > { %v1008_v24 = vmul.f32 %v2297_v32, %v987_v10  ;;  %v1009_v4 = vmul.f32 %v1868_v30, %v991_v18  ;;  %v927_v41 = vmul.f32 %v2288_v47, %v903_v29  ;;  %v928_v20 = vmul.f32 %v1863_v23, %v907_v28  ;;  %v983_v38 = vpop.permute.xlu0 %982  ;;  %v981_v53 = vpop.permute.xlu1 %980  ;;  %v2306_v10 = vld [vmem:[#allocation33_spill] sm:$0xff]  ;;  %v2307_v29 = vld [vmem:[#allocation34_spill] sm:$0xff] }
 0x239   : > { %v989_v21 = vsel %vm986_vm7, %v2298_v60, %v983_v38  ;;  %v993_v14 = vsel %vm986_vm7, %v983_v38, %v2298_v60  ;;  %v988_v56 = vsel %vm986_vm7, %v2299_v22, %v981_v53  ;;  %v992_v48 = vsel %vm986_vm7, %v981_v53, %v2299_v22 }
 0x23a   : > { %v1041_v23 = vmul.f32 %v2300_v37, %v1008_v24  ;;  %v1042_v47 = vmul.f32 %v2300_v37, %v1009_v4  ;;  %v960_v51 = vmul.f32 %v2301_v15, %v927_v41  ;;  %v961_v6 = vmul.f32 %v2301_v15, %v928_v20 }
 0x23b   : > { %v1012_v26 = vmul.f32 %v2297_v32, %v989_v21  ;;  %v1013_v62 = vmul.f32 %v1868_v30, %v993_v14  ;;  %v1010_v27 = vmul.f32 %v2297_v32, %v988_v56  ;;  %v1011_v11 = vmul.f32 %v1868_v30, %v992_v48  ;;  %v2310_v56 = vld [vmem:[#allocation17_spill] sm:$0xff] }
 0x23c   : > { %v1049_v50 = vadd.f32 %v1041_v23, %v962_v31  ;;  %v1050_v40 = vadd.f32 %v1042_v47, %v963_v39  ;;  %v968_v16 = vadd.f32 %v960_v51, %v881_v61  ;;  %v969_v8 = vadd.f32 %v961_v6, %v882_v7  ;;  %v1066_v49 = vpop.permute.xlu0 %1065  ;;  %v985_v9 = vpop.permute.xlu1 %984  ;;  %v2305_v31 = vld [vmem:[#allocation32_spill] sm:$0xff]  ;;  %v2312_v51 = vld [vmem:[#allocation35_spill] sm:$0xff] }
 0x23d   : > { %v1045_v17 = vmul.f32 %v2302_v63, %v1012_v26  ;;  %v1046_v59 = vmul.f32 %v2302_v63, %v1013_v62  ;;  %v1043_v54 = vmul.f32 %v2303_v12, %v1010_v27  ;;  %v1044_v44 = vmul.f32 %v2303_v12, %v1011_v11  ;;  %v2311_v23 = vld [vmem:[#allocation16_spill] sm:$0xff] }
 0x23e   : > { %v1074_v43 = vsel %vm1073_vm8, %v2304_v36, %v1066_v49  ;;  %v1078_v13 = vsel %vm1073_vm8, %v1066_v49, %v2304_v36  ;;  %v990_v39 = vsel %vm986_vm7, %v2305_v31, %v985_v9  ;;  %v994_v61 = vsel %vm986_vm7, %v985_v9, %v2305_v31 }
 0x23f   : > { %v1053_v7 = vadd.f32 %v1045_v17, %v966_v19  ;;  %v1054_v0 = vadd.f32 %v1046_v59, %v967_v42  ;;  %v1051_v35 = vadd.f32 %v1043_v54, %v964_v55  ;;  %v1052_v46 = vadd.f32 %v1044_v44, %v965_v2  ;;  %v2308_v42 = vld [vmem:[#allocation15_spill] sm:$0xff]  ;;  %v2309_v2 = vld [vmem:[#allocation14_spill] sm:$0xff] }
 0x240   : > { %v1095_v25 = vmul.f32 %v1870_v52, %v1074_v43  ;;  %v1096_v5 = vmul.f32 %v1872_v3, %v1078_v13  ;;  %v1014_v58 = vmul.f32 %v2297_v32, %v990_v39  ;;  %v1015_v45 = vmul.f32 %v1868_v30, %v994_v61  ;;  %v1070_v34 = vpop.permute.xlu0 %1069  ;;  %v1068_v33 = vpop.permute.xlu1 %1067 }
 0x241   : > { %v1076_v18 = vsel %vm1073_vm8, %v2306_v10, %v1070_v34  ;;  %v1080_v1 = vsel %vm1073_vm8, %v1070_v34, %v2306_v10  ;;  %v1075_v28 = vsel %vm1073_vm8, %v2307_v29, %v1068_v33  ;;  %v1079_v19 = vsel %vm1073_vm8, %v1068_v33, %v2307_v29 }
 0x242   : > { %v1128_v30 = vmul.f32 %v2308_v42, %v1095_v25  ;;  %v1129_v55 = vmul.f32 %v2308_v42, %v1096_v5  ;;  %v1047_v32 = vmul.f32 %v2309_v2, %v1014_v58  ;;  %v1048_v24 = vmul.f32 %v2309_v2, %v1015_v45 }
 0x243   : > { %v1099_v4 = vmul.f32 %v1870_v52, %v1076_v18  ;;  %v1100_v41 = vmul.f32 %v1872_v3, %v1080_v1  ;;  %v1097_v20 = vmul.f32 %v1870_v52, %v1075_v28  ;;  %v1098_v38 = vmul.f32 %v1872_v3, %v1079_v19 }
 0x244   : > { %v1136_v53 = vadd.f32 %v1128_v30, %v1049_v50  ;;  %v1137_v60 = vadd.f32 %v1129_v55, %v1050_v40  ;;  %v1055_v21 = vadd.f32 %v1047_v32, %v968_v16  ;;  %v1056_v14 = vadd.f32 %v1048_v24, %v969_v8  ;;  %v1072_v22 = vpop.permute.xlu1 %1071  ;;  %v2313_v8 = vld [vmem:[#allocation18_spill] sm:$0xff] }
 0x245   : > { %v1132_v48 = vmul.f32 %v2310_v56, %v1099_v4  ;;  %v1133_v37 = vmul.f32 %v2310_v56, %v1100_v41  ;;  %v1130_v47 = vmul.f32 %v2311_v23, %v1097_v20  ;;  %v1131_v15 = vmul.f32 %v2311_v23, %v1098_v38 }
 0x246   : > { %1144 = vst [vmem:[%s2162_s27] sm:$0xff] %v1136_v53  ;;  %1145 = vst [vmem:[%s2162_s27 + $0x8] sm:$0xff] %v1137_v60  ;;  %v1077_v6 = vsel %vm1073_vm8, %v2312_v51, %v1072_v22  ;;  %v1081_v26 = vsel %vm1073_vm8, %v1072_v22, %v2312_v51 }
 0x247   : > { %v1140_v62 = vadd.f32 %v1132_v48, %v1053_v7  ;;  %v1141_v27 = vadd.f32 %v1133_v37, %v1054_v0  ;;  %v1138_v11 = vadd.f32 %v1130_v47, %v1051_v35  ;;  %v1139_v50 = vadd.f32 %v1131_v15, %v1052_v46 }
 0x248   : > { %v1101_v40 = vmul.f32 %v1870_v52, %v1077_v6  ;;  %v1102_v16 = vmul.f32 %v1872_v3, %v1081_v26 }
 0x249   : > { %1148 = vst [vmem:[%s2162_s27 + $0x20] sm:$0xff] %v1140_v62  ;;  %1149 = vst [vmem:[%s2162_s27 + $0x28] sm:$0xff] %v1141_v27 }
 0x24a   : > { %1146 = vst [vmem:[%s2162_s27 + $0x10] sm:$0xff] %v1138_v11  ;;  %1147 = vst [vmem:[%s2162_s27 + $0x18] sm:$0xff] %v1139_v50  ;;  %v1134_v49 = vmul.f32 %v2313_v8, %v1101_v40  ;;  %v1135_v9 = vmul.f32 %v2313_v8, %v1102_v16 }
 0x24c   : > { %v1142_v57 = vadd.f32 %v1134_v49, %v1055_v21  ;;  %v1143_v63 = vadd.f32 %v1135_v9, %v1056_v14 }
 0x24e   : > { %1150 = vst [vmem:[%s2162_s27 + $0x30] sm:$0xff] %v1142_v57  ;;  %1151 = vst [vmem:[%s2162_s27 + $0x38] sm:$0xff] %v1143_v63 }
 0x24f PF: > { %s16_s21 = sadd.s32 1, %s1295_s21  }
 0x250   : > { %p13_p4 = scmp.ge.s32.totalorder %s16_s21, 4  }
 0x252   :  { %15 = sbr.rel (!%p13_p4) target bundleno = 1 (0x1), region = 89 }

</bundles_post_ra>
